<compile_context>
chip_gen: v7x
topology: tpu7x:2x2x1
jax: 0.10.0
libtpu: 0.0.40
codegen_flags: <defaults>
</compile_context>

<pallas_src>
import jax
import jax.numpy as jnp
import numpy as np
from jax import lax
from jax.experimental import pallas as pl
from jax.experimental.pallas import tpu as pltpu

_HIGHEST = lax.Precision.HIGHEST


def _offdiag(n, d):
    """(n, n) f32 matrix M with M[i, j] = 1 iff j == i + d (else 0)."""
    i = lax.broadcasted_iota(jnp.int32, (n, n), 0)
    j = lax.broadcasted_iota(jnp.int32, (n, n), 1)
    return (j - i == d).astype(jnp.float32)


def frelu_kernel(w_ref, shift_ref, x_ref, o_ref):
    """One (c_blk, H, W) NCHW block of one batch element.

    w_ref:     (C*9,) f32 SMEM  depthwise 3x3 weights, BN scale folded in
    shift_ref: (C,)   f32 SMEM  folded BN shift
    x_ref:     (c_blk, H, W)    VMEM input block (activation dtype)
    o_ref:     (c_blk, H, W)    VMEM output block (activation dtype)
    """
    c_blk, H, W = x_ref.shape
    c_base = pl.program_id(1) * c_blk
    f32 = jnp.float32

    # ---- tap generators (hoisted out of the channel loop) -------------------
    # W (lane-axis) +-1 shifts: XLU roll + iota mask when lane-aligned,
    # otherwise an off-diagonal shift matrix on the (otherwise idle) MXU.
    if W % 128 == 0:
        cols = lax.broadcasted_iota(jnp.int32, (H, W), 1)
        col_lo = cols >= 1          # p[:, w-1] is inside the image
        col_hi = cols <= W - 2      # p[:, w+1] is inside the image

        def shift_cols(p, d):       # y[h, w] = p[h, w+d], zero outside
            mask = col_lo if d == -1 else col_hi
            return jnp.where(mask, pltpu.roll(p, (-d) % W, axis=1), 0.0)
    else:
        sup_w = _offdiag(W, 1)
        sub_w = _offdiag(W, -1)

        def shift_cols(p, d):       # y[h, w] = p[h, w+d], zero outside
            m = sub_w if d == 1 else sup_w
            return jnp.dot(p, m, precision=_HIGHEST,
                           preferred_element_type=f32)

    # H (sublane-axis) +-1 shifts via the MXU: the zero border falls out of the
    # matmul, so no padded scratch / boundary masks are needed.
    # TODO(synk): use sublane pltpu.roll for tile-aligned H once measured.
    sup_h = _offdiag(H, 1)
    sub_h = _offdiag(H, -1)

    def shift_rows(p, d):           # y[h, w] = p[h+d, w], zero outside
        m = sup_h if d == 1 else sub_h
        return jnp.dot(m, p, precision=_HIGHEST, preferred_element_type=f32)

    # ---- strip-mined 9-tap accumulation: one channel plane at a time --------
    def body(c, carry):
        cg = c_base + c             # global channel index
        wb = cg * 9
        xc = x_ref[c].astype(f32)   # (H, W) centre plane, single read

        r_up = shift_rows(xc, -1)   # x[h-1, w]
        r_dn = shift_rows(xc, 1)    # x[h+1, w]

        # Seed the accumulator with the centre tap + folded BN shift.
        acc = xc * w_ref[wb + 4] + shift_ref[cg]
        acc = acc + r_up * w_ref[wb + 1] + r_dn * w_ref[wb + 7]
        for kh, plane in ((0, r_up), (1, xc), (2, r_dn)):
            acc = acc + shift_cols(plane, -1) * w_ref[wb + 3 * kh]
            acc = acc + shift_cols(plane, 1) * w_ref[wb + 3 * kh + 2]

        # FReLU: max(x, BN(conv_dw(x))).
        o_ref[c] = jnp.maximum(xc, acc).astype(o_ref.dtype)
        return carry

    lax.fori_loop(0, c_blk, body, 0, unroll=min(c_blk, 8))


def _pick_channel_block(B, C, H, W, itemsize, budget_bytes=24 << 20):
    """Largest channel block whose double-buffered in+out footprint fits the
    byte budget (sized so it also fits v7x's 64 MiB VMEM with headroom)."""
    def resident(cb):   # ~2x in + 2x out blocks live per step (auto pipeline)
        return 4 * cb * H * W * itemsize

    best = 1
    for d in range(1, C + 1):
        if C % d == 0 and resident(d) <= budget_bytes:
            best = d
    # Keep >= 2 grid steps when possible so both v7x TensorCores get work.
    if B * (C // best) < 2:
        for d in range(best - 1, 0, -1):
            if C % d == 0:
                best = d
                break
    # TODO(synk): add an H-tile grid axis (with a 1-row halo) for very large
    # H*W where even c_blk == 1 exceeds the VMEM budget.
    return best


def frelu(x, conv_w, bn_gamma, bn_beta, bn_mean, bn_var, eps=1e-5):
    """x: (B, C, H, W); conv_w: (C, 1, 3, 3) depthwise weights.

    Matches PyTorch FReLU.forward with BatchNorm2d in eval mode (running stats
    folded into a per-channel scale/shift).
    """
    B, C, H, W = x.shape

    # Fold eval-mode BN into the conv: y = conv(x) * scale + shift.
    scale = bn_gamma.astype(jnp.float32) / jnp.sqrt(
        bn_var.astype(jnp.float32) + eps)                                  # (C,)
    shift = bn_beta.astype(jnp.float32) - bn_mean.astype(jnp.float32) * scale
    w_flat = (conv_w.reshape(C, 9).astype(jnp.float32)
              * scale[:, None]).reshape(C * 9)                             # (C*9,)

    itemsize = jnp.dtype(x.dtype).itemsize
    c_blk = _pick_channel_block(B, C, H, W, itemsize)
    grid = (B, C // c_blk)

    block_bytes = c_blk * H * W * itemsize
    vmem_limit = int(min(64 << 20, max(32 << 20, 6 * block_bytes)))

    block = (None, c_blk, H, W)   # batch dim squeezed away inside the kernel

    return pl.pallas_call(
        frelu_kernel,
        out_shape=jax.ShapeDtypeStruct((B, C, H, W), x.dtype),
        grid_spec=pltpu.PrefetchScalarGridSpec(
            num_scalar_prefetch=2,      # folded weights + BN shift -> SMEM once
            grid=grid,
            in_specs=[
                pl.BlockSpec(block, lambda b, cb, w_s, s_s: (b, cb, 0, 0)),
            ],
            out_specs=pl.BlockSpec(block, lambda b, cb, w_s, s_s: (b, cb, 0, 0)),
        ),
        compiler_params=pltpu.CompilerParams(
            dimension_semantics=("parallel", "parallel"),
            vmem_limit_bytes=vmem_limit),
    )(w_flat, shift, x)


def frelu_ref(x, conv_w, gamma, beta, mean, var, eps=1e-5):
    """Pure-JAX reference (depthwise conv + eval-mode BN + max)."""
    C = x.shape[1]
    y = lax.conv_general_dilated(
        x.astype(jnp.float32), conv_w.astype(jnp.float32),
        window_strides=(1, 1), padding=((1, 1), (1, 1)),
        dimension_numbers=("NCHW", "OIHW", "NCHW"),
        feature_group_count=C, precision=_HIGHEST)
    scale = gamma / jnp.sqrt(var + eps)
    y = y * scale[None, :, None, None] + (beta - mean * scale)[None, :, None, None]
    return jnp.maximum(x, y).astype(x.dtype)


def _make_inputs(key, B, C, H, W):
    k1, k2, k3, k4, k5, k6 = jax.random.split(key, 6)
    x = jax.random.normal(k1, (B, C, H, W), jnp.float32)
    conv_w = jax.random.normal(k2, (C, 1, 3, 3), jnp.float32) * (1.0 / 3.0)
    gamma = 1.0 + 0.1 * jax.random.normal(k3, (C,), jnp.float32)
    beta = 0.1 * jax.random.normal(k4, (C,), jnp.float32)
    mean = 0.05 * jax.random.normal(k5, (C,), jnp.float32)
    var = jnp.abs(jax.random.normal(k6, (C,), jnp.float32)) + 0.5
    return x, conv_w, gamma, beta, mean, var


if __name__ == "__main__":
    key = jax.random.PRNGKey(0)
    k_a, k_b = jax.random.split(key)

    # Primary demo shape (small, module-consistent): 16x16 planes take the
    # MXU shift-matrix tap path.
    args_a = _make_inputs(k_a, 2, 4, 16, 16)
    out_a = jax.block_until_ready(frelu(*args_a))
    np.testing.assert_allclose(np.asarray(out_a), np.asarray(frelu_ref(*args_a)),
                               rtol=2e-5, atol=2e-5)

    # Lane-aligned planes (W % 128 == 0) take the pltpu.roll tap path and use
    # two channel blocks (exercises SMEM weight indexing across grid steps).
    args_b = _make_inputs(k_b, 1, 4, 8, 128)
    out_b = jax.block_until_ready(frelu(*args_b))
    np.testing.assert_allclose(np.asarray(out_b), np.asarray(frelu_ref(*args_b)),
                               rtol=2e-5, atol=2e-5)

    print("KERNEL_OK")
</pallas_src>

<mosaic_0001>
module attributes {stable_mosaic.version = 11 : i64} {
  func.func @frelu_kernel(%arg0: i32, %arg1: i32, %arg2: memref<36xf32, #tpu.memory_space<smem>>, %arg3: memref<4xf32, #tpu.memory_space<smem>>, %arg4: memref<1x4x16x16xf32, #tpu.memory_space<vmem>>, %arg5: memref<1x4x16x16xf32, #tpu.memory_space<vmem>>) attributes {dimension_semantics = [#tpu.dimension_semantics<parallel>, #tpu.dimension_semantics<parallel>], iteration_bounds = array<i64: 2, 1>, scalar_prefetch = 2 : i64, scratch_operands = 0 : i64, tpu.core_type = #tpu.core_type<tc>, window_params = [{transform_indices = @transform_0, window_bounds = array<i64: 1, 4, 16, 16>}, {transform_indices = @transform_1, window_bounds = array<i64: 1, 4, 16, 16>}]} {
    %c4_i32 = arith.constant 4 : i32
    %0 = arith.muli %arg1, %c4_i32 : i32
    %1 = tpu.iota {dimensions = array<i32: 0>} : vector<16x16xi32>
    %2 = tpu.iota {dimensions = array<i32: 1>} : vector<16x16xi32>
    %3 = arith.subi %2, %1 : vector<16x16xi32>
    %c1_i32 = arith.constant 1 : i32
    %4 = vector.broadcast %c1_i32 : i32 to vector<16x16xi32>
    %5 = arith.cmpi eq, %3, %4 : vector<16x16xi32>
    %6 = arith.extui %5 : vector<16x16xi1> to vector<16x16xi32>
    %7 = arith.sitofp %6 : vector<16x16xi32> to vector<16x16xf32>
    %8 = tpu.iota {dimensions = array<i32: 0>} : vector<16x16xi32>
    %9 = tpu.iota {dimensions = array<i32: 1>} : vector<16x16xi32>
    %10 = arith.subi %9, %8 : vector<16x16xi32>
    %c-1_i32 = arith.constant -1 : i32
    %11 = vector.broadcast %c-1_i32 : i32 to vector<16x16xi32>
    %12 = arith.cmpi eq, %10, %11 : vector<16x16xi32>
    %13 = arith.extui %12 : vector<16x16xi1> to vector<16x16xi32>
    %14 = arith.sitofp %13 : vector<16x16xi32> to vector<16x16xf32>
    %15 = tpu.iota {dimensions = array<i32: 0>} : vector<16x16xi32>
    %16 = tpu.iota {dimensions = array<i32: 1>} : vector<16x16xi32>
    %17 = arith.subi %16, %15 : vector<16x16xi32>
    %c1_i32_0 = arith.constant 1 : i32
    %18 = vector.broadcast %c1_i32_0 : i32 to vector<16x16xi32>
    %19 = arith.cmpi eq, %17, %18 : vector<16x16xi32>
    %20 = arith.extui %19 : vector<16x16xi1> to vector<16x16xi32>
    %21 = arith.sitofp %20 : vector<16x16xi32> to vector<16x16xf32>
    %22 = tpu.iota {dimensions = array<i32: 0>} : vector<16x16xi32>
    %23 = tpu.iota {dimensions = array<i32: 1>} : vector<16x16xi32>
    %24 = arith.subi %23, %22 : vector<16x16xi32>
    %c-1_i32_1 = arith.constant -1 : i32
    %25 = vector.broadcast %c-1_i32_1 : i32 to vector<16x16xi32>
    %26 = arith.cmpi eq, %24, %25 : vector<16x16xi32>
    %27 = arith.extui %26 : vector<16x16xi1> to vector<16x16xi32>
    %28 = arith.sitofp %27 : vector<16x16xi32> to vector<16x16xf32>
    %c0_i32 = arith.constant 0 : i32
    %29 = arith.addi %0, %c0_i32 : i32
    %c9_i32 = arith.constant 9 : i32
    %30 = arith.muli %29, %c9_i32 : i32
    %c0 = arith.constant 0 : index
    %31 = arith.index_cast %c0_i32 : i32 to index
    %c0_2 = arith.constant 0 : index
    %c0_3 = arith.constant 0 : index
    %32 = vector.load %arg4[%c0, %31, %c0_2, %c0_3] : memref<1x4x16x16xf32, #tpu.memory_space<vmem>>, vector<1x1x16x16xf32>
    %33 = vector.shape_cast %32 : vector<1x1x16x16xf32> to vector<16x16xf32>
    %cst = arith.constant dense<0.000000e+00> : vector<16x16xf32>
    %34 = tpu.matmul %28, %33, %cst {dimension_numbers = #tpu.dot_dimension_numbers<[1], [0], [0], [1], [0, 0, 1, 1], [], []>, precision = #tpu.contract_precision<fp32>} : vector<16x16xf32>, vector<16x16xf32>, vector<16x16xf32> -> vector<16x16xf32>
    %cst_4 = arith.constant dense<0.000000e+00> : vector<16x16xf32>
    %35 = tpu.matmul %21, %33, %cst_4 {dimension_numbers = #tpu.dot_dimension_numbers<[1], [0], [0], [1], [0, 0, 1, 1], [], []>, precision = #tpu.contract_precision<fp32>} : vector<16x16xf32>, vector<16x16xf32>, vector<16x16xf32> -> vector<16x16xf32>
    %c4_i32_5 = arith.constant 4 : i32
    %36 = arith.addi %30, %c4_i32_5 : i32
    %37 = arith.index_cast %36 : i32 to index
    %38 = memref.load %arg2[%37] : memref<36xf32, #tpu.memory_space<smem>>
    %39 = vector.broadcast %38 : f32 to vector<16x16xf32>
    %40 = arith.mulf %33, %39 : vector<16x16xf32>
    %41 = arith.index_cast %29 : i32 to index
    %42 = memref.load %arg3[%41] : memref<4xf32, #tpu.memory_space<smem>>
    %43 = vector.broadcast %42 : f32 to vector<16x16xf32>
    %44 = arith.addf %40, %43 : vector<16x16xf32>
    %c1_i32_6 = arith.constant 1 : i32
    %45 = arith.addi %30, %c1_i32_6 : i32
    %46 = arith.index_cast %45 : i32 to index
    %47 = memref.load %arg2[%46] : memref<36xf32, #tpu.memory_space<smem>>
    %48 = vector.broadcast %47 : f32 to vector<16x16xf32>
    %49 = arith.mulf %34, %48 : vector<16x16xf32>
    %50 = arith.addf %44, %49 : vector<16x16xf32>
    %c7_i32 = arith.constant 7 : i32
    %51 = arith.addi %30, %c7_i32 : i32
    %52 = arith.index_cast %51 : i32 to index
    %53 = memref.load %arg2[%52] : memref<36xf32, #tpu.memory_space<smem>>
    %54 = vector.broadcast %53 : f32 to vector<16x16xf32>
    %55 = arith.mulf %35, %54 : vector<16x16xf32>
    %56 = arith.addf %50, %55 : vector<16x16xf32>
    %cst_7 = arith.constant dense<0.000000e+00> : vector<16x16xf32>
    %57 = tpu.matmul %34, %7, %cst_7 {dimension_numbers = #tpu.dot_dimension_numbers<[1], [0], [0], [1], [0, 0, 1, 1], [], []>, precision = #tpu.contract_precision<fp32>} : vector<16x16xf32>, vector<16x16xf32>, vector<16x16xf32> -> vector<16x16xf32>
    %c0_i32_8 = arith.constant 0 : i32
    %58 = arith.addi %30, %c0_i32_8 : i32
    %59 = arith.index_cast %58 : i32 to index
    %60 = memref.load %arg2[%59] : memref<36xf32, #tpu.memory_space<smem>>
    %61 = vector.broadcast %60 : f32 to vector<16x16xf32>
    %62 = arith.mulf %57, %61 : vector<16x16xf32>
    %63 = arith.addf %56, %62 : vector<16x16xf32>
    %cst_9 = arith.constant dense<0.000000e+00> : vector<16x16xf32>
    %64 = tpu.matmul %34, %14, %cst_9 {dimension_numbers = #tpu.dot_dimension_numbers<[1], [0], [0], [1], [0, 0, 1, 1], [], []>, precision = #tpu.contract_precision<fp32>} : vector<16x16xf32>, vector<16x16xf32>, vector<16x16xf32> -> vector<16x16xf32>
    %c0_i32_10 = arith.constant 0 : i32
    %65 = arith.addi %30, %c0_i32_10 : i32
    %c2_i32 = arith.constant 2 : i32
    %66 = arith.addi %65, %c2_i32 : i32
    %67 = arith.index_cast %66 : i32 to index
    %68 = memref.load %arg2[%67] : memref<36xf32, #tpu.memory_space<smem>>
    %69 = vector.broadcast %68 : f32 to vector<16x16xf32>
    %70 = arith.mulf %64, %69 : vector<16x16xf32>
    %71 = arith.addf %63, %70 : vector<16x16xf32>
    %cst_11 = arith.constant dense<0.000000e+00> : vector<16x16xf32>
    %72 = tpu.matmul %33, %7, %cst_11 {dimension_numbers = #tpu.dot_dimension_numbers<[1], [0], [0], [1], [0, 0, 1, 1], [], []>, precision = #tpu.contract_precision<fp32>} : vector<16x16xf32>, vector<16x16xf32>, vector<16x16xf32> -> vector<16x16xf32>
    %c3_i32 = arith.constant 3 : i32
    %73 = arith.addi %30, %c3_i32 : i32
    %74 = arith.index_cast %73 : i32 to index
    %75 = memref.load %arg2[%74] : memref<36xf32, #tpu.memory_space<smem>>
    %76 = vector.broadcast %75 : f32 to vector<16x16xf32>
    %77 = arith.mulf %72, %76 : vector<16x16xf32>
    %78 = arith.addf %71, %77 : vector<16x16xf32>
    %cst_12 = arith.constant dense<0.000000e+00> : vector<16x16xf32>
    %79 = tpu.matmul %33, %14, %cst_12 {dimension_numbers = #tpu.dot_dimension_numbers<[1], [0], [0], [1], [0, 0, 1, 1], [], []>, precision = #tpu.contract_precision<fp32>} : vector<16x16xf32>, vector<16x16xf32>, vector<16x16xf32> -> vector<16x16xf32>
    %c3_i32_13 = arith.constant 3 : i32
    %80 = arith.addi %30, %c3_i32_13 : i32
    %c2_i32_14 = arith.constant 2 : i32
    %81 = arith.addi %80, %c2_i32_14 : i32
    %82 = arith.index_cast %81 : i32 to index
    %83 = memref.load %arg2[%82] : memref<36xf32, #tpu.memory_space<smem>>
    %84 = vector.broadcast %83 : f32 to vector<16x16xf32>
    %85 = arith.mulf %79, %84 : vector<16x16xf32>
    %86 = arith.addf %78, %85 : vector<16x16xf32>
    %cst_15 = arith.constant dense<0.000000e+00> : vector<16x16xf32>
    %87 = tpu.matmul %35, %7, %cst_15 {dimension_numbers = #tpu.dot_dimension_numbers<[1], [0], [0], [1], [0, 0, 1, 1], [], []>, precision = #tpu.contract_precision<fp32>} : vector<16x16xf32>, vector<16x16xf32>, vector<16x16xf32> -> vector<16x16xf32>
    %c6_i32 = arith.constant 6 : i32
    %88 = arith.addi %30, %c6_i32 : i32
    %89 = arith.index_cast %88 : i32 to index
    %90 = memref.load %arg2[%89] : memref<36xf32, #tpu.memory_space<smem>>
    %91 = vector.broadcast %90 : f32 to vector<16x16xf32>
    %92 = arith.mulf %87, %91 : vector<16x16xf32>
    %93 = arith.addf %86, %92 : vector<16x16xf32>
    %cst_16 = arith.constant dense<0.000000e+00> : vector<16x16xf32>
    %94 = tpu.matmul %35, %14, %cst_16 {dimension_numbers = #tpu.dot_dimension_numbers<[1], [0], [0], [1], [0, 0, 1, 1], [], []>, precision = #tpu.contract_precision<fp32>} : vector<16x16xf32>, vector<16x16xf32>, vector<16x16xf32> -> vector<16x16xf32>
    %c6_i32_17 = arith.constant 6 : i32
    %95 = arith.addi %30, %c6_i32_17 : i32
    %c2_i32_18 = arith.constant 2 : i32
    %96 = arith.addi %95, %c2_i32_18 : i32
    %97 = arith.index_cast %96 : i32 to index
    %98 = memref.load %arg2[%97] : memref<36xf32, #tpu.memory_space<smem>>
    %99 = vector.broadcast %98 : f32 to vector<16x16xf32>
    %100 = arith.mulf %94, %99 : vector<16x16xf32>
    %101 = arith.addf %93, %100 : vector<16x16xf32>
    %102 = arith.maximumf %33, %101 : vector<16x16xf32>
    %c0_19 = arith.constant 0 : index
    %103 = arith.index_cast %c0_i32 : i32 to index
    %c0_20 = arith.constant 0 : index
    %c0_21 = arith.constant 0 : index
    %104 = vector.load %arg5[%c0_19, %103, %c0_20, %c0_21] : memref<1x4x16x16xf32, #tpu.memory_space<vmem>>, vector<1x1x16x16xf32>
    %105 = vector.shape_cast %104 : vector<1x1x16x16xf32> to vector<16x16xf32>
    %106 = vector.shape_cast %102 : vector<16x16xf32> to vector<1x1x16x16xf32>
    tpu.vector_store %arg5[%c0_19, %103, %c0_20, %c0_21], %106 {strides = array<i32>} : memref<1x4x16x16xf32, #tpu.memory_space<vmem>>, vector<1x1x16x16xf32>,
    %c1_i32_22 = arith.constant 1 : i32
    %107 = arith.addi %0, %c1_i32_22 : i32
    %c9_i32_23 = arith.constant 9 : i32
    %108 = arith.muli %107, %c9_i32_23 : i32
    %c0_24 = arith.constant 0 : index
    %109 = arith.index_cast %c1_i32_22 : i32 to index
    %c0_25 = arith.constant 0 : index
    %c0_26 = arith.constant 0 : index
    %110 = vector.load %arg4[%c0_24, %109, %c0_25, %c0_26] : memref<1x4x16x16xf32, #tpu.memory_space<vmem>>, vector<1x1x16x16xf32>
    %111 = vector.shape_cast %110 : vector<1x1x16x16xf32> to vector<16x16xf32>
    %cst_27 = arith.constant dense<0.000000e+00> : vector<16x16xf32>
    %112 = tpu.matmul %28, %111, %cst_27 {dimension_numbers = #tpu.dot_dimension_numbers<[1], [0], [0], [1], [0, 0, 1, 1], [], []>, precision = #tpu.contract_precision<fp32>} : vector<16x16xf32>, vector<16x16xf32>, vector<16x16xf32> -> vector<16x16xf32>
    %cst_28 = arith.constant dense<0.000000e+00> : vector<16x16xf32>
    %113 = tpu.matmul %21, %111, %cst_28 {dimension_numbers = #tpu.dot_dimension_numbers<[1], [0], [0], [1], [0, 0, 1, 1], [], []>, precision = #tpu.contract_precision<fp32>} : vector<16x16xf32>, vector<16x16xf32>, vector<16x16xf32> -> vector<16x16xf32>
    %c4_i32_29 = arith.constant 4 : i32
    %114 = arith.addi %108, %c4_i32_29 : i32
    %115 = arith.index_cast %114 : i32 to index
    %116 = memref.load %arg2[%115] : memref<36xf32, #tpu.memory_space<smem>>
    %117 = vector.broadcast %116 : f32 to vector<16x16xf32>
    %118 = arith.mulf %111, %117 : vector<16x16xf32>
    %119 = arith.index_cast %107 : i32 to index
    %120 = memref.load %arg3[%119] : memref<4xf32, #tpu.memory_space<smem>>
    %121 = vector.broadcast %120 : f32 to vector<16x16xf32>
    %122 = arith.addf %118, %121 : vector<16x16xf32>
    %c1_i32_30 = arith.constant 1 : i32
    %123 = arith.addi %108, %c1_i32_30 : i32
    %124 = arith.index_cast %123 : i32 to index
    %125 = memref.load %arg2[%124] : memref<36xf32, #tpu.memory_space<smem>>
    %126 = vector.broadcast %125 : f32 to vector<16x16xf32>
    %127 = arith.mulf %112, %126 : vector<16x16xf32>
    %128 = arith.addf %122, %127 : vector<16x16xf32>
    %c7_i32_31 = arith.constant 7 : i32
    %129 = arith.addi %108, %c7_i32_31 : i32
    %130 = arith.index_cast %129 : i32 to index
    %131 = memref.load %arg2[%130] : memref<36xf32, #tpu.memory_space<smem>>
    %132 = vector.broadcast %131 : f32 to vector<16x16xf32>
    %133 = arith.mulf %113, %132 : vector<16x16xf32>
    %134 = arith.addf %128, %133 : vector<16x16xf32>
    %cst_32 = arith.constant dense<0.000000e+00> : vector<16x16xf32>
    %135 = tpu.matmul %112, %7, %cst_32 {dimension_numbers = #tpu.dot_dimension_numbers<[1], [0], [0], [1], [0, 0, 1, 1], [], []>, precision = #tpu.contract_precision<fp32>} : vector<16x16xf32>, vector<16x16xf32>, vector<16x16xf32> -> vector<16x16xf32>
    %c0_i32_33 = arith.constant 0 : i32
    %136 = arith.addi %108, %c0_i32_33 : i32
    %137 = arith.index_cast %136 : i32 to index
    %138 = memref.load %arg2[%137] : memref<36xf32, #tpu.memory_space<smem>>
    %139 = vector.broadcast %138 : f32 to vector<16x16xf32>
    %140 = arith.mulf %135, %139 : vector<16x16xf32>
    %141 = arith.addf %134, %140 : vector<16x16xf32>
    %cst_34 = arith.constant dense<0.000000e+00> : vector<16x16xf32>
    %142 = tpu.matmul %112, %14, %cst_34 {dimension_numbers = #tpu.dot_dimension_numbers<[1], [0], [0], [1], [0, 0, 1, 1], [], []>, precision = #tpu.contract_precision<fp32>} : vector<16x16xf32>, vector<16x16xf32>, vector<16x16xf32> -> vector<16x16xf32>
    %c0_i32_35 = arith.constant 0 : i32
    %143 = arith.addi %108, %c0_i32_35 : i32
    %c2_i32_36 = arith.constant 2 : i32
    %144 = arith.addi %143, %c2_i32_36 : i32
    %145 = arith.index_cast %144 : i32 to index
    %146 = memref.load %arg2[%145] : memref<36xf32, #tpu.memory_space<smem>>
    %147 = vector.broadcast %146 : f32 to vector<16x16xf32>
    %148 = arith.mulf %142, %147 : vector<16x16xf32>
    %149 = arith.addf %141, %148 : vector<16x16xf32>
    %cst_37 = arith.constant dense<0.000000e+00> : vector<16x16xf32>
    %150 = tpu.matmul %111, %7, %cst_37 {dimension_numbers = #tpu.dot_dimension_numbers<[1], [0], [0], [1], [0, 0, 1, 1], [], []>, precision = #tpu.contract_precision<fp32>} : vector<16x16xf32>, vector<16x16xf32>, vector<16x16xf32> -> vector<16x16xf32>
    %c3_i32_38 = arith.constant 3 : i32
    %151 = arith.addi %108, %c3_i32_38 : i32
    %152 = arith.index_cast %151 : i32 to index
    %153 = memref.load %arg2[%152] : memref<36xf32, #tpu.memory_space<smem>>
    %154 = vector.broadcast %153 : f32 to vector<16x16xf32>
    %155 = arith.mulf %150, %154 : vector<16x16xf32>
    %156 = arith.addf %149, %155 : vector<16x16xf32>
    %cst_39 = arith.constant dense<0.000000e+00> : vector<16x16xf32>
    %157 = tpu.matmul %111, %14, %cst_39 {dimension_numbers = #tpu.dot_dimension_numbers<[1], [0], [0], [1], [0, 0, 1, 1], [], []>, precision = #tpu.contract_precision<fp32>} : vector<16x16xf32>, vector<16x16xf32>, vector<16x16xf32> -> vector<16x16xf32>
    %c3_i32_40 = arith.constant 3 : i32
    %158 = arith.addi %108, %c3_i32_40 : i32
    %c2_i32_41 = arith.constant 2 : i32
    %159 = arith.addi %158, %c2_i32_41 : i32
    %160 = arith.index_cast %159 : i32 to index
    %161 = memref.load %arg2[%160] : memref<36xf32, #tpu.memory_space<smem>>
    %162 = vector.broadcast %161 : f32 to vector<16x16xf32>
    %163 = arith.mulf %157, %162 : vector<16x16xf32>
    %164 = arith.addf %156, %163 : vector<16x16xf32>
    %cst_42 = arith.constant dense<0.000000e+00> : vector<16x16xf32>
    %165 = tpu.matmul %113, %7, %cst_42 {dimension_numbers = #tpu.dot_dimension_numbers<[1], [0], [0], [1], [0, 0, 1, 1], [], []>, precision = #tpu.contract_precision<fp32>} : vector<16x16xf32>, vector<16x16xf32>, vector<16x16xf32> -> vector<16x16xf32>
    %c6_i32_43 = arith.constant 6 : i32
    %166 = arith.addi %108, %c6_i32_43 : i32
    %167 = arith.index_cast %166 : i32 to index
    %168 = memref.load %arg2[%167] : memref<36xf32, #tpu.memory_space<smem>>
    %169 = vector.broadcast %168 : f32 to vector<16x16xf32>
    %170 = arith.mulf %165, %169 : vector<16x16xf32>
    %171 = arith.addf %164, %170 : vector<16x16xf32>
    %cst_44 = arith.constant dense<0.000000e+00> : vector<16x16xf32>
    %172 = tpu.matmul %113, %14, %cst_44 {dimension_numbers = #tpu.dot_dimension_numbers<[1], [0], [0], [1], [0, 0, 1, 1], [], []>, precision = #tpu.contract_precision<fp32>} : vector<16x16xf32>, vector<16x16xf32>, vector<16x16xf32> -> vector<16x16xf32>
    %c6_i32_45 = arith.constant 6 : i32
    %173 = arith.addi %108, %c6_i32_45 : i32
    %c2_i32_46 = arith.constant 2 : i32
    %174 = arith.addi %173, %c2_i32_46 : i32
    %175 = arith.index_cast %174 : i32 to index
    %176 = memref.load %arg2[%175] : memref<36xf32, #tpu.memory_space<smem>>
    %177 = vector.broadcast %176 : f32 to vector<16x16xf32>
    %178 = arith.mulf %172, %177 : vector<16x16xf32>
    %179 = arith.addf %171, %178 : vector<16x16xf32>
    %180 = arith.maximumf %111, %179 : vector<16x16xf32>
    %c0_47 = arith.constant 0 : index
    %181 = arith.index_cast %c1_i32_22 : i32 to index
    %c0_48 = arith.constant 0 : index
    %c0_49 = arith.constant 0 : index
    %182 = vector.load %arg5[%c0_47, %181, %c0_48, %c0_49] : memref<1x4x16x16xf32, #tpu.memory_space<vmem>>, vector<1x1x16x16xf32>
    %183 = vector.shape_cast %182 : vector<1x1x16x16xf32> to vector<16x16xf32>
    %184 = vector.shape_cast %180 : vector<16x16xf32> to vector<1x1x16x16xf32>
    tpu.vector_store %arg5[%c0_47, %181, %c0_48, %c0_49], %184 {strides = array<i32>} : memref<1x4x16x16xf32, #tpu.memory_space<vmem>>, vector<1x1x16x16xf32>,
    %c2_i32_50 = arith.constant 2 : i32
    %185 = arith.addi %0, %c2_i32_50 : i32
    %c9_i32_51 = arith.constant 9 : i32
    %186 = arith.muli %185, %c9_i32_51 : i32
    %c0_52 = arith.constant 0 : index
    %187 = arith.index_cast %c2_i32_50 : i32 to index
    %c0_53 = arith.constant 0 : index
    %c0_54 = arith.constant 0 : index
    %188 = vector.load %arg4[%c0_52, %187, %c0_53, %c0_54] : memref<1x4x16x16xf32, #tpu.memory_space<vmem>>, vector<1x1x16x16xf32>
    %189 = vector.shape_cast %188 : vector<1x1x16x16xf32> to vector<16x16xf32>
    %cst_55 = arith.constant dense<0.000000e+00> : vector<16x16xf32>
    %190 = tpu.matmul %28, %189, %cst_55 {dimension_numbers = #tpu.dot_dimension_numbers<[1], [0], [0], [1], [0, 0, 1, 1], [], []>, precision = #tpu.contract_precision<fp32>} : vector<16x16xf32>, vector<16x16xf32>, vector<16x16xf32> -> vector<16x16xf32>
    %cst_56 = arith.constant dense<0.000000e+00> : vector<16x16xf32>
    %191 = tpu.matmul %21, %189, %cst_56 {dimension_numbers = #tpu.dot_dimension_numbers<[1], [0], [0], [1], [0, 0, 1, 1], [], []>, precision = #tpu.contract_precision<fp32>} : vector<16x16xf32>, vector<16x16xf32>, vector<16x16xf32> -> vector<16x16xf32>
    %c4_i32_57 = arith.constant 4 : i32
    %192 = arith.addi %186, %c4_i32_57 : i32
    %193 = arith.index_cast %192 : i32 to index
    %194 = memref.load %arg2[%193] : memref<36xf32, #tpu.memory_space<smem>>
    %195 = vector.broadcast %194 : f32 to vector<16x16xf32>
    %196 = arith.mulf %189, %195 : vector<16x16xf32>
    %197 = arith.index_cast %185 : i32 to index
    %198 = memref.load %arg3[%197] : memref<4xf32, #tpu.memory_space<smem>>
    %199 = vector.broadcast %198 : f32 to vector<16x16xf32>
    %200 = arith.addf %196, %199 : vector<16x16xf32>
    %c1_i32_58 = arith.constant 1 : i32
    %201 = arith.addi %186, %c1_i32_58 : i32
    %202 = arith.index_cast %201 : i32 to index
    %203 = memref.load %arg2[%202] : memref<36xf32, #tpu.memory_space<smem>>
    %204 = vector.broadcast %203 : f32 to vector<16x16xf32>
    %205 = arith.mulf %190, %204 : vector<16x16xf32>
    %206 = arith.addf %200, %205 : vector<16x16xf32>
    %c7_i32_59 = arith.constant 7 : i32
    %207 = arith.addi %186, %c7_i32_59 : i32
    %208 = arith.index_cast %207 : i32 to index
    %209 = memref.load %arg2[%208] : memref<36xf32, #tpu.memory_space<smem>>
    %210 = vector.broadcast %209 : f32 to vector<16x16xf32>
    %211 = arith.mulf %191, %210 : vector<16x16xf32>
    %212 = arith.addf %206, %211 : vector<16x16xf32>
    %cst_60 = arith.constant dense<0.000000e+00> : vector<16x16xf32>
    %213 = tpu.matmul %190, %7, %cst_60 {dimension_numbers = #tpu.dot_dimension_numbers<[1], [0], [0], [1], [0, 0, 1, 1], [], []>, precision = #tpu.contract_precision<fp32>} : vector<16x16xf32>, vector<16x16xf32>, vector<16x16xf32> -> vector<16x16xf32>
    %c0_i32_61 = arith.constant 0 : i32
    %214 = arith.addi %186, %c0_i32_61 : i32
    %215 = arith.index_cast %214 : i32 to index
    %216 = memref.load %arg2[%215] : memref<36xf32, #tpu.memory_space<smem>>
    %217 = vector.broadcast %216 : f32 to vector<16x16xf32>
    %218 = arith.mulf %213, %217 : vector<16x16xf32>
    %219 = arith.addf %212, %218 : vector<16x16xf32>
    %cst_62 = arith.constant dense<0.000000e+00> : vector<16x16xf32>
    %220 = tpu.matmul %190, %14, %cst_62 {dimension_numbers = #tpu.dot_dimension_numbers<[1], [0], [0], [1], [0, 0, 1, 1], [], []>, precision = #tpu.contract_precision<fp32>} : vector<16x16xf32>, vector<16x16xf32>, vector<16x16xf32> -> vector<16x16xf32>
    %c0_i32_63 = arith.constant 0 : i32
    %221 = arith.addi %186, %c0_i32_63 : i32
    %c2_i32_64 = arith.constant 2 : i32
    %222 = arith.addi %221, %c2_i32_64 : i32
    %223 = arith.index_cast %222 : i32 to index
    %224 = memref.load %arg2[%223] : memref<36xf32, #tpu.memory_space<smem>>
    %225 = vector.broadcast %224 : f32 to vector<16x16xf32>
    %226 = arith.mulf %220, %225 : vector<16x16xf32>
    %227 = arith.addf %219, %226 : vector<16x16xf32>
    %cst_65 = arith.constant dense<0.000000e+00> : vector<16x16xf32>
    %228 = tpu.matmul %189, %7, %cst_65 {dimension_numbers = #tpu.dot_dimension_numbers<[1], [0], [0], [1], [0, 0, 1, 1], [], []>, precision = #tpu.contract_precision<fp32>} : vector<16x16xf32>, vector<16x16xf32>, vector<16x16xf32> -> vector<16x16xf32>
    %c3_i32_66 = arith.constant 3 : i32
    %229 = arith.addi %186, %c3_i32_66 : i32
    %230 = arith.index_cast %229 : i32 to index
    %231 = memref.load %arg2[%230] : memref<36xf32, #tpu.memory_space<smem>>
    %232 = vector.broadcast %231 : f32 to vector<16x16xf32>
    %233 = arith.mulf %228, %232 : vector<16x16xf32>
    %234 = arith.addf %227, %233 : vector<16x16xf32>
    %cst_67 = arith.constant dense<0.000000e+00> : vector<16x16xf32>
    %235 = tpu.matmul %189, %14, %cst_67 {dimension_numbers = #tpu.dot_dimension_numbers<[1], [0], [0], [1], [0, 0, 1, 1], [], []>, precision = #tpu.contract_precision<fp32>} : vector<16x16xf32>, vector<16x16xf32>, vector<16x16xf32> -> vector<16x16xf32>
    %c3_i32_68 = arith.constant 3 : i32
    %236 = arith.addi %186, %c3_i32_68 : i32
    %c2_i32_69 = arith.constant 2 : i32
    %237 = arith.addi %236, %c2_i32_69 : i32
    %238 = arith.index_cast %237 : i32 to index
    %239 = memref.load %arg2[%238] : memref<36xf32, #tpu.memory_space<smem>>
    %240 = vector.broadcast %239 : f32 to vector<16x16xf32>
    %241 = arith.mulf %235, %240 : vector<16x16xf32>
    %242 = arith.addf %234, %241 : vector<16x16xf32>
    %cst_70 = arith.constant dense<0.000000e+00> : vector<16x16xf32>
    %243 = tpu.matmul %191, %7, %cst_70 {dimension_numbers = #tpu.dot_dimension_numbers<[1], [0], [0], [1], [0, 0, 1, 1], [], []>, precision = #tpu.contract_precision<fp32>} : vector<16x16xf32>, vector<16x16xf32>, vector<16x16xf32> -> vector<16x16xf32>
    %c6_i32_71 = arith.constant 6 : i32
    %244 = arith.addi %186, %c6_i32_71 : i32
    %245 = arith.index_cast %244 : i32 to index
    %246 = memref.load %arg2[%245] : memref<36xf32, #tpu.memory_space<smem>>
    %247 = vector.broadcast %246 : f32 to vector<16x16xf32>
    %248 = arith.mulf %243, %247 : vector<16x16xf32>
    %249 = arith.addf %242, %248 : vector<16x16xf32>
    %cst_72 = arith.constant dense<0.000000e+00> : vector<16x16xf32>
    %250 = tpu.matmul %191, %14, %cst_72 {dimension_numbers = #tpu.dot_dimension_numbers<[1], [0], [0], [1], [0, 0, 1, 1], [], []>, precision = #tpu.contract_precision<fp32>} : vector<16x16xf32>, vector<16x16xf32>, vector<16x16xf32> -> vector<16x16xf32>
    %c6_i32_73 = arith.constant 6 : i32
    %251 = arith.addi %186, %c6_i32_73 : i32
    %c2_i32_74 = arith.constant 2 : i32
    %252 = arith.addi %251, %c2_i32_74 : i32
    %253 = arith.index_cast %252 : i32 to index
    %254 = memref.load %arg2[%253] : memref<36xf32, #tpu.memory_space<smem>>
    %255 = vector.broadcast %254 : f32 to vector<16x16xf32>
    %256 = arith.mulf %250, %255 : vector<16x16xf32>
    %257 = arith.addf %249, %256 : vector<16x16xf32>
    %258 = arith.maximumf %189, %257 : vector<16x16xf32>
    %c0_75 = arith.constant 0 : index
    %259 = arith.index_cast %c2_i32_50 : i32 to index
    %c0_76 = arith.constant 0 : index
    %c0_77 = arith.constant 0 : index
    %260 = vector.load %arg5[%c0_75, %259, %c0_76, %c0_77] : memref<1x4x16x16xf32, #tpu.memory_space<vmem>>, vector<1x1x16x16xf32>
    %261 = vector.shape_cast %260 : vector<1x1x16x16xf32> to vector<16x16xf32>
    %262 = vector.shape_cast %258 : vector<16x16xf32> to vector<1x1x16x16xf32>
    tpu.vector_store %arg5[%c0_75, %259, %c0_76, %c0_77], %262 {strides = array<i32>} : memref<1x4x16x16xf32, #tpu.memory_space<vmem>>, vector<1x1x16x16xf32>,
    %c3_i32_78 = arith.constant 3 : i32
    %263 = arith.addi %0, %c3_i32_78 : i32
    %c9_i32_79 = arith.constant 9 : i32
    %264 = arith.muli %263, %c9_i32_79 : i32
    %c0_80 = arith.constant 0 : index
    %265 = arith.index_cast %c3_i32_78 : i32 to index
    %c0_81 = arith.constant 0 : index
    %c0_82 = arith.constant 0 : index
    %266 = vector.load %arg4[%c0_80, %265, %c0_81, %c0_82] : memref<1x4x16x16xf32, #tpu.memory_space<vmem>>, vector<1x1x16x16xf32>
    %267 = vector.shape_cast %266 : vector<1x1x16x16xf32> to vector<16x16xf32>
    %cst_83 = arith.constant dense<0.000000e+00> : vector<16x16xf32>
    %268 = tpu.matmul %28, %267, %cst_83 {dimension_numbers = #tpu.dot_dimension_numbers<[1], [0], [0], [1], [0, 0, 1, 1], [], []>, precision = #tpu.contract_precision<fp32>} : vector<16x16xf32>, vector<16x16xf32>, vector<16x16xf32> -> vector<16x16xf32>
    %cst_84 = arith.constant dense<0.000000e+00> : vector<16x16xf32>
    %269 = tpu.matmul %21, %267, %cst_84 {dimension_numbers = #tpu.dot_dimension_numbers<[1], [0], [0], [1], [0, 0, 1, 1], [], []>, precision = #tpu.contract_precision<fp32>} : vector<16x16xf32>, vector<16x16xf32>, vector<16x16xf32> -> vector<16x16xf32>
    %c4_i32_85 = arith.constant 4 : i32
    %270 = arith.addi %264, %c4_i32_85 : i32
    %271 = arith.index_cast %270 : i32 to index
    %272 = memref.load %arg2[%271] : memref<36xf32, #tpu.memory_space<smem>>
    %273 = vector.broadcast %272 : f32 to vector<16x16xf32>
    %274 = arith.mulf %267, %273 : vector<16x16xf32>
    %275 = arith.index_cast %263 : i32 to index
    %276 = memref.load %arg3[%275] : memref<4xf32, #tpu.memory_space<smem>>
    %277 = vector.broadcast %276 : f32 to vector<16x16xf32>
    %278 = arith.addf %274, %277 : vector<16x16xf32>
    %c1_i32_86 = arith.constant 1 : i32
    %279 = arith.addi %264, %c1_i32_86 : i32
    %280 = arith.index_cast %279 : i32 to index
    %281 = memref.load %arg2[%280] : memref<36xf32, #tpu.memory_space<smem>>
    %282 = vector.broadcast %281 : f32 to vector<16x16xf32>
    %283 = arith.mulf %268, %282 : vector<16x16xf32>
    %284 = arith.addf %278, %283 : vector<16x16xf32>
    %c7_i32_87 = arith.constant 7 : i32
    %285 = arith.addi %264, %c7_i32_87 : i32
    %286 = arith.index_cast %285 : i32 to index
    %287 = memref.load %arg2[%286] : memref<36xf32, #tpu.memory_space<smem>>
    %288 = vector.broadcast %287 : f32 to vector<16x16xf32>
    %289 = arith.mulf %269, %288 : vector<16x16xf32>
    %290 = arith.addf %284, %289 : vector<16x16xf32>
    %cst_88 = arith.constant dense<0.000000e+00> : vector<16x16xf32>
    %291 = tpu.matmul %268, %7, %cst_88 {dimension_numbers = #tpu.dot_dimension_numbers<[1], [0], [0], [1], [0, 0, 1, 1], [], []>, precision = #tpu.contract_precision<fp32>} : vector<16x16xf32>, vector<16x16xf32>, vector<16x16xf32> -> vector<16x16xf32>
    %c0_i32_89 = arith.constant 0 : i32
    %292 = arith.addi %264, %c0_i32_89 : i32
    %293 = arith.index_cast %292 : i32 to index
    %294 = memref.load %arg2[%293] : memref<36xf32, #tpu.memory_space<smem>>
    %295 = vector.broadcast %294 : f32 to vector<16x16xf32>
    %296 = arith.mulf %291, %295 : vector<16x16xf32>
    %297 = arith.addf %290, %296 : vector<16x16xf32>
    %cst_90 = arith.constant dense<0.000000e+00> : vector<16x16xf32>
    %298 = tpu.matmul %268, %14, %cst_90 {dimension_numbers = #tpu.dot_dimension_numbers<[1], [0], [0], [1], [0, 0, 1, 1], [], []>, precision = #tpu.contract_precision<fp32>} : vector<16x16xf32>, vector<16x16xf32>, vector<16x16xf32> -> vector<16x16xf32>
    %c0_i32_91 = arith.constant 0 : i32
    %299 = arith.addi %264, %c0_i32_91 : i32
    %c2_i32_92 = arith.constant 2 : i32
    %300 = arith.addi %299, %c2_i32_92 : i32
    %301 = arith.index_cast %300 : i32 to index
    %302 = memref.load %arg2[%301] : memref<36xf32, #tpu.memory_space<smem>>
    %303 = vector.broadcast %302 : f32 to vector<16x16xf32>
    %304 = arith.mulf %298, %303 : vector<16x16xf32>
    %305 = arith.addf %297, %304 : vector<16x16xf32>
    %cst_93 = arith.constant dense<0.000000e+00> : vector<16x16xf32>
    %306 = tpu.matmul %267, %7, %cst_93 {dimension_numbers = #tpu.dot_dimension_numbers<[1], [0], [0], [1], [0, 0, 1, 1], [], []>, precision = #tpu.contract_precision<fp32>} : vector<16x16xf32>, vector<16x16xf32>, vector<16x16xf32> -> vector<16x16xf32>
    %c3_i32_94 = arith.constant 3 : i32
    %307 = arith.addi %264, %c3_i32_94 : i32
    %308 = arith.index_cast %307 : i32 to index
    %309 = memref.load %arg2[%308] : memref<36xf32, #tpu.memory_space<smem>>
    %310 = vector.broadcast %309 : f32 to vector<16x16xf32>
    %311 = arith.mulf %306, %310 : vector<16x16xf32>
    %312 = arith.addf %305, %311 : vector<16x16xf32>
    %cst_95 = arith.constant dense<0.000000e+00> : vector<16x16xf32>
    %313 = tpu.matmul %267, %14, %cst_95 {dimension_numbers = #tpu.dot_dimension_numbers<[1], [0], [0], [1], [0, 0, 1, 1], [], []>, precision = #tpu.contract_precision<fp32>} : vector<16x16xf32>, vector<16x16xf32>, vector<16x16xf32> -> vector<16x16xf32>
    %c3_i32_96 = arith.constant 3 : i32
    %314 = arith.addi %264, %c3_i32_96 : i32
    %c2_i32_97 = arith.constant 2 : i32
    %315 = arith.addi %314, %c2_i32_97 : i32
    %316 = arith.index_cast %315 : i32 to index
    %317 = memref.load %arg2[%316] : memref<36xf32, #tpu.memory_space<smem>>
    %318 = vector.broadcast %317 : f32 to vector<16x16xf32>
    %319 = arith.mulf %313, %318 : vector<16x16xf32>
    %320 = arith.addf %312, %319 : vector<16x16xf32>
    %cst_98 = arith.constant dense<0.000000e+00> : vector<16x16xf32>
    %321 = tpu.matmul %269, %7, %cst_98 {dimension_numbers = #tpu.dot_dimension_numbers<[1], [0], [0], [1], [0, 0, 1, 1], [], []>, precision = #tpu.contract_precision<fp32>} : vector<16x16xf32>, vector<16x16xf32>, vector<16x16xf32> -> vector<16x16xf32>
    %c6_i32_99 = arith.constant 6 : i32
    %322 = arith.addi %264, %c6_i32_99 : i32
    %323 = arith.index_cast %322 : i32 to index
    %324 = memref.load %arg2[%323] : memref<36xf32, #tpu.memory_space<smem>>
    %325 = vector.broadcast %324 : f32 to vector<16x16xf32>
    %326 = arith.mulf %321, %325 : vector<16x16xf32>
    %327 = arith.addf %320, %326 : vector<16x16xf32>
    %cst_100 = arith.constant dense<0.000000e+00> : vector<16x16xf32>
    %328 = tpu.matmul %269, %14, %cst_100 {dimension_numbers = #tpu.dot_dimension_numbers<[1], [0], [0], [1], [0, 0, 1, 1], [], []>, precision = #tpu.contract_precision<fp32>} : vector<16x16xf32>, vector<16x16xf32>, vector<16x16xf32> -> vector<16x16xf32>
    %c6_i32_101 = arith.constant 6 : i32
    %329 = arith.addi %264, %c6_i32_101 : i32
    %c2_i32_102 = arith.constant 2 : i32
    %330 = arith.addi %329, %c2_i32_102 : i32
    %331 = arith.index_cast %330 : i32 to index
    %332 = memref.load %arg2[%331] : memref<36xf32, #tpu.memory_space<smem>>
    %333 = vector.broadcast %332 : f32 to vector<16x16xf32>
    %334 = arith.mulf %328, %333 : vector<16x16xf32>
    %335 = arith.addf %327, %334 : vector<16x16xf32>
    %336 = arith.maximumf %267, %335 : vector<16x16xf32>
    %c0_103 = arith.constant 0 : index
    %337 = arith.index_cast %c3_i32_78 : i32 to index
    %c0_104 = arith.constant 0 : index
    %c0_105 = arith.constant 0 : index
    %338 = vector.load %arg5[%c0_103, %337, %c0_104, %c0_105] : memref<1x4x16x16xf32, #tpu.memory_space<vmem>>, vector<1x1x16x16xf32>
    %339 = vector.shape_cast %338 : vector<1x1x16x16xf32> to vector<16x16xf32>
    %340 = vector.shape_cast %336 : vector<16x16xf32> to vector<1x1x16x16xf32>
    tpu.vector_store %arg5[%c0_103, %337, %c0_104, %c0_105], %340 {strides = array<i32>} : memref<1x4x16x16xf32, #tpu.memory_space<vmem>>, vector<1x1x16x16xf32>,
    %c4_i32_106 = arith.constant 4 : i32
    return
  }
  func.func @transform_0(%arg0: i32, %arg1: i32, %arg2: memref<36xf32, #tpu.memory_space<smem>>, %arg3: memref<4xf32, #tpu.memory_space<smem>>) -> (i32, i32, i32, i32) {
    %c0_i32 = arith.constant 0 : i32
    %c0_i32_0 = arith.constant 0 : i32
    %c0_i32_1 = arith.constant 0 : i32
    return %arg0, %arg1, %c0_i32, %c0_i32_0 : i32, i32, i32, i32
  }
  func.func @transform_1(%arg0: i32, %arg1: i32, %arg2: memref<36xf32, #tpu.memory_space<smem>>, %arg3: memref<4xf32, #tpu.memory_space<smem>>) -> (i32, i32, i32, i32) {
    %c0_i32 = arith.constant 0 : i32
    %c0_i32_0 = arith.constant 0 : i32
    %c0_i32_1 = arith.constant 0 : i32
    return %arg0, %arg1, %c0_i32, %c0_i32_0 : i32, i32, i32, i32
  }
}

</mosaic_0001>

<bundles_post_ra>
// kernel: tpu_custom_call.1
= control target key start
LH: loop header
LB: loop body
LE: loop exit
PB: predicated region body
PF: predicated region fallthrough
CT: control target
= control target key end

     0   :  { %s21822_s0 = inlined_call_operand.hbm [shape: f32[36], index: 0, kind: input, shape index: {}]   ;;  %s21823_s2 = inlined_call_operand.hbm [shape: f32[2,4,16,16], index: 2, kind: input, shape index: {}]   ;;  %s21824_s3 = inlined_call_operand.hbm [shape: f32[2,4,16,16], index: 3, kind: output, shape index: {}]   ;;  %s21825_s1 = inlined_call_operand.vmem [shape: f32[4], index: 1, kind: input, shape index: {}]  }
   0x1   :  { %s20265_s14 = scalar_lea.hbm %s21822_s0, 16 }
   0x2   :  { %p20266_p0 = scmp.ne.s32.totalorder %s21822_s0, %s20265_s14  ;;  %p20269_p1 = scmp.lt.u32.totalorder %s20265_s14, %s21822_s0 }
   0x4   :  { %p20271_p2 = pnand %p20269_p1, %p20266_p0 }
   0x6   :  { %20274 = shalt.err (!%p20271_p2)  }
   0x7   :  { %s20403_s19 = smov [#allocation3]   ;;  %s10_s24 = sshll.u32 %s21825_s1, 4  ;;  %s11_s24 = int_to_ptr.vmem [resolvable:$true] %s10_s24 }
   0x8   :  { %9 = dma.hbm_to_smem %s21822_s0, 16, %s20403_s19, [#allocation2] }
   0x9   :  { %s20275_s25 = scalar_lea.vmem %s11_s24, 16  ;;  %p20280_p4 = scmp.lt.s32.totalorder %s11_s24, %s11_s24 }
   0xa   :  { %p20276_p3 = scmp.ne.s32.totalorder %s11_s24, %s20275_s25  ;;  %p20281_p5 = scmp.lt.s32.totalorder %s20275_s25, %s20275_s25 }
   0xc   :  { %p20282_p6 = por %p20281_p5, %p20280_p4 }
   0xe   :  { %p20283_p7 = pnand %p20282_p6, %p20276_p3 }
  0x10   :  { %20286 = shalt.err (!%p20283_p7)  }
  0x11   :  { %s20404_s26 = smov [#allocation4]  }
  0x12   :  { %13 = dma.vmem_to_smem %s11_s24, 16, %s20404_s26, [#allocation2] }
  0x13   :  { %20369 = dma.done.wait [#allocation2], 32 }
  0x14   :  { %20370 = vsyncadd [#allocation2], 4294967264 }
  0x15   :  { %15 = sfence }
  0x16   :  { %16 = vsyncpa [#allocation6], 0 }
  0x17   :  { %18 = vsyncpa [#allocation6 + $0x1], 0 }
  0x18   :  { %19 = vsyncpa [#allocation7], 0 }
  0x19   :  { %21 = vsyncpa [#allocation7 + $0x1], 0  ;;  %s20448_s0 = smov 0   ;;  %s20450_s1 = smov 0  }
  0x1a   :  { %s20452_s27 = smov 0   ;;  %s20454_s28 = smov 0  }
  0x1b   :  { %s20456_s29 = smov 0   ;;  %s20458_s30 = smov 0  }
  0x1c LB: > { %s16732_s4 = sadd.s32 4294967295, %s20401_s30   ;;  %s16733_s5 = sadd.s32 4294967294, %s20401_s30   ;;  %s20401_s30 = sphi %s20458_s30, %s27_s30   ;;  %s20397_s29 = sphi %s20456_s29, %s21844_s29   ;;  %s20393_s28 = sphi %s20454_s28, %s21843_s28   ;;  %s20389_s27 = sphi %s20452_s27, %s21842_s27   ;;  %s20385_s1 = sphi %s20450_s1, %s21841_s1   ;;  %s20381_s0 = sphi %s20448_s0, %s21840_s0  }
  0x1d   : > { %s39_s6 = sadd.s32 1, %s20397_s29  ;;  %s48_s7 = sadd.s32 1, %s20389_s27 }
  0x1e   : > { %p41_p8 = scmp.ge.s32.totalorder %s39_s6, 2  ;;  %p55_p9 = scmp.ne.s32.totalorder %s20389_s27, %s20385_s1 }
  0x1f   : > { %p56_p10 = scmp.eq.s32.totalorder %s20401_s30, 0  ;;  %p61_p11 = scmp.ne.s32.totalorder %s20385_s1, %s20381_s0 }
  0x20   : > { %s21846_s6 = smov (%p41_p8, %s39_s6), 0  ;;  %p62_p13 = scmp.eq.s32.totalorder %s16732_s4, 0 }
  0x21   : > { %p20489_p12 = por %p56_p10, %p55_p9  ;;  %s43_s9 = ssub.s32 %s20397_s29, %s21846_s6 }
  0x22   : > { %p87_p0 = scmp.eq.s32.totalorder %s16732_s4, 1  ;;  %p46_p1 = scmp.eq.s32.totalorder %s43_s9, 0 }
  0x23   : > { %p20495_p2 = por %p62_p13, %p61_p11  ;;  %p93_p4 = scmp.eq.s32.totalorder %s16733_s5, 1 }
  0x24   : > { %p20499_p3 = por %p87_p0, %p55_p9  ;;  %p20207_p7 = scmp.lt.s32.totalorder %s20401_s30, 2 }
  0x25   : > { %s20504_s12 = scalar_select %p46_p1, %s20389_s27, %s48_s7  }
  0x26   : > { %s21829_s11 = scalar_select %p20499_p3, 1, 0 }
  0x27   : > { %p20506_p5 = por %p93_p4, %p61_p11  ;;  %s113_s14 = sand.u32 1, %s20389_s27  }
  0x28   : > { %s16736_s15 = sshll.u32 %s113_s14, 6  ;;  %s16993_s16 = sshll.u32 %s20397_s29, 10 }
  0x29   : > { %s21830_s13 = scalar_select %p20506_p5, 1, 0 }
  0x2a   : > { %s20517_s19 = scalar_lea.hbm %s21823_s2, %s16993_s16  ;;  %s117_s20 = scalar_lea.vmem [#allocation5], %s16736_s15 }
  0x2b   : > { %s127_s21 = sshll.u32 %s117_s20, 4  ;;  %p20523_p8 = pnand %p20207_p7, %p20489_p12  ;;  %s20519_s21 = int_to_ptr.vmem [resolvable:$true] %s127_s21 }
  0x2c   : > { %s20528_s23 = scalar_lea.sflag [#allocation6], %s113_s14  ;;  %s20287_s24 = scalar_lea.hbm %s20517_s19, 1024 }
  0x2d   : > { %p20288_p10 = scmp.ne.s32.totalorder %s20517_s19, %s20287_s24  ;;  %p20289_p11 = pneg %p20523_p8 }
  0x2e   : > { %s20292_s4 = scalar_lea.hbm %s21823_s2, 2048  ;;  %p20293_p12 = scmp.lt.u32.totalorder %s20517_s19, %s21823_s2 }
  0x2f   : > { %p20290_p13 = pnand %p20289_p11, %p20288_p10  ;;  %p20294_p1 = scmp.lt.u32.totalorder %s20292_s4, %s20287_s24 }
  0x30   : > { %p20296_p7 = scmp.lt.u32.totalorder %s20287_s24, %s20517_s19 }
  0x31   : > { %p20291_p0 = pneg %p20290_p13  ;;  %p20295_p4 = por %p20294_p1, %p20293_p12 }
  0x33   : > { %p20297_p6 = por %p20296_p7, %p20295_p4 }
  0x35   : > { %p20298_p9 = pnand %p20297_p6, %p20291_p0 }
  0x37   : > { %20301 = shalt.err (!%p20298_p9)
}
  0x38   : > { %s20302_s8 = scalar_lea.vmem %s20519_s21, 1024  ;;  %s20405_s9 = smov [#allocation5]  }
  0x39   : > { %p20303_p10 = scmp.ne.s32.totalorder %s20519_s21, %s20302_s8  ;;  %s20307_s14 = sshll.u32 %s20405_s9, 4  ;;  %s20308_s14 = int_to_ptr.vmem [resolvable:$false] %s20307_s14 }
  0x3a   : > { %s20309_s15 = scalar_lea.vmem %s20308_s14, 2048  ;;  %p20310_p3 = scmp.lt.s32.totalorder %s20519_s21, %s20308_s14 }
  0x3b   : > { %p20305_p13 = pnand %p20303_p10, %p20289_p11  ;;  %p20311_p12 = scmp.lt.s32.totalorder %s20309_s15, %s20302_s8 }
  0x3d   : > { %p20306_p5 = pneg %p20305_p13  ;;  %p20312_p1 = por %p20311_p12, %p20310_p3 }
  0x3f   : > { %p20313_p4 = pnand %p20312_p1, %p20306_p5 }
  0x41   : > { %20316 = shalt.err (!%p20313_p4)
}
  0x42   : > { %s20406_s16 = smov 128   ;;  %s20407_s17 = smov 8  }
  0x43   : > { %20202 = dma.hbm_to_vmem [thread:$0]  (!%p20523_p8), %s20517_s19, 1024, %s20519_s21, %s20528_s23, %s20406_s16, %s20406_s16, %s20407_s17  }
  0x44   : > { %p135_p6 = scmp.lt.s32.totalorder %s20401_s30, 3  ;;  %p21832_p9 = scmp.ge.s32.totalorder %s20401_s30, 1 }
  0x46   : > { %p136_p11 = pnand %p21832_p9, %p135_p6 }
  0x47   : > { %s20560_s18 = sand.u32 (!%p136_p11), 1, %s20385_s1  }
  0x48   : > { %139 = sbr.rel (%p136_p11) target bundleno = 1919 (0x77f), region = 24  ;;  %s16740_s20 = sshll.u32 (!%p136_p11), %s20560_s18, 6 }
  0x49   : > { %s142_s24 = scalar_lea.sflag (!%p136_p11), [#allocation6], %s20560_s18  ;;  %s20566_s25 = scalar_lea.vmem (!%p136_p11), [#allocation5], %s16740_s20 }
  0x4f   : > { %20372 = dma.done.wait (%p20495_p2), %s142_s24, 1024  }
  0x50   : > { %20374 = vsyncadd (%p20495_p2), %s142_s24, 4294966272  ;;  %v167_v0 = vlaneseq  ;;  %vm189_vm0 = vcmask 130048   ;;  %v20573_v6 = vld [vmem:[%s20566_s25] sm:$0xff]  ;;  %v20576_v7 = vld [vmem:[%s20566_s25 + $0x8] sm:$0xff]  ;;  %v20408_v8 = vmov 0.0   ;;  %s16758_s10 = sld [smem:[#allocation3 + $0x4]] }
  0x51   : > { %v197_v11 = vand.u32 4294901760, %v20573_v6  ;;  %v200_v12 = vand.u32 4294901760, %v20576_v7  ;;  %s1211_s19 = sld [smem:[#allocation4]]  ;;  %s16759_s21 = sld [smem:[#allocation3 + $0x1]] }
  0x52   : > { %v168_v1 = vshrl.u32 %v167_v0, 7  ;;  %v171_v2 = vand.u32 127, %v167_v0  ;;  %s16760_s22 = sld [smem:[#allocation3 + $0x7]]  ;;  %s1737_s23 = sld [smem:[#allocation3]] }
  0x53   : > { %v20596_v17 = vpack.c.bf16 %v200_v12, %v197_v11  ;;  %v285_v20 = vsub.f32 %v20573_v6, %v197_v11  ;;  %v292_v24 = vsub.f32 %v20576_v7, %v200_v12  ;;  %v20409_v11 = vmov 1.0|1.0   ;;  %s16773_s26 = sld [smem:[#allocation3 + $0x2]]  ;;  %s16780_s4 = sld [smem:[#allocation3 + $0x3]] }
  0x54   : > { %v172_v3 = vsub.s32 %v171_v2, %v168_v1  ;;  %v169_v4 = vadd.s32 8, %v168_v1  ;;  %s16787_s5 = sld [smem:[#allocation3 + $0x5]]  ;;  %s16794_s7 = sld [smem:[#allocation3 + $0x6]] }
  0x55   : > { %19108 = vmatprep.subr.bf16.mxu0 %v20596_v17  ;;  %19132 = vmatprep.subr.bf16.mxu1 %v20596_v17  ;;  %v286_v27 = vand.u32 4294901760, %v285_v20  ;;  %v293_v32 = vand.u32 4294901760, %v292_v24  ;;  %v19115_v51 = vpack.c.bf16 %v292_v24, %v285_v20  ;;  %s16801_s8 = sld [smem:[#allocation3 + $0x8]]  ;;  %s21025_s9 = scalar_lea.vmem [#allocation8], %s16740_s20 }
  0x56   : > { %vm180_vm1 = vcmp.eq.s32.totalorder %v172_v3, 4294967295  ;;  %v173_v5 = vsub.s32 %v171_v2, %v169_v4  ;;  %vm174_vm2 = vcmp.eq.s32.totalorder %v172_v3, 1  ;;  %19110 = vmatpush3.bf16.msra.mxu0 %v20596_v17  ;;  %19134 = vmatpush3.bf16.msra.mxu1 %v20596_v17  ;;  %v1208_v12 = vstv %s16758_s10  ;;  %s16816_s14 = sld [smem:[#allocation3 + $0xd]]  ;;  %s16817_s15 = sld [smem:[#allocation4 + $0x1]] }
  0x57   : > { %v20579_v9 = vsel %vm180_vm1, 1.0, %v20408_v8  ;;  %v20582_v10 = vsel %vm174_vm2, 1.0, %v20408_v8  ;;  %v287_v34 = vsub.f32 %v285_v20, %v286_v27  ;;  %v294_v38 = vsub.f32 %v292_v24, %v293_v32  ;;  %s16818_s16 = sld [smem:[#allocation3 + $0xa]]  ;;  %s16819_s17 = sld [smem:[#allocation3 + $0x10]] }
  0x58   : > { %v191_v13 = vsel %vm189_vm0, %v20579_v9, 0  ;;  %v20590_v14 = vsub.f32 %v20579_v9, %v20579_v9  ;;  %vm181_vm3 = vcmp.eq.s32.totalorder %v173_v5, 4294967295  ;;  %v699_v16 = vsel %vm189_vm0, %v20582_v10, 0  ;;  %s16826_s20 = sld [smem:[#allocation3 + $0x9]]  ;;  %s16833_s24 = sld [smem:[#allocation3 + $0xb]] }
  0x59   : > { %v20592_v15 = vsub.f32 %v191_v13, %v191_v13  ;;  %v20598_v18 = vsel %vm181_vm3, 1.0, %v20408_v8  ;;  %vm20601_vm4 = vmpackc.low %vm181_vm3, %vm180_vm1  ;;  %v20621_v28 = vsub.f32 %v699_v16, %v699_v16  ;;  %v288_v40 = vand.u32 4294901760, %v287_v34  ;;  %s16840_s10 = sld [smem:[#allocation3 + $0xc]]  ;;  %p21837_p3 = scmp.ne.s32.totalorder %s21829_s11, 0 }
  0x5a   : > { %v194_v22 = vsel %vm189_vm0, %v20598_v18, 0  ;;  %v20613_v23 = vsub.f32 %v20598_v18, %v20598_v18  ;;  %v1833_v25 = vand.u32 4294901760, %v20590_v14  ;;  %v295_v42 = vand.u32 4294901760, %v294_v38 }
  0x5b   : > { %v20607_v21 = vand.u32 4294901760, %v20592_v15  ;;  %v20619_v26 = vsub.f32 %v194_v22, %v194_v22  ;;  %v20636_v35 = vand.u32 4294901760, %v20621_v28  ;;  %v20653_v43 = vsub.f32 %v20582_v10, %v20582_v10 }
  0x5c   : > { %v1840_v30 = vand.u32 4294901760, %v20613_v23  ;;  %v20630_v31 = vpack.c.bf16 %v20613_v23, %v20590_v14  ;;  %vm175_vm5 = vcmp.eq.s32.totalorder %v173_v5, 1  ;;  %v19111_v48 = vpack.c.bf16 %v295_v42, %v288_v40 }
  0x5d   : > { %v266_v29 = vsub.f32 %v20592_v15, %v20607_v21  ;;  %v20633_v33 = vand.u32 4294901760, %v20619_v26  ;;  %v774_v41 = vsub.f32 %v20621_v28, %v20636_v35  ;;  %v20659_v46 = vsel %vm175_vm5, 1.0, %v20408_v8  ;;  %vm20662_vm6 = vmpackc.low %vm175_vm5, %vm174_vm2 }
  0x5e   : > { %v20644_v37 = vpack.c.bf16 %v1840_v30, %v1833_v25  ;;  %v702_v49 = vsel %vm189_vm0, %v20659_v46, 0  ;;  %v1331_v50 = vsub.f32 %v20659_v46, %v20659_v46  ;;  %19112 = vmatprep.subr.bf16.mxu0 %v19111_v48  ;;  %v1325_v53 = vand.u32 4294901760, %v20653_v43  ;;  %19136 = vmatprep.subr.bf16.mxu1 %v19111_v48 }
  0x5f   : > { %v20638_v36 = vand.u32 4294901760, %v266_v29  ;;  %v276_v39 = vsub.f32 %v20619_v26, %v20633_v33  ;;  %v20657_v45 = vand.u32 4294901760, %v774_v41  ;;  %v20672_v52 = vsub.f32 %v702_v49, %v702_v49 }
  0x60   : > { %v1332_v54 = vand.u32 4294901760, %v1331_v50  ;;  %v20676_v55 = vpack.c.bf16 %v1331_v50, %v20653_v43  ;;  %v19123_v60 = vpack.c.bf16 %v293_v32, %v286_v27  ;;  %v1834_v61 = vsub.f32 %v20590_v14, %v1833_v25 }
  0x61   : > { %17767 = vmatprep.mubr.f32.mxu0 %v20638_v36  ;;  %v20655_v44 = vand.u32 4294901760, %v276_v39  ;;  %17809 = vmatprep.mubr.f32.mxu1 %v20657_v45  ;;  %v20679_v56 = vand.u32 4294901760, %v20672_v52  ;;  %v1841_v62 = vsub.f32 %v20613_v23, %v1840_v30  ;;  %v1326_v63 = vsub.f32 %v20653_v43, %v1325_v53 }
  0x62   : > { %v20683_v57 = vpack.c.bf16 %v1332_v54, %v1325_v53  ;;  %v1333_v0 = vsub.f32 %v1331_v50, %v1332_v54  ;;  %v1835_v1 = vand.u32 4294901760, %v1834_v61  ;;  %v1210_v13 = vmul.f32 %v1208_v12, %v20576_v7 }
  0x63   : > { %17768 = vmatmul.mubr.f32.vlgmr.msra.gmra.mrb[0].mxu0 %v20655_v44  ;;  %v784_v58 = vsub.f32 %v20672_v52, %v20679_v56  ;;  %v1842_v2 = vand.u32 4294901760, %v1841_v62  ;;  %v1327_v3 = vand.u32 4294901760, %v1326_v63  ;;  %v1212_v16 = vstv %s1211_s19  ;;  %s16847_s19 = sld [smem:[#allocation3 + $0xe]] }
  0x64   : > { %19114 = vmatpush3.bf16.msra.mxu0 %v19111_v48  ;;  %17774 = vmatprep.mubr.msk.f32.mxu0 %vm189_vm0, %v20579_v9  ;;  %v1334_v4 = vand.u32 4294901760, %v1333_v0  ;;  %v1209_v20 = vmul.f32 %v1208_v12, %v20573_v6  ;;  %v1214_v27 = vadd.f32 %v1212_v16, %v1210_v13  ;;  %v1224_v41 = vstv %s16760_s22  ;;  %s16861_s22 = sld [smem:[#allocation3 + $0x11]] }
  0x65   : > { %19116 = vmatprep.subr.bf16.mxu0 %v19115_v51  ;;  %v20687_v59 = vand.u32 4294901760, %v784_v58  ;;  %v20735_v5 = vpack.c.bf16 %v1842_v2, %v1835_v1  ;;  %v2253_v0 = vsel %vm189_vm0, %v20573_v6, 0  ;;  %v2256_v1 = vsel %vm189_vm0, %v20576_v7, 0 }
  0x66   : > { %v20737_v8 = vpack.c.bf16 %v1334_v4, %v1327_v3  ;;  %v1213_v34 = vadd.f32 %v1212_v16, %v1209_v20  ;;  %v20801_v2 = vand.u32 4294901760, %v2253_v0  ;;  %v20803_v3 = vand.u32 4294901760, %v2256_v1 }
  0x67   : > { %17810 = vmatmul.mubr.f32.vlgmr.msra.gmra.mrb[0].mxu1 %v20687_v59 }
  0x68   : > { %19138 = vmatpush3.bf16.msra.mxu1 %v19111_v48  ;;  %17816 = vmatprep.mubr.msk.f32.mxu1 %vm189_vm0, %v20582_v10  ;;  %v2326_v4 = vsub.f32 %v2253_v0, %v20801_v2  ;;  %v2336_v12 = vsub.f32 %v2256_v1, %v20803_v3 }
  0x69   : > { %19140 = vmatprep.subr.bf16.mxu1 %v19115_v51 }
  0x6a   : > { %v2327_v13 = vand.u32 4294901760, %v2326_v4 }
  0x6b   : > { %17775 = vmatmul.mubr.msk.f32.vlgmr.msra.gmra.mrb[0].mxu0 %vm189_vm0, %v20598_v18 }
  0x6c   : > { %19118 = vmatpush3.bf16.msra.mxu0 %v19115_v51  ;;  %17781 = vmatprep.mubr.f32.mxu0 %v20592_v15  ;;  %v2328_v16 = vsub.f32 %v2326_v4, %v2327_v13 }
  0x6d   : > { %19120 = vmatprep.subr.bf16.mxu0 %v20596_v17 }
  0x6e   : > { %v2329_v20 = vand.u32 4294901760, %v2328_v16  ;;  %v2247_v16 = vstv %s16773_s26  ;;  %s16879_s26 = sld [smem:[#allocation4 + $0x2]] }
  0x6f   : > { %17817 = vmatmul.mubr.msk.f32.vlgmr.msra.gmra.mrb[0].mxu1 %vm189_vm0, %v20659_v46 }
  0x70   : > { %19142 = vmatpush3.bf16.msra.mxu1 %v19115_v51  ;;  %17823 = vmatprep.mubr.f32.mxu1 %v20621_v28 }
  0x71   : > { %19144 = vmatprep.subr.bf16.mxu1 %v20596_v17 }
  0x73   : > { %17782 = vmatmul.mubr.f32.vlgmr.msra.gmra.mrb[0].mxu0 %v20619_v26 }
  0x74   : > { %19122 = vmatpush3.bf16.msra.mxu0 %v20596_v17  ;;  %17788 = vmatprep.mubr.f32.mxu0 %v20607_v21 }
  0x75   : > { %19124 = vmatprep.subr.bf16.mxu0 %v19123_v60 }
  0x77   : > { %17824 = vmatmul.mubr.f32.vlgmr.msra.gmra.mrb[0].mxu1 %v20672_v52 }
  0x78   : > { %19146 = vmatpush3.bf16.msra.mxu1 %v20596_v17  ;;  %17830 = vmatprep.mubr.f32.mxu1 %v20636_v35 }
  0x79   : > { %19148 = vmatprep.subr.bf16.mxu1 %v19123_v60 }
  0x7b   : > { %17789 = vmatmul.mubr.f32.vlgmr.msra.gmra.mrb[0].mxu0 %v20633_v33 }
  0x7c   : > { %19126 = vmatpush3.bf16.msra.mxu0 %v19123_v60  ;;  %17795 = vmatprep.mubr.msk.f32.mxu0 %vm189_vm0, %v20579_v9 }
  0x7d   : > { %19128 = vmatprep.subr.bf16.mxu0 %v20596_v17 }
  0x7f   : > { %17831 = vmatmul.mubr.f32.vlgmr.msra.gmra.mrb[0].mxu1 %v20679_v56 }
  0x80   : > { %19150 = vmatpush3.bf16.msra.mxu1 %v19123_v60  ;;  %17837 = vmatprep.mubr.msk.f32.mxu1 %vm189_vm0, %v20582_v10 }
  0x81   : > { %19152 = vmatprep.subr.bf16.mxu1 %v20596_v17 }
  0x83   : > { %17796 = vmatmul.mubr.msk.f32.vlgmr.msra.gmra.mrb[0].mxu0 %vm189_vm0, %v20598_v18 }
  0x84   : > { %19130 = vmatpush3.bf16.msra.mxu0 %v20596_v17  ;;  %17802 = vmatprep.mubr.msk.f32.mxu0 %vm189_vm0, %v20579_v9 }
  0x85   : > { %19156 = vmatprep.subr.msk.bf16.mxu0 %vm20662_vm6, %v20409_v11 }
  0x87   : > { %17838 = vmatmul.mubr.msk.f32.vlgmr.msra.gmra.mrb[0].mxu1 %vm189_vm0, %v20659_v46 }
  0x88   : > { %19154 = vmatpush3.bf16.msra.mxu1 %v20596_v17  ;;  %17844 = vmatprep.mubr.msk.f32.mxu1 %vm189_vm0, %v20582_v10  ;;  %v1217_v17 = vstv %s16759_s21  ;;  %s16854_s21 = sld [smem:[#allocation3 + $0xf]] }
  0x89   : > { %19180 = vmatprep.subr.msk.bf16.mxu1 %vm20601_vm4, %v20409_v11 }
  0x8b   : > { %17803 = vmatmul.mubr.msk.f32.vlgmr.msra.gmra.mrb[0].mxu0 %vm189_vm0, %v20598_v18 }
  0x8c   : > { %19158 = vmatpush3.bf16.msk.msra.mxu0 %vm20662_vm6, %v20409_v11 }
  0x8d   : > { %19160 = vmatprep.subr.bf16.mxu0 %v20737_v8 }
  0x8f   : > { %17845 = vmatmul.mubr.msk.f32.vlgmr.msra.gmra.mrb[0].mxu1 %vm189_vm0, %v20659_v46 }
  0x90   : > { %19182 = vmatpush3.bf16.msk.msra.mxu1 %vm20601_vm4, %v20409_v11 }
  0x91   : > { %19184 = vmatprep.subr.bf16.mxu1 %v20735_v5 }
 0x15e   : > { %v17804_v14 = vpop.f32.mrb[0].mxu0 }
 0x15f   : > { %v1233_v22 = vsel %vm189_vm0, %v17804_v14, 0  ;;  %v688_v23 = vpop.f32.mrb[1].mxu0  ;;  %v1219_v29 = vmul.f32 %v17804_v14, %v1217_v17  ;;  %v2337_v14 = vand.u32 4294901760, %v2336_v12 }
 0x160   : > { %v20756_v24 = vand.u32 4294901760, %v1233_v22  ;;  %v1230_v25 = vsel %vm189_vm0, %v688_v23, 0  ;;  %v1218_v38 = vmul.f32 %v1217_v17, %v688_v23 }
 0x161   : > { %v20759_v30 = vand.u32 4294901760, %v1230_v25  ;;  %v1221_v42 = vadd.f32 %v1219_v29, %v1214_v27  ;;  %v2338_v17 = vsub.f32 %v2336_v12, %v2337_v14 }
 0x162   : > { %v1313_v32 = vsub.f32 %v1233_v22, %v20756_v24  ;;  %v1220_v48 = vadd.f32 %v1218_v38, %v1213_v34  ;;  %v20763_v49 = vpop.f32.mrb[0].mxu1 }
 0x163   : > { %v1303_v39 = vsub.f32 %v1230_v25, %v20759_v30  ;;  %v1226_v51 = vmul.f32 %v20763_v49, %v1224_v41  ;;  %v20766_v53 = vpop.f32.mrb[1].mxu1  ;;  %v2339_v22 = vand.u32 4294901760, %v2338_v17 }
 0x164   : > { %v1314_v40 = vand.u32 4294901760, %v1313_v32  ;;  %v1225_v58 = vmul.f32 %v1224_v41, %v20766_v53  ;;  %v3277_v23 = vsel %vm189_vm0, %v20766_v53, 0 }
 0x165   : > { %v1304_v43 = vand.u32 4294901760, %v1303_v39  ;;  %v20769_v60 = vadd.f32 %v1226_v51, %v1221_v42  ;;  %v20871_v25 = vand.u32 4294901760, %v3277_v23  ;;  %v20930_v42 = vld [vmem:[%s20566_s25 + $0x10] sm:$0xff] }
 0x166   : > { %v1315_v50 = vsub.f32 %v1313_v32, %v1314_v40  ;;  %v20771_v62 = vadd.f32 %v1225_v58, %v1220_v48  ;;  %v4310_v48 = vand.u32 4294901760, %v20930_v42 }
 0x167   : > { %v1305_v54 = vsub.f32 %v1303_v39, %v1304_v43  ;;  %v3350_v29 = vsub.f32 %v3277_v23, %v20871_v25 }
 0x168   : > { %v1316_v63 = vand.u32 4294901760, %v1315_v50  ;;  %v4398_v50 = vsub.f32 %v20930_v42, %v4310_v48 }
 0x169   : > { %v1306_v61 = vand.u32 4294901760, %v1305_v54 }
 0x16a   : > { %v4399_v53 = vand.u32 4294901760, %v4398_v50 }
 0x16b   : > { %17851 = vmatprep.mubr.f32.mxu0 %v1306_v61  ;;  %17893 = vmatprep.mubr.f32.mxu1 %v1306_v61 }
 0x16c   : > { %17852 = vmatmul.mubr.f32.vlgmr.msra.gmra.mrb[2].mxu0 %v1316_v63  ;;  %17894 = vmatmul.mubr.f32.vlgmr.msra.gmra.mrb[2].mxu1 %v1316_v63  ;;  %v4400_v61 = vsub.f32 %v4398_v50, %v4399_v53 }
 0x16d   : > { %17858 = vmatprep.mubr.f32.mxu0 %v20759_v30  ;;  %17900 = vmatprep.mubr.f32.mxu1 %v20759_v30 }
 0x16e   : > { %19162 = vmatpush3.bf16.msra.mxu0 %v20737_v8  ;;  %19186 = vmatpush3.bf16.msra.mxu1 %v20735_v5  ;;  %v4401_v0 = vand.u32 4294901760, %v4400_v61 }
 0x16f   : > { %19164 = vmatprep.subr.bf16.mxu0 %v20676_v55  ;;  %19188 = vmatprep.subr.bf16.mxu1 %v20630_v31 }
 0x174   : > { %17859 = vmatmul.mubr.f32.vlgmr.msra.gmra.mrb[2].mxu0 %v20756_v24  ;;  %17901 = vmatmul.mubr.f32.vlgmr.msra.gmra.mrb[2].mxu1 %v20756_v24 }
 0x175   : > { %17865 = vmatprep.mubr.f32.mxu0 %v1303_v39  ;;  %17907 = vmatprep.mubr.f32.mxu1 %v1303_v39 }
 0x176   : > { %19166 = vmatpush3.bf16.msra.mxu0 %v20676_v55  ;;  %19190 = vmatpush3.bf16.msra.mxu1 %v20630_v31 }
 0x177   : > { %19168 = vmatprep.subr.msk.bf16.mxu0 %vm20662_vm6, %v20409_v11  ;;  %19192 = vmatprep.subr.msk.bf16.mxu1 %vm20601_vm4, %v20409_v11 }
 0x17c   : > { %17866 = vmatmul.mubr.f32.vlgmr.msra.gmra.mrb[2].mxu0 %v1313_v32  ;;  %17908 = vmatmul.mubr.f32.vlgmr.msra.gmra.mrb[2].mxu1 %v1313_v32  ;;  %v3351_v32 = vand.u32 4294901760, %v3350_v29 }
 0x17d   : > { %17872 = vmatprep.mubr.f32.mxu0 %v1304_v43  ;;  %17914 = vmatprep.mubr.f32.mxu1 %v1304_v43  ;;  %v20933_v43 = vld [vmem:[%s20566_s25 + $0x18] sm:$0xff] }
 0x17e   : > { %19170 = vmatpush3.bf16.msk.msra.mxu0 %vm20662_vm6, %v20409_v11  ;;  %19194 = vmatpush3.bf16.msk.msra.mxu1 %vm20601_vm4, %v20409_v11  ;;  %v3352_v38 = vsub.f32 %v3350_v29, %v3351_v32 }
 0x17f   : > { %19172 = vmatprep.subr.bf16.mxu0 %v20683_v57  ;;  %19196 = vmatprep.subr.bf16.mxu1 %v20644_v37 }
 0x184   : > { %17873 = vmatmul.mubr.f32.vlgmr.msra.gmra.mrb[2].mxu0 %v1314_v40  ;;  %17915 = vmatmul.mubr.f32.vlgmr.msra.gmra.mrb[2].mxu1 %v1314_v40  ;;  %v3353_v40 = vand.u32 4294901760, %v3352_v38  ;;  %v3271_v38 = vstv %s16787_s5  ;;  %s16881_s5 = sld [smem:[#allocation3 + $0x19]] }
 0x185   : > { %17879 = vmatprep.mubr.f32.mxu0 %v20759_v30  ;;  %17921 = vmatprep.mubr.f32.mxu1 %v20759_v30 }
 0x186   : > { %19174 = vmatpush3.bf16.msra.mxu0 %v20683_v57  ;;  %19198 = vmatpush3.bf16.msra.mxu1 %v20644_v37 }
 0x187   : > { %19176 = vmatprep.subr.msk.bf16.mxu0 %vm20662_vm6, %v20409_v11  ;;  %19200 = vmatprep.subr.msk.bf16.mxu1 %vm20601_vm4, %v20409_v11 }
 0x18c   : > { %17880 = vmatmul.mubr.f32.vlgmr.msra.gmra.mrb[2].mxu0 %v20756_v24  ;;  %17922 = vmatmul.mubr.f32.vlgmr.msra.gmra.mrb[2].mxu1 %v20756_v24 }
 0x18d   : > { %17886 = vmatprep.mubr.f32.mxu0 %v20759_v30  ;;  %17928 = vmatprep.mubr.f32.mxu1 %v20759_v30 }
 0x18e   : > { %19178 = vmatpush3.bf16.msk.msra.mxu0 %vm20662_vm6, %v20409_v11  ;;  %19202 = vmatpush3.bf16.msk.msra.mxu1 %vm20601_vm4, %v20409_v11 }
 0x18f   : > { %19204 = vmatprep.subr.msk.bf16.mxu0 %vm20662_vm6, %v20409_v11  ;;  %19228 = vmatprep.subr.msk.bf16.mxu1 %vm20601_vm4, %v20409_v11 }
 0x194   : > { %17887 = vmatmul.mubr.f32.vlgmr.msra.gmra.mrb[2].mxu0 %v20756_v24  ;;  %17929 = vmatmul.mubr.f32.vlgmr.msra.gmra.mrb[2].mxu1 %v20756_v24  ;;  %v3280_v24 = vsel %vm189_vm0, %v20763_v49, 0  ;;  %v4313_v49 = vand.u32 4294901760, %v20933_v43 }
 0x195   : > { %19206 = vmatpush3.bf16.msk.msra.mxu0 %vm20662_vm6, %v20409_v11  ;;  %19230 = vmatpush3.bf16.msk.msra.mxu1 %vm20601_vm4, %v20409_v11  ;;  %v20875_v27 = vand.u32 4294901760, %v3280_v24 }
 0x196   : > { %17935 = vmatprep.mubr.f32.mxu0 %v2329_v20  ;;  %17977 = vmatprep.mubr.f32.mxu1 %v2329_v20  ;;  %v4405_v51 = vsub.f32 %v20933_v43, %v4313_v49  ;;  %v19299_v58 = vpack.c.bf16 %v4313_v49, %v4310_v48 }
 0x197   : > { %19208 = vmatprep.subr.bf16.mxu0 %v20737_v8  ;;  %19232 = vmatprep.subr.bf16.mxu1 %v20735_v5  ;;  %v3360_v30 = vsub.f32 %v3280_v24, %v20875_v27 }
 0x198   : > { %17936 = vmatmul.mubr.f32.vlgmr.msra.gmra.mrb[4].mxu0 %v2339_v22  ;;  %17978 = vmatmul.mubr.f32.vlgmr.msra.gmra.mrb[4].mxu1 %v2339_v22  ;;  %v4406_v54 = vand.u32 4294901760, %v4405_v51 }
 0x199   : > { %19210 = vmatpush3.bf16.msra.mxu0 %v20737_v8  ;;  %19234 = vmatpush3.bf16.msra.mxu1 %v20735_v5  ;;  %v3361_v34 = vand.u32 4294901760, %v3360_v30 }
 0x19a   : > { %17942 = vmatprep.mubr.f32.mxu0 %v20801_v2  ;;  %17984 = vmatprep.mubr.f32.mxu1 %v20801_v2  ;;  %v4407_v63 = vsub.f32 %v4405_v51, %v4406_v54 }
 0x19b   : > { %19212 = vmatprep.subr.bf16.mxu0 %v20676_v55  ;;  %19236 = vmatprep.subr.bf16.mxu1 %v20630_v31  ;;  %v3362_v39 = vsub.f32 %v3360_v30, %v3361_v34 }
 0x19c   : > { %v4408_v1 = vand.u32 4294901760, %v4407_v63 }
 0x19d   : > { %v3363_v41 = vand.u32 4294901760, %v3362_v39 }
 0x1a0   : > { %17943 = vmatmul.mubr.f32.vlgmr.msra.gmra.mrb[4].mxu0 %v20803_v3  ;;  %17985 = vmatmul.mubr.f32.vlgmr.msra.gmra.mrb[4].mxu1 %v20803_v3 }
 0x1a1   : > { %19214 = vmatpush3.bf16.msra.mxu0 %v20676_v55  ;;  %19238 = vmatpush3.bf16.msra.mxu1 %v20630_v31 }
 0x1a2   : > { %17949 = vmatprep.mubr.f32.mxu0 %v2326_v4  ;;  %17991 = vmatprep.mubr.f32.mxu1 %v2326_v4  ;;  %v19315_v4 = vpack.c.bf16 %v4406_v54, %v4399_v53 }
 0x1a3   : > { %19216 = vmatprep.subr.msk.bf16.mxu0 %vm20662_vm6, %v20409_v11  ;;  %19240 = vmatprep.subr.msk.bf16.mxu1 %vm20601_vm4, %v20409_v11 }
 0x1a8   : > { %17950 = vmatmul.mubr.f32.vlgmr.msra.gmra.mrb[4].mxu0 %v2336_v12  ;;  %17992 = vmatmul.mubr.f32.vlgmr.msra.gmra.mrb[4].mxu1 %v2336_v12  ;;  %v1738_v12 = vstv %s1737_s23  ;;  %s16878_s23 = sld [smem:[#allocation3 + $0x16]] }
 0x1a9   : > { %19218 = vmatpush3.bf16.msk.msra.mxu0 %vm20662_vm6, %v20409_v11  ;;  %19242 = vmatpush3.bf16.msk.msra.mxu1 %vm20601_vm4, %v20409_v11 }
 0x1aa   : > { %17956 = vmatprep.mubr.f32.mxu0 %v2327_v13  ;;  %17998 = vmatprep.mubr.f32.mxu1 %v2327_v13 }
 0x1ab   : > { %19220 = vmatprep.subr.bf16.mxu0 %v20683_v57  ;;  %19244 = vmatprep.subr.bf16.mxu1 %v20644_v37 }
 0x1b0   : > { %17957 = vmatmul.mubr.f32.vlgmr.msra.gmra.mrb[4].mxu0 %v2337_v14  ;;  %17999 = vmatmul.mubr.f32.vlgmr.msra.gmra.mrb[4].mxu1 %v2337_v14 }
 0x1b1   : > { %19222 = vmatpush3.bf16.msra.mxu0 %v20683_v57  ;;  %19246 = vmatpush3.bf16.msra.mxu1 %v20644_v37 }
 0x1b2   : > { %17963 = vmatprep.mubr.f32.mxu0 %v20801_v2  ;;  %18005 = vmatprep.mubr.f32.mxu1 %v20801_v2 }
 0x1b3   : > { %19224 = vmatprep.subr.msk.bf16.mxu0 %vm20662_vm6, %v20409_v11  ;;  %19248 = vmatprep.subr.msk.bf16.mxu1 %vm20601_vm4, %v20409_v11 }
 0x1b8   : > { %17964 = vmatmul.mubr.f32.vlgmr.msra.gmra.mrb[4].mxu0 %v20803_v3  ;;  %18006 = vmatmul.mubr.f32.vlgmr.msra.gmra.mrb[4].mxu1 %v20803_v3 }
 0x1b9   : > { %19226 = vmatpush3.bf16.msk.msra.mxu0 %vm20662_vm6, %v20409_v11  ;;  %19250 = vmatpush3.bf16.msk.msra.mxu1 %vm20601_vm4, %v20409_v11 }
 0x1ba   : > { %17970 = vmatprep.mubr.f32.mxu0 %v20801_v2  ;;  %18012 = vmatprep.mubr.f32.mxu1 %v20801_v2  ;;  %v19303_v2 = vpack.c.bf16 %v4408_v1, %v4401_v0  ;;  %v4295_v0 = vstv %s16801_s8  ;;  %s16902_s8 = sld [smem:[#allocation3 + $0x15]] }
 0x1bb   : > { %19252 = vmatprep.subr.msk.bf16.mxu0 %vm20662_vm6, %v20409_v11  ;;  %19276 = vmatprep.subr.msk.bf16.mxu1 %vm20601_vm4, %v20409_v11 }
 0x1c0   : > { %17971 = vmatmul.mubr.f32.vlgmr.msra.gmra.mrb[4].mxu0 %v20803_v3  ;;  %18013 = vmatmul.mubr.f32.vlgmr.msra.gmra.mrb[4].mxu1 %v20803_v3  ;;  %v19307_v3 = vpack.c.bf16 %v4405_v51, %v4398_v50 }
 0x1c1   : > { %19254 = vmatpush3.bf16.msk.msra.mxu0 %vm20662_vm6, %v20409_v11  ;;  %18019 = vmatprep.mubr.f32.mxu0 %v3353_v40 }
 0x1c2   : > { %19278 = vmatpush3.bf16.msk.msra.mxu1 %vm20601_vm4, %v20409_v11  ;;  %18061 = vmatprep.mubr.f32.mxu1 %v3353_v40 }
 0x1c3   : > { %19256 = vmatprep.subr.bf16.mxu0 %v20737_v8  ;;  %19280 = vmatprep.subr.bf16.mxu1 %v20735_v5 }
 0x1c4   : > { %18020 = vmatmul.mubr.f32.vlgmr.msra.gmra.mrb[6].mxu0 %v3363_v41 }
 0x1c5   : > { %18062 = vmatmul.mubr.f32.vlgmr.msra.gmra.mrb[6].mxu1 %v3363_v41  ;;  %18026 = vmatprep.mubr.f32.mxu0 %v20871_v25 }
 0x1c6   : > { %18068 = vmatprep.mubr.f32.mxu1 %v20871_v25  ;;  %19258 = vmatpush3.bf16.msra.mxu0 %v20737_v8 }
 0x1c7   : > { %19282 = vmatpush3.bf16.msra.mxu1 %v20735_v5  ;;  %19260 = vmatprep.subr.bf16.mxu0 %v20676_v55 }
 0x1c8   : > { %19284 = vmatprep.subr.bf16.mxu1 %v20630_v31 }
 0x1cc   : > { %18027 = vmatmul.mubr.f32.vlgmr.msra.gmra.mrb[6].mxu0 %v20875_v27 }
 0x1cd   : > { %18069 = vmatmul.mubr.f32.vlgmr.msra.gmra.mrb[6].mxu1 %v20875_v27  ;;  %18033 = vmatprep.mubr.f32.mxu0 %v3350_v29 }
 0x1ce   : > { %18075 = vmatprep.mubr.f32.mxu1 %v3350_v29  ;;  %19262 = vmatpush3.bf16.msra.mxu0 %v20676_v55 }
 0x1cf   : > { %19286 = vmatpush3.bf16.msra.mxu1 %v20630_v31  ;;  %19264 = vmatprep.subr.msk.bf16.mxu0 %vm20662_vm6, %v20409_v11 }
 0x1d0   : > { %19288 = vmatprep.subr.msk.bf16.mxu1 %vm20601_vm4, %v20409_v11 }
 0x1d4   : > { %18034 = vmatmul.mubr.f32.vlgmr.msra.gmra.mrb[6].mxu0 %v3360_v30 }
 0x1d5   : > { %18076 = vmatmul.mubr.f32.vlgmr.msra.gmra.mrb[6].mxu1 %v3360_v30  ;;  %18040 = vmatprep.mubr.f32.mxu0 %v3351_v32 }
 0x1d6   : > { %18082 = vmatprep.mubr.f32.mxu1 %v3351_v32  ;;  %19266 = vmatpush3.bf16.msk.msra.mxu0 %vm20662_vm6, %v20409_v11 }
 0x1d7   : > { %19290 = vmatpush3.bf16.msk.msra.mxu1 %vm20601_vm4, %v20409_v11  ;;  %19268 = vmatprep.subr.bf16.mxu0 %v20683_v57 }
 0x1d8   : > { %19292 = vmatprep.subr.bf16.mxu1 %v20644_v37 }
 0x1dc   : > { %18041 = vmatmul.mubr.f32.vlgmr.msra.gmra.mrb[6].mxu0 %v3361_v34 }
 0x1dd   : > { %18083 = vmatmul.mubr.f32.vlgmr.msra.gmra.mrb[6].mxu1 %v3361_v34  ;;  %18047 = vmatprep.mubr.f32.mxu0 %v20871_v25  ;;  %v2762_v34 = vstv %s16780_s4  ;;  %s16880_s4 = sld [smem:[#allocation3 + $0x13]] }
 0x1de   : > { %18089 = vmatprep.mubr.f32.mxu1 %v20871_v25  ;;  %19270 = vmatpush3.bf16.msra.mxu0 %v20683_v57 }
 0x1df   : > { %19294 = vmatpush3.bf16.msra.mxu1 %v20644_v37  ;;  %19272 = vmatprep.subr.msk.bf16.mxu0 %vm20662_vm6, %v20409_v11 }
 0x1e0   : > { %19296 = vmatprep.subr.msk.bf16.mxu1 %vm20601_vm4, %v20409_v11 }
 0x1e4   : > { %18048 = vmatmul.mubr.f32.vlgmr.msra.gmra.mrb[6].mxu0 %v20875_v27 }
 0x1e5   : > { %18090 = vmatmul.mubr.f32.vlgmr.msra.gmra.mrb[6].mxu1 %v20875_v27  ;;  %18054 = vmatprep.mubr.f32.mxu0 %v20871_v25 }
 0x1e6   : > { %18096 = vmatprep.mubr.f32.mxu1 %v20871_v25  ;;  %19274 = vmatpush3.bf16.msk.msra.mxu0 %vm20662_vm6, %v20409_v11 }
 0x1e7   : > { %19298 = vmatpush3.bf16.msk.msra.mxu1 %vm20601_vm4, %v20409_v11  ;;  %19300 = vmatprep.subr.bf16.mxu0 %v19299_v58 }
 0x1e8   : > { %19324 = vmatprep.subr.bf16.mxu1 %v19299_v58 }
 0x1ec   : > { %18055 = vmatmul.mubr.f32.vlgmr.msra.gmra.mrb[6].mxu0 %v20875_v27 }
 0x1ed   : > { %18097 = vmatmul.mubr.f32.vlgmr.msra.gmra.mrb[6].mxu1 %v20875_v27  ;;  %19302 = vmatpush3.bf16.msra.mxu0 %v19299_v58 }
 0x1ee   : > { %18103 = vmatprep.mubr.f32.mxu0 %v20638_v36  ;;  %19326 = vmatpush3.bf16.msra.mxu1 %v19299_v58 }
 0x1ef   : > { %19304 = vmatprep.subr.bf16.mxu0 %v19303_v2  ;;  %18145 = vmatprep.mubr.f32.mxu1 %v20657_v45 }
 0x1f0   : > { %18104 = vmatmul.mubr.f32.vlgmr.msra.gmra.mrb[8].mxu0 %v20655_v44  ;;  %19328 = vmatprep.subr.bf16.mxu1 %v19303_v2 }
 0x1f1   : > { %19306 = vmatpush3.bf16.msra.mxu0 %v19303_v2  ;;  %18146 = vmatmul.mubr.f32.vlgmr.msra.gmra.mrb[8].mxu1 %v20687_v59 }
 0x1f2   : > { %18110 = vmatprep.mubr.msk.f32.mxu0 %vm189_vm0, %v20579_v9  ;;  %19330 = vmatpush3.bf16.msra.mxu1 %v19303_v2 }
 0x1f3   : > { %19308 = vmatprep.subr.bf16.mxu0 %v19307_v3  ;;  %18152 = vmatprep.mubr.msk.f32.mxu1 %vm189_vm0, %v20582_v10 }
 0x1f4   : > { %19332 = vmatprep.subr.bf16.mxu1 %v19307_v3 }
 0x1f8   : > { %18111 = vmatmul.mubr.msk.f32.vlgmr.msra.gmra.mrb[8].mxu0 %vm189_vm0, %v20598_v18 }
 0x1f9   : > { %19310 = vmatpush3.bf16.msra.mxu0 %v19307_v3  ;;  %18153 = vmatmul.mubr.msk.f32.vlgmr.msra.gmra.mrb[8].mxu1 %vm189_vm0, %v20659_v46 }
 0x1fa   : > { %18117 = vmatprep.mubr.f32.mxu0 %v20592_v15  ;;  %19334 = vmatpush3.bf16.msra.mxu1 %v19307_v3 }
 0x1fb   : > { %19312 = vmatprep.subr.bf16.mxu0 %v19299_v58  ;;  %18159 = vmatprep.mubr.f32.mxu1 %v20621_v28 }
 0x1fc   : > { %19336 = vmatprep.subr.bf16.mxu1 %v19299_v58 }
 0x200   : > { %18118 = vmatmul.mubr.f32.vlgmr.msra.gmra.mrb[8].mxu0 %v20619_v26 }
 0x201   : > { %19314 = vmatpush3.bf16.msra.mxu0 %v19299_v58  ;;  %18160 = vmatmul.mubr.f32.vlgmr.msra.gmra.mrb[8].mxu1 %v20672_v52 }
 0x202   : > { %18124 = vmatprep.mubr.f32.mxu0 %v20607_v21  ;;  %19338 = vmatpush3.bf16.msra.mxu1 %v19299_v58 }
 0x203   : > { %19316 = vmatprep.subr.bf16.mxu0 %v19315_v4  ;;  %18166 = vmatprep.mubr.f32.mxu1 %v20636_v35 }
 0x204   : > { %19340 = vmatprep.subr.bf16.mxu1 %v19315_v4 }
 0x208   : > { %18125 = vmatmul.mubr.f32.vlgmr.msra.gmra.mrb[8].mxu0 %v20633_v33 }
 0x209   : > { %19318 = vmatpush3.bf16.msra.mxu0 %v19315_v4  ;;  %18167 = vmatmul.mubr.f32.vlgmr.msra.gmra.mrb[8].mxu1 %v20679_v56 }
 0x20a   : > { %18131 = vmatprep.mubr.msk.f32.mxu0 %vm189_vm0, %v20579_v9  ;;  %19342 = vmatpush3.bf16.msra.mxu1 %v19315_v4 }
 0x20b   : > { %19320 = vmatprep.subr.bf16.mxu0 %v19299_v58  ;;  %18173 = vmatprep.mubr.msk.f32.mxu1 %vm189_vm0, %v20582_v10 }
 0x20c   : > { %19344 = vmatprep.subr.bf16.mxu1 %v19299_v58 }
 0x210   : > { %18132 = vmatmul.mubr.msk.f32.vlgmr.msra.gmra.mrb[8].mxu0 %vm189_vm0, %v20598_v18 }
 0x211   : > { %19322 = vmatpush3.bf16.msra.mxu0 %v19299_v58  ;;  %18174 = vmatmul.mubr.msk.f32.vlgmr.msra.gmra.mrb[8].mxu1 %vm189_vm0, %v20659_v46 }
 0x212   : > { %18138 = vmatprep.mubr.msk.f32.mxu0 %vm189_vm0, %v20579_v9  ;;  %19346 = vmatpush3.bf16.msra.mxu1 %v19299_v58 }
 0x213   : > { %18180 = vmatprep.mubr.msk.f32.mxu1 %vm189_vm0, %v20582_v10  ;;  %19348 = vmatprep.subr.msk.bf16.mxu0 %vm20662_vm6, %v20409_v11 }
 0x214   : > { %19372 = vmatprep.subr.msk.bf16.mxu1 %vm20601_vm4, %v20409_v11 }
 0x218   : > { %18139 = vmatmul.mubr.msk.f32.vlgmr.msra.gmra.mrb[8].mxu0 %vm189_vm0, %v20598_v18 }
 0x219   : > { %18181 = vmatmul.mubr.msk.f32.vlgmr.msra.gmra.mrb[8].mxu1 %vm189_vm0, %v20659_v46  ;;  %19350 = vmatpush3.bf16.msk.msra.mxu0 %vm20662_vm6, %v20409_v11 }
 0x21a   : > { %19374 = vmatpush3.bf16.msk.msra.mxu1 %vm20601_vm4, %v20409_v11  ;;  %19352 = vmatprep.subr.bf16.mxu0 %v20737_v8 }
 0x21b   : > { %19376 = vmatprep.subr.bf16.mxu1 %v20735_v5 }
 0x267   : > { %v17888_v13 = vpop.f32.mrb[2].mxu0  ;;  %v17930_v14 = vpop.f32.mrb[2].mxu1 }
 0x268   : > { %v1740_v17 = vmul.f32 %v17888_v13, %v1738_v12  ;;  %v1727_v20 = vpop.f32.mrb[3].mxu0  ;;  %v2235_v22 = vpop.f32.mrb[3].mxu1  ;;  %v2249_v25 = vmul.f32 %v17930_v14, %v2247_v16 }
 0x269   : > { %v1739_v23 = vmul.f32 %v1738_v12, %v1727_v20  ;;  %v2248_v29 = vmul.f32 %v2247_v16, %v2235_v22 }
 0x26a   : > { %v1742_v24 = vadd.f32 %v1740_v17, %v20769_v60 }
 0x26b   : > { %v1741_v27 = vadd.f32 %v1739_v23, %v20771_v62  ;;  %v3786_v62 = vstv %s16794_s7  ;;  %s16895_s7 = sld [smem:[#allocation3 + $0x14]] }
 0x26c   : > { %v2251_v30 = vadd.f32 %v2249_v25, %v1742_v24  ;;  %v5315_v25 = vstv %s16816_s14  ;;  %s16909_s14 = sld [smem:[#allocation3 + $0x17]] }
 0x26d   : > { %v2250_v32 = vadd.f32 %v2248_v29, %v1741_v27  ;;  %v5317_v27 = vmul.f32 %v20933_v43, %v5315_v25  ;;  %v5319_v29 = vstv %s16817_s15  ;;  %s16916_s15 = sld [smem:[#allocation3 + $0x18]] }
 0x293   : > { %v17972_v39 = vpop.f32.mrb[4].mxu0  ;;  %v18014_v40 = vpop.f32.mrb[4].mxu1 }
 0x294   : > { %v2764_v41 = vmul.f32 %v17972_v39, %v2762_v34  ;;  %v2750_v48 = vpop.f32.mrb[5].mxu0  ;;  %v3273_v49 = vmul.f32 %v18014_v40, %v3271_v38  ;;  %v3259_v50 = vpop.f32.mrb[5].mxu1 }
 0x295   : > { %v2763_v51 = vmul.f32 %v2762_v34, %v2750_v48  ;;  %v3272_v53 = vmul.f32 %v3271_v38, %v3259_v50 }
 0x296   : > { %v2766_v54 = vadd.f32 %v2764_v41, %v2251_v30  ;;  %v5321_v30 = vadd.f32 %v5319_v29, %v5317_v27 }
 0x297   : > { %v2765_v60 = vadd.f32 %v2763_v51, %v2250_v32  ;;  %v5331_v32 = vstv %s16819_s17  ;;  %s16940_s17 = sld [smem:[#allocation3 + $0x1f]] }
 0x298   : > { %v3275_v58 = vadd.f32 %v3273_v49, %v2766_v54 }
 0x299   : > { %v3274_v61 = vadd.f32 %v3272_v53, %v2765_v60 }
 0x2bf   : > { %v18056_v63 = vpop.f32.mrb[6].mxu0 }
 0x2c0   : > { %v3788_v1 = vmul.f32 %v18056_v63, %v3786_v62  ;;  %v18098_v2 = vpop.f32.mrb[6].mxu1  ;;  %v3774_v3 = vpop.f32.mrb[7].mxu0 }
 0x2c1   : > { %v3787_v4 = vmul.f32 %v3786_v62, %v3774_v3  ;;  %v4283_v12 = vpop.f32.mrb[7].mxu1  ;;  %v4297_v14 = vmul.f32 %v18098_v2, %v4295_v0 }
 0x2c2   : > { %v3790_v13 = vadd.f32 %v3788_v1, %v3275_v58  ;;  %v4296_v17 = vmul.f32 %v4295_v0, %v4283_v12 }
 0x2c3   : > { %v3789_v16 = vadd.f32 %v3787_v4, %v3274_v61 }
 0x2c4   : > { %v4299_v20 = vadd.f32 %v4297_v14, %v3790_v13 }
 0x2c5   : > { %v4298_v22 = vadd.f32 %v4296_v17, %v3789_v16  ;;  %v6360_v17 = vsel %vm189_vm0, %v20930_v42, 0 }
 0x2c6   : > { %v4301_v23 = vmax.f32 %v20576_v7, %v4299_v20  ;;  %v5316_v7 = vmul.f32 %v20930_v42, %v5315_v25  ;;  %v6363_v20 = vsel %vm189_vm0, %v20933_v43, 0 }
 0x2c7   : > { %v4300_v24 = vmax.f32 %v20573_v6, %v4298_v22  ;;  %v5324_v6 = vstv %s16818_s16  ;;  %v21074_v22 = vand.u32 4294901760, %v6360_v17  ;;  %s16923_s16 = sld [smem:[#allocation3 + $0x1a]] }
 0x2c8   : > { %4303 = vst.msk [vmem:[%s21025_s9 + $0x8] sm:$0xff] %vm189_vm0, %v4301_v23  ;;  %v5320_v38 = vadd.f32 %v5319_v29, %v5316_v7  ;;  %v21076_v23 = vand.u32 4294901760, %v6363_v20 }
 0x2c9   : > { %4302 = vst.msk [vmem:[%s21025_s9] sm:$0xff] %vm189_vm0, %v4300_v24  ;;  %v6433_v24 = vsub.f32 %v6360_v17, %v21074_v22 }
 0x2ca   : > { %v6443_v25 = vsub.f32 %v6363_v20, %v21076_v23 }
 0x2cb   : > { %v6434_v27 = vand.u32 4294901760, %v6433_v24 }
 0x2cc   : > { %v6444_v29 = vand.u32 4294901760, %v6443_v25 }
 0x2cd   : > { %v6435_v7 = vsub.f32 %v6433_v24, %v6434_v27 }
 0x2eb   : > { %v18140_v34 = vpop.f32.mrb[8].mxu0 }
 0x2ec   : > { %v5326_v39 = vmul.f32 %v18140_v34, %v5324_v6  ;;  %v5340_v40 = vsel %vm189_vm0, %v18140_v34, 0  ;;  %v4801_v41 = vpop.f32.mrb[9].mxu0  ;;  %v21034_v48 = vpop.f32.mrb[8].mxu1 }
 0x2ed   : > { %v21036_v49 = vand.u32 4294901760, %v5340_v40  ;;  %v5325_v50 = vmul.f32 %v5324_v6, %v4801_v41  ;;  %v5337_v51 = vsel %vm189_vm0, %v4801_v41, 0  ;;  %v5333_v53 = vmul.f32 %v21034_v48, %v5331_v32  ;;  %v21040_v54 = vpop.f32.mrb[9].mxu1 }
 0x2ee   : > { %v5328_v60 = vadd.f32 %v5326_v39, %v5321_v30  ;;  %v5409_v58 = vand.u32 4294901760, %v5337_v51  ;;  %v5332_v61 = vmul.f32 %v5331_v32, %v21040_v54  ;;  %v6445_v6 = vsub.f32 %v6443_v25, %v6444_v29 }
 0x2ef   : > { %v5420_v62 = vsub.f32 %v5340_v40, %v21036_v49  ;;  %v5327_v63 = vadd.f32 %v5325_v50, %v5320_v38  ;;  %v6436_v30 = vand.u32 4294901760, %v6435_v7  ;;  %v7384_v34 = vsel %vm189_vm0, %v21040_v54, 0 }
 0x2f0   : > { %v5410_v0 = vsub.f32 %v5337_v51, %v5409_v58  ;;  %v21044_v1 = vadd.f32 %v5333_v53, %v5328_v60  ;;  %v6446_v32 = vand.u32 4294901760, %v6445_v6  ;;  %v7387_v38 = vsel %vm189_vm0, %v21034_v48, 0 }
 0x2f1   : > { %v5421_v2 = vand.u32 4294901760, %v5420_v62  ;;  %v21046_v3 = vadd.f32 %v5332_v61, %v5327_v63  ;;  %v21140_v39 = vand.u32 4294901760, %v7384_v34  ;;  %v21144_v40 = vand.u32 4294901760, %v7387_v38  ;;  %v21202_v61 = vld [vmem:[%s20566_s25 + $0x28] sm:$0xff] }
 0x2f2   : > { %v5411_v4 = vand.u32 4294901760, %v5410_v0  ;;  %v8421_v63 = vand.u32 4294901760, %v21202_v61  ;;  %v6354_v7 = vstv %s16833_s24  ;;  %s16942_s24 = sld [smem:[#allocation3 + $0x1c]] }
 0x2f3   : > { %v5422_v12 = vsub.f32 %v5420_v62, %v5421_v2  ;;  %v7457_v41 = vsub.f32 %v7384_v34, %v21140_v39  ;;  %v7467_v48 = vsub.f32 %v7387_v38, %v21144_v40 }
 0x2f4   : > { %v5412_v13 = vsub.f32 %v5410_v0, %v5411_v4 }
 0x2f5   : > { %v5423_v16 = vand.u32 4294901760, %v5422_v12  ;;  %v7468_v50 = vand.u32 4294901760, %v7467_v48 }
 0x2f6   : > { %v5413_v14 = vand.u32 4294901760, %v5412_v13 }
 0x2f7   : > { %v7469_v53 = vsub.f32 %v7467_v48, %v7468_v50 }
 0x2f8   : > { %18187 = vmatprep.mubr.f32.mxu0 %v5413_v14  ;;  %18229 = vmatprep.mubr.f32.mxu1 %v5413_v14 }
 0x2f9   : > { %18188 = vmatmul.mubr.f32.vlgmr.msra.gmra.mrb[10].mxu0 %v5423_v16  ;;  %18230 = vmatmul.mubr.f32.vlgmr.msra.gmra.mrb[10].mxu1 %v5423_v16  ;;  %v7470_v60 = vand.u32 4294901760, %v7469_v53 }
 0x2fa   : > { %18194 = vmatprep.mubr.f32.mxu0 %v5409_v58  ;;  %18236 = vmatprep.mubr.f32.mxu1 %v5409_v58 }
 0x2fb   : > { %19354 = vmatpush3.bf16.msra.mxu0 %v20737_v8  ;;  %19378 = vmatpush3.bf16.msra.mxu1 %v20735_v5 }
 0x2fc   : > { %19356 = vmatprep.subr.bf16.mxu0 %v20676_v55  ;;  %19380 = vmatprep.subr.bf16.mxu1 %v20630_v31 }
 0x301   : > { %18195 = vmatmul.mubr.f32.vlgmr.msra.gmra.mrb[10].mxu0 %v21036_v49  ;;  %18237 = vmatmul.mubr.f32.vlgmr.msra.gmra.mrb[10].mxu1 %v21036_v49 }
 0x302   : > { %18201 = vmatprep.mubr.f32.mxu0 %v5410_v0  ;;  %18243 = vmatprep.mubr.f32.mxu1 %v5410_v0 }
 0x303   : > { %19358 = vmatpush3.bf16.msra.mxu0 %v20676_v55  ;;  %19382 = vmatpush3.bf16.msra.mxu1 %v20630_v31 }
 0x304   : > { %19360 = vmatprep.subr.msk.bf16.mxu0 %vm20662_vm6, %v20409_v11  ;;  %19384 = vmatprep.subr.msk.bf16.mxu1 %vm20601_vm4, %v20409_v11 }
 0x309   : > { %18202 = vmatmul.mubr.f32.vlgmr.msra.gmra.mrb[10].mxu0 %v5420_v62  ;;  %18244 = vmatmul.mubr.f32.vlgmr.msra.gmra.mrb[10].mxu1 %v5420_v62 }
 0x30a   : > { %18208 = vmatprep.mubr.f32.mxu0 %v5411_v4  ;;  %18250 = vmatprep.mubr.f32.mxu1 %v5411_v4 }
 0x30b   : > { %19362 = vmatpush3.bf16.msk.msra.mxu0 %vm20662_vm6, %v20409_v11  ;;  %19386 = vmatpush3.bf16.msk.msra.mxu1 %vm20601_vm4, %v20409_v11 }
 0x30c   : > { %19364 = vmatprep.subr.bf16.mxu0 %v20683_v57  ;;  %19388 = vmatprep.subr.bf16.mxu1 %v20644_v37 }
 0x311   : > { %18209 = vmatmul.mubr.f32.vlgmr.msra.gmra.mrb[10].mxu0 %v5421_v2  ;;  %18251 = vmatmul.mubr.f32.vlgmr.msra.gmra.mrb[10].mxu1 %v5421_v2  ;;  %v8513_v2 = vsub.f32 %v21202_v61, %v8421_v63 }
 0x312   : > { %18215 = vmatprep.mubr.f32.mxu0 %v5409_v58  ;;  %18257 = vmatprep.mubr.f32.mxu1 %v5409_v58 }
 0x313   : > { %19366 = vmatpush3.bf16.msra.mxu0 %v20683_v57  ;;  %19390 = vmatpush3.bf16.msra.mxu1 %v20644_v37  ;;  %v8514_v12 = vand.u32 4294901760, %v8513_v2 }
 0x314   : > { %19368 = vmatprep.subr.msk.bf16.mxu0 %vm20662_vm6, %v20409_v11  ;;  %19392 = vmatprep.subr.msk.bf16.mxu1 %vm20601_vm4, %v20409_v11 }
 0x315   : > { %v8515_v16 = vsub.f32 %v8513_v2, %v8514_v12 }
 0x317   : > { %v8516_v20 = vand.u32 4294901760, %v8515_v16 }
 0x319   : > { %18216 = vmatmul.mubr.f32.vlgmr.msra.gmra.mrb[10].mxu0 %v21036_v49  ;;  %18258 = vmatmul.mubr.f32.vlgmr.msra.gmra.mrb[10].mxu1 %v21036_v49 }
 0x31a   : > { %18222 = vmatprep.mubr.f32.mxu0 %v5409_v58  ;;  %18264 = vmatprep.mubr.f32.mxu1 %v5409_v58  ;;  %v21199_v58 = vld [vmem:[%s20566_s25 + $0x20] sm:$0xff] }
 0x31b   : > { %19370 = vmatpush3.bf16.msk.msra.mxu0 %vm20662_vm6, %v20409_v11  ;;  %19394 = vmatpush3.bf16.msk.msra.mxu1 %vm20601_vm4, %v20409_v11  ;;  %v8418_v62 = vand.u32 4294901760, %v21199_v58 }
 0x31c   : > { %19396 = vmatprep.subr.msk.bf16.mxu0 %vm20662_vm6, %v20409_v11  ;;  %19420 = vmatprep.subr.msk.bf16.mxu1 %vm20601_vm4, %v20409_v11 }
 0x31d   : > { %v8506_v0 = vsub.f32 %v21199_v58, %v8418_v62  ;;  %v19491_v13 = vpack.c.bf16 %v8421_v63, %v8418_v62 }
 0x31f   : > { %v8507_v4 = vand.u32 4294901760, %v8506_v0 }
 0x321   : > { %18223 = vmatmul.mubr.f32.vlgmr.msra.gmra.mrb[10].mxu0 %v21036_v49  ;;  %18265 = vmatmul.mubr.f32.vlgmr.msra.gmra.mrb[10].mxu1 %v21036_v49  ;;  %v7458_v49 = vand.u32 4294901760, %v7457_v41  ;;  %v8508_v14 = vsub.f32 %v8506_v0, %v8507_v4 }
 0x322   : > { %19398 = vmatpush3.bf16.msk.msra.mxu0 %vm20662_vm6, %v20409_v11  ;;  %19422 = vmatpush3.bf16.msk.msra.mxu1 %vm20601_vm4, %v20409_v11 }
 0x323   : > { %18271 = vmatprep.mubr.f32.mxu0 %v6436_v30  ;;  %18313 = vmatprep.mubr.f32.mxu1 %v6436_v30  ;;  %v7459_v51 = vsub.f32 %v7457_v41, %v7458_v49  ;;  %v8509_v17 = vand.u32 4294901760, %v8508_v14 }
 0x324   : > { %19400 = vmatprep.subr.bf16.mxu0 %v20737_v8  ;;  %19424 = vmatprep.subr.bf16.mxu1 %v20735_v5 }
 0x325   : > { %18272 = vmatmul.mubr.f32.vlgmr.msra.gmra.mrb[12].mxu0 %v6446_v32  ;;  %18314 = vmatmul.mubr.f32.vlgmr.msra.gmra.mrb[12].mxu1 %v6446_v32  ;;  %v7460_v54 = vand.u32 4294901760, %v7459_v51  ;;  %v7378_v51 = vstv %s16847_s19  ;;  %s16950_s19 = sld [smem:[#allocation3 + $0x1b]] }
 0x326   : > { %19402 = vmatpush3.bf16.msra.mxu0 %v20737_v8  ;;  %19426 = vmatpush3.bf16.msra.mxu1 %v20735_v5 }
 0x327   : > { %18278 = vmatprep.mubr.f32.mxu0 %v21074_v22  ;;  %18320 = vmatprep.mubr.f32.mxu1 %v21074_v22 }
 0x328   : > { %19404 = vmatprep.subr.bf16.mxu0 %v20676_v55  ;;  %19428 = vmatprep.subr.bf16.mxu1 %v20630_v31 }
 0x32d   : > { %18279 = vmatmul.mubr.f32.vlgmr.msra.gmra.mrb[12].mxu0 %v21076_v23  ;;  %18321 = vmatmul.mubr.f32.vlgmr.msra.gmra.mrb[12].mxu1 %v21076_v23 }
 0x32e   : > { %19406 = vmatpush3.bf16.msra.mxu0 %v20676_v55  ;;  %19430 = vmatpush3.bf16.msra.mxu1 %v20630_v31 }
 0x32f   : > { %18285 = vmatprep.mubr.f32.mxu0 %v6433_v24  ;;  %18327 = vmatprep.mubr.f32.mxu1 %v6433_v24  ;;  %v19507_v24 = vpack.c.bf16 %v8514_v12, %v8507_v4 }
 0x330   : > { %19408 = vmatprep.subr.msk.bf16.mxu0 %vm20662_vm6, %v20409_v11  ;;  %19432 = vmatprep.subr.msk.bf16.mxu1 %vm20601_vm4, %v20409_v11 }
 0x335   : > { %18286 = vmatmul.mubr.f32.vlgmr.msra.gmra.mrb[12].mxu0 %v6443_v25  ;;  %18328 = vmatmul.mubr.f32.vlgmr.msra.gmra.mrb[12].mxu1 %v6443_v25  ;;  %v5845_v25 = vstv %s16826_s20  ;;  %s16941_s20 = sld [smem:[#allocation4 + $0x3]] }
 0x336   : > { %19410 = vmatpush3.bf16.msk.msra.mxu0 %vm20662_vm6, %v20409_v11  ;;  %19434 = vmatpush3.bf16.msk.msra.mxu1 %vm20601_vm4, %v20409_v11 }
 0x337   : > { %18292 = vmatprep.mubr.f32.mxu0 %v6434_v27  ;;  %18334 = vmatprep.mubr.f32.mxu1 %v6434_v27 }
 0x338   : > { %19412 = vmatprep.subr.bf16.mxu0 %v20683_v57  ;;  %19436 = vmatprep.subr.bf16.mxu1 %v20644_v37 }
 0x33d   : > { %18293 = vmatmul.mubr.f32.vlgmr.msra.gmra.mrb[12].mxu0 %v6444_v29  ;;  %18335 = vmatmul.mubr.f32.vlgmr.msra.gmra.mrb[12].mxu1 %v6444_v29 }
 0x33e   : > { %19414 = vmatpush3.bf16.msra.mxu0 %v20683_v57  ;;  %19438 = vmatpush3.bf16.msra.mxu1 %v20644_v37 }
 0x33f   : > { %18299 = vmatprep.mubr.f32.mxu0 %v21074_v22  ;;  %18341 = vmatprep.mubr.f32.mxu1 %v21074_v22 }
 0x340   : > { %19416 = vmatprep.subr.msk.bf16.mxu0 %vm20662_vm6, %v20409_v11  ;;  %19440 = vmatprep.subr.msk.bf16.mxu1 %vm20601_vm4, %v20409_v11 }
 0x345   : > { %18300 = vmatmul.mubr.f32.vlgmr.msra.gmra.mrb[12].mxu0 %v21076_v23  ;;  %18342 = vmatmul.mubr.f32.vlgmr.msra.gmra.mrb[12].mxu1 %v21076_v23 }
 0x346   : > { %19418 = vmatpush3.bf16.msk.msra.mxu0 %vm20662_vm6, %v20409_v11  ;;  %19442 = vmatpush3.bf16.msk.msra.mxu1 %vm20601_vm4, %v20409_v11 }
 0x347   : > { %18306 = vmatprep.mubr.f32.mxu0 %v21074_v22  ;;  %18348 = vmatprep.mubr.f32.mxu1 %v21074_v22  ;;  %v19495_v22 = vpack.c.bf16 %v8516_v20, %v8509_v17  ;;  %v8402_v17 = vstv %s16861_s22  ;;  %s16964_s22 = sld [smem:[#allocation3 + $0x1e]] }
 0x348   : > { %19444 = vmatprep.subr.msk.bf16.mxu0 %vm20662_vm6, %v20409_v11  ;;  %19468 = vmatprep.subr.msk.bf16.mxu1 %vm20601_vm4, %v20409_v11 }
 0x34d   : > { %18307 = vmatmul.mubr.f32.vlgmr.msra.gmra.mrb[12].mxu0 %v21076_v23  ;;  %18349 = vmatmul.mubr.f32.vlgmr.msra.gmra.mrb[12].mxu1 %v21076_v23  ;;  %v19499_v23 = vpack.c.bf16 %v8513_v2, %v8506_v0 }
 0x34e   : > { %19446 = vmatpush3.bf16.msk.msra.mxu0 %vm20662_vm6, %v20409_v11  ;;  %18355 = vmatprep.mubr.f32.mxu0 %v7460_v54 }
 0x34f   : > { %19470 = vmatpush3.bf16.msk.msra.mxu1 %vm20601_vm4, %v20409_v11  ;;  %18397 = vmatprep.mubr.f32.mxu1 %v7460_v54 }
 0x350   : > { %19448 = vmatprep.subr.bf16.mxu0 %v20737_v8  ;;  %19472 = vmatprep.subr.bf16.mxu1 %v20735_v5 }
 0x351   : > { %18356 = vmatmul.mubr.f32.vlgmr.msra.gmra.mrb[14].mxu0 %v7470_v60 }
 0x352   : > { %18398 = vmatmul.mubr.f32.vlgmr.msra.gmra.mrb[14].mxu1 %v7470_v60  ;;  %18362 = vmatprep.mubr.f32.mxu0 %v21140_v39 }
 0x353   : > { %18404 = vmatprep.mubr.f32.mxu1 %v21140_v39  ;;  %19450 = vmatpush3.bf16.msra.mxu0 %v20737_v8 }
 0x354   : > { %19474 = vmatpush3.bf16.msra.mxu1 %v20735_v5  ;;  %19452 = vmatprep.subr.bf16.mxu0 %v20676_v55 }
 0x355   : > { %19476 = vmatprep.subr.bf16.mxu1 %v20630_v31 }
 0x359   : > { %18363 = vmatmul.mubr.f32.vlgmr.msra.gmra.mrb[14].mxu0 %v21144_v40 }
 0x35a   : > { %18405 = vmatmul.mubr.f32.vlgmr.msra.gmra.mrb[14].mxu1 %v21144_v40  ;;  %18369 = vmatprep.mubr.f32.mxu0 %v7457_v41 }
 0x35b   : > { %18411 = vmatprep.mubr.f32.mxu1 %v7457_v41  ;;  %19454 = vmatpush3.bf16.msra.mxu0 %v20676_v55 }
 0x35c   : > { %19478 = vmatpush3.bf16.msra.mxu1 %v20630_v31  ;;  %19456 = vmatprep.subr.msk.bf16.mxu0 %vm20662_vm6, %v20409_v11 }
 0x35d   : > { %19480 = vmatprep.subr.msk.bf16.mxu1 %vm20601_vm4, %v20409_v11 }
 0x361   : > { %18370 = vmatmul.mubr.f32.vlgmr.msra.gmra.mrb[14].mxu0 %v7467_v48 }
 0x362   : > { %18412 = vmatmul.mubr.f32.vlgmr.msra.gmra.mrb[14].mxu1 %v7467_v48  ;;  %18376 = vmatprep.mubr.f32.mxu0 %v7458_v49 }
 0x363   : > { %18418 = vmatprep.mubr.f32.mxu1 %v7458_v49  ;;  %19458 = vmatpush3.bf16.msk.msra.mxu0 %vm20662_vm6, %v20409_v11 }
 0x364   : > { %19482 = vmatpush3.bf16.msk.msra.mxu1 %vm20601_vm4, %v20409_v11  ;;  %19460 = vmatprep.subr.bf16.mxu0 %v20683_v57 }
 0x365   : > { %19484 = vmatprep.subr.bf16.mxu1 %v20644_v37 }
 0x369   : > { %18377 = vmatmul.mubr.f32.vlgmr.msra.gmra.mrb[14].mxu0 %v7468_v50 }
 0x36a   : > { %18419 = vmatmul.mubr.f32.vlgmr.msra.gmra.mrb[14].mxu1 %v7468_v50  ;;  %18383 = vmatprep.mubr.f32.mxu0 %v21140_v39  ;;  %v6869_v50 = vstv %s16840_s10  ;;  %s16943_s10 = sld [smem:[#allocation3 + $0x22]] }
 0x36b   : > { %18425 = vmatprep.mubr.f32.mxu1 %v21140_v39  ;;  %19462 = vmatpush3.bf16.msra.mxu0 %v20683_v57 }
 0x36c   : > { %19486 = vmatpush3.bf16.msra.mxu1 %v20644_v37  ;;  %19464 = vmatprep.subr.msk.bf16.mxu0 %vm20662_vm6, %v20409_v11 }
 0x36d   : > { %19488 = vmatprep.subr.msk.bf16.mxu1 %vm20601_vm4, %v20409_v11 }
 0x371   : > { %18384 = vmatmul.mubr.f32.vlgmr.msra.gmra.mrb[14].mxu0 %v21144_v40 }
 0x372   : > { %18426 = vmatmul.mubr.f32.vlgmr.msra.gmra.mrb[14].mxu1 %v21144_v40  ;;  %18390 = vmatprep.mubr.f32.mxu0 %v21140_v39 }
 0x373   : > { %18432 = vmatprep.mubr.f32.mxu1 %v21140_v39  ;;  %19466 = vmatpush3.bf16.msk.msra.mxu0 %vm20662_vm6, %v20409_v11 }
 0x374   : > { %19490 = vmatpush3.bf16.msk.msra.mxu1 %vm20601_vm4, %v20409_v11  ;;  %19492 = vmatprep.subr.bf16.mxu0 %v19491_v13 }
 0x375   : > { %19516 = vmatprep.subr.bf16.mxu1 %v19491_v13 }
 0x379   : > { %18391 = vmatmul.mubr.f32.vlgmr.msra.gmra.mrb[14].mxu0 %v21144_v40 }
 0x37a   : > { %18433 = vmatmul.mubr.f32.vlgmr.msra.gmra.mrb[14].mxu1 %v21144_v40  ;;  %19494 = vmatpush3.bf16.msra.mxu0 %v19491_v13 }
 0x37b   : > { %18439 = vmatprep.mubr.f32.mxu0 %v20638_v36  ;;  %19518 = vmatpush3.bf16.msra.mxu1 %v19491_v13 }
 0x37c   : > { %19496 = vmatprep.subr.bf16.mxu0 %v19495_v22  ;;  %18481 = vmatprep.mubr.f32.mxu1 %v20657_v45 }
 0x37d   : > { %18440 = vmatmul.mubr.f32.vlgmr.msra.gmra.mrb[16].mxu0 %v20655_v44  ;;  %19520 = vmatprep.subr.bf16.mxu1 %v19495_v22 }
 0x37e   : > { %19498 = vmatpush3.bf16.msra.mxu0 %v19495_v22  ;;  %18482 = vmatmul.mubr.f32.vlgmr.msra.gmra.mrb[16].mxu1 %v20687_v59 }
 0x37f   : > { %18446 = vmatprep.mubr.msk.f32.mxu0 %vm189_vm0, %v20579_v9  ;;  %19522 = vmatpush3.bf16.msra.mxu1 %v19495_v22 }
 0x380   : > { %19500 = vmatprep.subr.bf16.mxu0 %v19499_v23  ;;  %18488 = vmatprep.mubr.msk.f32.mxu1 %vm189_vm0, %v20582_v10 }
 0x381   : > { %19524 = vmatprep.subr.bf16.mxu1 %v19499_v23 }
 0x385   : > { %18447 = vmatmul.mubr.msk.f32.vlgmr.msra.gmra.mrb[16].mxu0 %vm189_vm0, %v20598_v18 }
 0x386   : > { %19502 = vmatpush3.bf16.msra.mxu0 %v19499_v23  ;;  %18489 = vmatmul.mubr.msk.f32.vlgmr.msra.gmra.mrb[16].mxu1 %vm189_vm0, %v20659_v46 }
 0x387   : > { %18453 = vmatprep.mubr.f32.mxu0 %v20592_v15  ;;  %19526 = vmatpush3.bf16.msra.mxu1 %v19499_v23 }
 0x388   : > { %19504 = vmatprep.subr.bf16.mxu0 %v19491_v13  ;;  %18495 = vmatprep.mubr.f32.mxu1 %v20621_v28 }
 0x389   : > { %19528 = vmatprep.subr.bf16.mxu1 %v19491_v13 }
 0x38d   : > { %18454 = vmatmul.mubr.f32.vlgmr.msra.gmra.mrb[16].mxu0 %v20619_v26 }
 0x38e   : > { %19506 = vmatpush3.bf16.msra.mxu0 %v19491_v13  ;;  %18496 = vmatmul.mubr.f32.vlgmr.msra.gmra.mrb[16].mxu1 %v20672_v52 }
 0x38f   : > { %18460 = vmatprep.mubr.f32.mxu0 %v20607_v21  ;;  %19530 = vmatpush3.bf16.msra.mxu1 %v19491_v13 }
 0x390   : > { %19508 = vmatprep.subr.bf16.mxu0 %v19507_v24  ;;  %18502 = vmatprep.mubr.f32.mxu1 %v20636_v35 }
 0x391   : > { %19532 = vmatprep.subr.bf16.mxu1 %v19507_v24 }
 0x395   : > { %18461 = vmatmul.mubr.f32.vlgmr.msra.gmra.mrb[16].mxu0 %v20633_v33 }
 0x396   : > { %19510 = vmatpush3.bf16.msra.mxu0 %v19507_v24  ;;  %18503 = vmatmul.mubr.f32.vlgmr.msra.gmra.mrb[16].mxu1 %v20679_v56 }
 0x397   : > { %18467 = vmatprep.mubr.msk.f32.mxu0 %vm189_vm0, %v20579_v9  ;;  %19534 = vmatpush3.bf16.msra.mxu1 %v19507_v24 }
 0x398   : > { %19512 = vmatprep.subr.bf16.mxu0 %v19491_v13  ;;  %18509 = vmatprep.mubr.msk.f32.mxu1 %vm189_vm0, %v20582_v10 }
 0x399   : > { %19536 = vmatprep.subr.bf16.mxu1 %v19491_v13 }
 0x39d   : > { %18468 = vmatmul.mubr.msk.f32.vlgmr.msra.gmra.mrb[16].mxu0 %vm189_vm0, %v20598_v18 }
 0x39e   : > { %19514 = vmatpush3.bf16.msra.mxu0 %v19491_v13  ;;  %18510 = vmatmul.mubr.msk.f32.vlgmr.msra.gmra.mrb[16].mxu1 %vm189_vm0, %v20659_v46 }
 0x39f   : > { %18474 = vmatprep.mubr.msk.f32.mxu0 %vm189_vm0, %v20579_v9  ;;  %19538 = vmatpush3.bf16.msra.mxu1 %v19491_v13 }
 0x3a0   : > { %18516 = vmatprep.mubr.msk.f32.mxu1 %vm189_vm0, %v20582_v10  ;;  %19540 = vmatprep.subr.msk.bf16.mxu0 %vm20662_vm6, %v20409_v11 }
 0x3a1   : > { %19564 = vmatprep.subr.msk.bf16.mxu1 %vm20601_vm4, %v20409_v11 }
 0x3a5   : > { %18475 = vmatmul.mubr.msk.f32.vlgmr.msra.gmra.mrb[16].mxu0 %vm189_vm0, %v20598_v18 }
 0x3a6   : > { %18517 = vmatmul.mubr.msk.f32.vlgmr.msra.gmra.mrb[16].mxu1 %vm189_vm0, %v20659_v46  ;;  %19542 = vmatpush3.bf16.msk.msra.mxu0 %vm20662_vm6, %v20409_v11 }
 0x3a7   : > { %19566 = vmatpush3.bf16.msk.msra.mxu1 %vm20601_vm4, %v20409_v11  ;;  %19544 = vmatprep.subr.bf16.mxu0 %v20737_v8 }
 0x3a8   : > { %19568 = vmatprep.subr.bf16.mxu1 %v20735_v5 }
 0x3f4   : > { %v18224_v27 = vpop.f32.mrb[10].mxu0  ;;  %v18266_v29 = vpop.f32.mrb[10].mxu1 }
 0x3f5   : > { %v5847_v6 = vmul.f32 %v18224_v27, %v5845_v25  ;;  %v5834_v30 = vpop.f32.mrb[11].mxu0  ;;  %v6342_v32 = vpop.f32.mrb[11].mxu1  ;;  %v6356_v39 = vmul.f32 %v18266_v29, %v6354_v7 }
 0x3f6   : > { %v5846_v34 = vmul.f32 %v5845_v25, %v5834_v30  ;;  %v6355_v41 = vmul.f32 %v6354_v7, %v6342_v32 }
 0x3f7   : > { %v5849_v38 = vadd.f32 %v5847_v6, %v21044_v1 }
 0x3f8   : > { %v5848_v40 = vadd.f32 %v5846_v34, %v21046_v3  ;;  %v7893_v3 = vstv %s16854_s21  ;;  %s16957_s21 = sld [smem:[#allocation3 + $0x1d]] }
 0x3f9   : > { %v6358_v48 = vadd.f32 %v6356_v39, %v5849_v38  ;;  %v9423_v39 = vstv %s16878_s23  ;;  %s16971_s23 = sld [smem:[#allocation3 + $0x20]] }
 0x3fa   : > { %v6357_v49 = vadd.f32 %v6355_v41, %v5848_v40  ;;  %v9425_v40 = vmul.f32 %v21202_v61, %v9423_v39  ;;  %v9427_v41 = vstv %s16879_s26  ;;  %s16978_s26 = sld [smem:[#allocation3 + $0x21]] }
 0x420   : > { %v18308_v53 = vpop.f32.mrb[12].mxu0  ;;  %v18350_v54 = vpop.f32.mrb[12].mxu1 }
 0x421   : > { %v6871_v60 = vmul.f32 %v18308_v53, %v6869_v50  ;;  %v6857_v62 = vpop.f32.mrb[13].mxu0  ;;  %v7380_v63 = vmul.f32 %v18350_v54, %v7378_v51  ;;  %v7366_v0 = vpop.f32.mrb[13].mxu1 }
 0x422   : > { %v6870_v2 = vmul.f32 %v6869_v50, %v6857_v62  ;;  %v7379_v4 = vmul.f32 %v7378_v51, %v7366_v0  ;;  %v9429_v50 = vadd.f32 %v9427_v41, %v9425_v40  ;;  %v9439_v51 = vstv %s16881_s5  ;;  %s16994_s5 = sshll.u32 %s20393_s28, 10  ;;  %s16629_s28 = scalar_lea.sflag [#allocation7], %s20560_s18 }
 0x423   : > { %v6873_v12 = vadd.f32 %v6871_v60, %v6358_v48  ;;  %v9424_v48 = vmul.f32 %v21199_v58, %v9423_v39 }
 0x424   : > { %v6872_v1 = vadd.f32 %v6870_v2, %v6357_v49  ;;  %v9432_v49 = vstv %s16880_s4  ;;  %s16985_s4 = sld [smem:[#allocation3 + $0x23]] }
 0x425   : > { %v7382_v13 = vadd.f32 %v7380_v63, %v6873_v12  ;;  %v9428_v53 = vadd.f32 %v9427_v41, %v9424_v48 }
 0x426   : > { %v7381_v14 = vadd.f32 %v7379_v4, %v6872_v1 }
 0x44c   : > { %v18392_v16 = vpop.f32.mrb[14].mxu0 }
 0x44d   : > { %v7895_v20 = vmul.f32 %v18392_v16, %v7893_v3  ;;  %v18434_v22 = vpop.f32.mrb[14].mxu1  ;;  %v7881_v23 = vpop.f32.mrb[15].mxu0 }
 0x44e   : > { %v7894_v24 = vmul.f32 %v7893_v3, %v7881_v23  ;;  %v8390_v25 = vpop.f32.mrb[15].mxu1  ;;  %v8404_v29 = vmul.f32 %v18434_v22, %v8402_v17 }
 0x44f   : > { %v7897_v27 = vadd.f32 %v7895_v20, %v7382_v13  ;;  %v8403_v6 = vmul.f32 %v8402_v17, %v8390_v25 }
 0x450   : > { %v7896_v7 = vadd.f32 %v7894_v24, %v7381_v14 }
 0x451   : > { %v8406_v30 = vadd.f32 %v8404_v29, %v7897_v27 }
 0x452   : > { %v8405_v32 = vadd.f32 %v8403_v6, %v7896_v7  ;;  %v10468_v6 = vsel %vm189_vm0, %v21199_v58, 0 }
 0x453   : > { %v8408_v34 = vmax.f32 %v20933_v43, %v8406_v30  ;;  %v10471_v30 = vsel %vm189_vm0, %v21202_v61, 0 }
 0x454   : > { %v8407_v38 = vmax.f32 %v20930_v42, %v8405_v32  ;;  %v21339_v32 = vand.u32 4294901760, %v10468_v6 }
 0x455   : > { %16863 = vst.msk [vmem:[%s21025_s9 + $0x18] sm:$0xff] %vm189_vm0, %v8408_v34  ;;  %v21341_v34 = vand.u32 4294901760, %v10471_v30 }
 0x456   : > { %16862 = vst.msk [vmem:[%s21025_s9 + $0x10] sm:$0xff] %vm189_vm0, %v8407_v38  ;;  %v10541_v38 = vsub.f32 %v10468_v6, %v21339_v32 }
 0x457   : > { %v10551_v39 = vsub.f32 %v10471_v30, %v21341_v34 }
 0x458   : > { %v10542_v40 = vand.u32 4294901760, %v10541_v38 }
 0x459   : > { %v10552_v41 = vand.u32 4294901760, %v10551_v39 }
 0x45a   : > { %v10543_v48 = vsub.f32 %v10541_v38, %v10542_v40 }
 0x478   : > { %v18476_v43 = vpop.f32.mrb[16].mxu0 }
 0x479   : > { %v9434_v42 = vmul.f32 %v18476_v43, %v9432_v49  ;;  %v9448_v54 = vsel %vm189_vm0, %v18476_v43, 0  ;;  %v8909_v60 = vpop.f32.mrb[17].mxu0  ;;  %v21299_v62 = vpop.f32.mrb[16].mxu1 }
 0x47a   : > { %v21301_v63 = vand.u32 4294901760, %v9448_v54  ;;  %v9433_v0 = vmul.f32 %v9432_v49, %v8909_v60  ;;  %v9445_v2 = vsel %vm189_vm0, %v8909_v60, 0  ;;  %v9441_v4 = vmul.f32 %v21299_v62, %v9439_v51  ;;  %v21305_v12 = vpop.f32.mrb[17].mxu1 }
 0x47b   : > { %v9436_v1 = vadd.f32 %v9434_v42, %v9429_v50  ;;  %v9517_v13 = vand.u32 4294901760, %v9445_v2  ;;  %v9440_v14 = vmul.f32 %v9439_v51, %v21305_v12  ;;  %v10553_v49 = vsub.f32 %v10551_v39, %v10552_v41 }
 0x47c   : > { %v9528_v3 = vsub.f32 %v9448_v54, %v21301_v63  ;;  %v9435_v16 = vadd.f32 %v9433_v0, %v9428_v53  ;;  %v10544_v50 = vand.u32 4294901760, %v10543_v48  ;;  %v11492_v43 = vsel %vm189_vm0, %v21305_v12, 0 }
 0x47d   : > { %v9518_v17 = vsub.f32 %v9445_v2, %v9517_v13  ;;  %v21309_v20 = vadd.f32 %v9441_v4, %v9436_v1  ;;  %v10554_v51 = vand.u32 4294901760, %v10553_v49  ;;  %v11495_v53 = vsel %vm189_vm0, %v21299_v62, 0 }
 0x47e   : > { %v9529_v22 = vand.u32 4294901760, %v9528_v3  ;;  %v21311_v23 = vadd.f32 %v9440_v14, %v9435_v16  ;;  %v21405_v42 = vand.u32 4294901760, %v11492_v43  ;;  %v21409_v54 = vand.u32 4294901760, %v11495_v53  ;;  %v21467_v14 = vld [vmem:[%s20566_s25 + $0x38] sm:$0xff] }
 0x47f   : > { %v9519_v24 = vand.u32 4294901760, %v9518_v17  ;;  %v12529_v16 = vand.u32 4294901760, %v21467_v14 }
 0x480   : > { %v9530_v25 = vsub.f32 %v9528_v3, %v9529_v22  ;;  %v11565_v60 = vsub.f32 %v11492_v43, %v21405_v42  ;;  %v11575_v62 = vsub.f32 %v11495_v53, %v21409_v54 }
 0x481   : > { %v9520_v27 = vsub.f32 %v9518_v17, %v9519_v24 }
 0x482   : > { %v9531_v7 = vand.u32 4294901760, %v9530_v25  ;;  %v11576_v0 = vand.u32 4294901760, %v11575_v62 }
 0x483   : > { %v9521_v29 = vand.u32 4294901760, %v9520_v27 }
 0x484   : > { %v11577_v4 = vsub.f32 %v11575_v62, %v11576_v0 }
 0x485   : > { %18523 = vmatprep.mubr.f32.mxu0 %v9521_v29  ;;  %18565 = vmatprep.mubr.f32.mxu1 %v9521_v29 }
 0x486   : > { %18524 = vmatmul.mubr.f32.vlgmr.msra.gmra.mrb[18].mxu0 %v9531_v7  ;;  %18566 = vmatmul.mubr.f32.vlgmr.msra.gmra.mrb[18].mxu1 %v9531_v7  ;;  %v11578_v1 = vand.u32 4294901760, %v11577_v4 }
 0x487   : > { %18530 = vmatprep.mubr.f32.mxu0 %v9517_v13  ;;  %18572 = vmatprep.mubr.f32.mxu1 %v9517_v13 }
 0x488   : > { %19546 = vmatpush3.bf16.msra.mxu0 %v20737_v8  ;;  %19570 = vmatpush3.bf16.msra.mxu1 %v20735_v5 }
 0x489   : > { %19548 = vmatprep.subr.bf16.mxu0 %v20676_v55  ;;  %19572 = vmatprep.subr.bf16.mxu1 %v20630_v31 }
 0x48e   : > { %18531 = vmatmul.mubr.f32.vlgmr.msra.gmra.mrb[18].mxu0 %v21301_v63  ;;  %18573 = vmatmul.mubr.f32.vlgmr.msra.gmra.mrb[18].mxu1 %v21301_v63 }
 0x48f   : > { %18537 = vmatprep.mubr.f32.mxu0 %v9518_v17  ;;  %18579 = vmatprep.mubr.f32.mxu1 %v9518_v17 }
 0x490   : > { %19550 = vmatpush3.bf16.msra.mxu0 %v20676_v55  ;;  %19574 = vmatpush3.bf16.msra.mxu1 %v20630_v31 }
 0x491   : > { %19552 = vmatprep.subr.msk.bf16.mxu0 %vm20662_vm6, %v20409_v11  ;;  %19576 = vmatprep.subr.msk.bf16.mxu1 %vm20601_vm4, %v20409_v11 }
 0x496   : > { %18538 = vmatmul.mubr.f32.vlgmr.msra.gmra.mrb[18].mxu0 %v9528_v3  ;;  %18580 = vmatmul.mubr.f32.vlgmr.msra.gmra.mrb[18].mxu1 %v9528_v3 }
 0x497   : > { %18544 = vmatprep.mubr.f32.mxu0 %v9519_v24  ;;  %18586 = vmatprep.mubr.f32.mxu1 %v9519_v24 }
 0x498   : > { %19554 = vmatpush3.bf16.msk.msra.mxu0 %vm20662_vm6, %v20409_v11  ;;  %19578 = vmatpush3.bf16.msk.msra.mxu1 %vm20601_vm4, %v20409_v11 }
 0x499   : > { %19556 = vmatprep.subr.bf16.mxu0 %v20683_v57  ;;  %19580 = vmatprep.subr.bf16.mxu1 %v20644_v37 }
 0x49e   : > { %18545 = vmatmul.mubr.f32.vlgmr.msra.gmra.mrb[18].mxu0 %v9529_v22  ;;  %18587 = vmatmul.mubr.f32.vlgmr.msra.gmra.mrb[18].mxu1 %v9529_v22  ;;  %v12621_v22 = vsub.f32 %v21467_v14, %v12529_v16 }
 0x49f   : > { %18551 = vmatprep.mubr.f32.mxu0 %v9517_v13  ;;  %18593 = vmatprep.mubr.f32.mxu1 %v9517_v13 }
 0x4a0   : > { %19558 = vmatpush3.bf16.msra.mxu0 %v20683_v57  ;;  %19582 = vmatpush3.bf16.msra.mxu1 %v20644_v37  ;;  %v12622_v25 = vand.u32 4294901760, %v12621_v22 }
 0x4a1   : > { %19560 = vmatprep.subr.msk.bf16.mxu0 %vm20662_vm6, %v20409_v11  ;;  %19584 = vmatprep.subr.msk.bf16.mxu1 %vm20601_vm4, %v20409_v11 }
 0x4a2   : > { %v12623_v7 = vsub.f32 %v12621_v22, %v12622_v25 }
 0x4a4   : > { %v12624_v30 = vand.u32 4294901760, %v12623_v7 }
 0x4a6   : > { %18552 = vmatmul.mubr.f32.vlgmr.msra.gmra.mrb[18].mxu0 %v21301_v63  ;;  %18594 = vmatmul.mubr.f32.vlgmr.msra.gmra.mrb[18].mxu1 %v21301_v63 }
 0x4a7   : > { %18558 = vmatprep.mubr.f32.mxu0 %v9517_v13  ;;  %18600 = vmatprep.mubr.f32.mxu1 %v9517_v13  ;;  %v21464_v13 = vld [vmem:[%s20566_s25 + $0x30] sm:$0xff]  ;;  %s16888_s25 = sld [smem:[#allocation3 + $0x12]] }
 0x4a8   : > { %19562 = vmatpush3.bf16.msk.msra.mxu0 %vm20662_vm6, %v20409_v11  ;;  %19586 = vmatpush3.bf16.msk.msra.mxu1 %vm20601_vm4, %v20409_v11  ;;  %v12526_v3 = vand.u32 4294901760, %v21464_v13 }
 0x4a9   : > { %19588 = vmatprep.subr.msk.bf16.mxu0 %vm20662_vm6, %v20409_v11  ;;  %19612 = vmatprep.subr.msk.bf16.mxu1 %vm20601_vm4, %v20409_v11 }
 0x4aa   : > { %v12614_v17 = vsub.f32 %v21464_v13, %v12526_v3  ;;  %v19683_v27 = vpack.c.bf16 %v12529_v16, %v12526_v3 }
 0x4ac   : > { %v12615_v24 = vand.u32 4294901760, %v12614_v17 }
 0x4ae   : > { %18559 = vmatmul.mubr.f32.vlgmr.msra.gmra.mrb[18].mxu0 %v21301_v63  ;;  %18601 = vmatmul.mubr.f32.vlgmr.msra.gmra.mrb[18].mxu1 %v21301_v63  ;;  %v11566_v63 = vand.u32 4294901760, %v11565_v60  ;;  %v12616_v29 = vsub.f32 %v12614_v17, %v12615_v24 }
 0x4af   : > { %19590 = vmatpush3.bf16.msk.msra.mxu0 %vm20662_vm6, %v20409_v11  ;;  %19614 = vmatpush3.bf16.msk.msra.mxu1 %vm20601_vm4, %v20409_v11 }
 0x4b0   : > { %18607 = vmatprep.mubr.f32.mxu0 %v10544_v50  ;;  %18649 = vmatprep.mubr.f32.mxu1 %v10544_v50  ;;  %v11567_v2 = vsub.f32 %v11565_v60, %v11566_v63  ;;  %v12617_v6 = vand.u32 4294901760, %v12616_v29  ;;  %v13531_v29 = vstv %s16940_s17 }
 0x4b1   : > { %19592 = vmatprep.subr.bf16.mxu0 %v20737_v8  ;;  %19616 = vmatprep.subr.bf16.mxu1 %v20735_v5  ;;  %v13533_v7 = vmul.f32 %v21467_v14, %v13531_v29 }
 0x4b2   : > { %18608 = vmatmul.mubr.f32.vlgmr.msra.gmra.mrb[20].mxu0 %v10554_v51  ;;  %18650 = vmatmul.mubr.f32.vlgmr.msra.gmra.mrb[20].mxu1 %v10554_v51  ;;  %v11568_v12 = vand.u32 4294901760, %v11567_v2 }
 0x4b3   : > { %19594 = vmatpush3.bf16.msra.mxu0 %v20737_v8  ;;  %19618 = vmatpush3.bf16.msra.mxu1 %v20735_v5 }
 0x4b4   : > { %18614 = vmatprep.mubr.f32.mxu0 %v21339_v32  ;;  %18656 = vmatprep.mubr.f32.mxu1 %v21339_v32 }
 0x4b5   : > { %19596 = vmatprep.subr.bf16.mxu0 %v20676_v55  ;;  %19620 = vmatprep.subr.bf16.mxu1 %v20630_v31 }
 0x4ba   : > { %18615 = vmatmul.mubr.f32.vlgmr.msra.gmra.mrb[20].mxu0 %v21341_v34  ;;  %18657 = vmatmul.mubr.f32.vlgmr.msra.gmra.mrb[20].mxu1 %v21341_v34 }
 0x4bb   : > { %19598 = vmatpush3.bf16.msra.mxu0 %v20676_v55  ;;  %19622 = vmatpush3.bf16.msra.mxu1 %v20630_v31 }
 0x4bc   : > { %18621 = vmatprep.mubr.f32.mxu0 %v10541_v38  ;;  %18663 = vmatprep.mubr.f32.mxu1 %v10541_v38  ;;  %v11486_v38 = vstv %s16909_s14  ;;  %s21766_s14 = scalar_lea.hbm %s21824_s3, %s16994_s5 }
 0x4bd   : > { %19600 = vmatprep.subr.msk.bf16.mxu0 %vm20662_vm6, %v20409_v11  ;;  %19624 = vmatprep.subr.msk.bf16.mxu1 %vm20601_vm4, %v20409_v11 }
 0x4c2   : > { %18622 = vmatmul.mubr.f32.vlgmr.msra.gmra.mrb[20].mxu0 %v10551_v39  ;;  %18664 = vmatmul.mubr.f32.vlgmr.msra.gmra.mrb[20].mxu1 %v10551_v39 }
 0x4c3   : > { %19602 = vmatpush3.bf16.msk.msra.mxu0 %vm20662_vm6, %v20409_v11  ;;  %19626 = vmatpush3.bf16.msk.msra.mxu1 %vm20601_vm4, %v20409_v11 }
 0x4c4   : > { %18628 = vmatprep.mubr.f32.mxu0 %v10542_v40  ;;  %18670 = vmatprep.mubr.f32.mxu1 %v10542_v40 }
 0x4c5   : > { %19604 = vmatprep.subr.bf16.mxu0 %v20683_v57  ;;  %19628 = vmatprep.subr.bf16.mxu1 %v20644_v37 }
 0x4ca   : > { %18629 = vmatmul.mubr.f32.vlgmr.msra.gmra.mrb[20].mxu0 %v10552_v41  ;;  %18671 = vmatmul.mubr.f32.vlgmr.msra.gmra.mrb[20].mxu1 %v10552_v41 }
 0x4cb   : > { %19606 = vmatpush3.bf16.msra.mxu0 %v20683_v57  ;;  %19630 = vmatpush3.bf16.msra.mxu1 %v20644_v37 }
 0x4cc   : > { %18635 = vmatprep.mubr.f32.mxu0 %v21339_v32  ;;  %18677 = vmatprep.mubr.f32.mxu1 %v21339_v32 }
 0x4cd   : > { %19608 = vmatprep.subr.msk.bf16.mxu0 %vm20662_vm6, %v20409_v11  ;;  %19632 = vmatprep.subr.msk.bf16.mxu1 %vm20601_vm4, %v20409_v11 }
 0x4d2   : > { %18636 = vmatmul.mubr.f32.vlgmr.msra.gmra.mrb[20].mxu0 %v21341_v34  ;;  %18678 = vmatmul.mubr.f32.vlgmr.msra.gmra.mrb[20].mxu1 %v21341_v34 }
 0x4d3   : > { %19610 = vmatpush3.bf16.msk.msra.mxu0 %vm20662_vm6, %v20409_v11  ;;  %19634 = vmatpush3.bf16.msk.msra.mxu1 %vm20601_vm4, %v20409_v11 }
 0x4d4   : > { %18642 = vmatprep.mubr.f32.mxu0 %v21339_v32  ;;  %18684 = vmatprep.mubr.f32.mxu1 %v21339_v32  ;;  %v19687_v32 = vpack.c.bf16 %v12624_v30, %v12617_v6  ;;  %v13535_v6 = vstv %s16941_s20  ;;  %v13532_v30 = vmul.f32 %v21464_v13, %v13531_v29 }
 0x4d5   : > { %19636 = vmatprep.subr.msk.bf16.mxu0 %vm20662_vm6, %v20409_v11  ;;  %19660 = vmatprep.subr.msk.bf16.mxu1 %vm20601_vm4, %v20409_v11 }
 0x4da   : > { %18643 = vmatmul.mubr.f32.vlgmr.msra.gmra.mrb[20].mxu0 %v21341_v34  ;;  %18685 = vmatmul.mubr.f32.vlgmr.msra.gmra.mrb[20].mxu1 %v21341_v34  ;;  %v19691_v34 = vpack.c.bf16 %v12621_v22, %v12614_v17 }
 0x4db   : > { %19638 = vmatpush3.bf16.msk.msra.mxu0 %vm20662_vm6, %v20409_v11  ;;  %18691 = vmatprep.mubr.f32.mxu0 %v11568_v12 }
 0x4dc   : > { %19662 = vmatpush3.bf16.msk.msra.mxu1 %vm20601_vm4, %v20409_v11  ;;  %18733 = vmatprep.mubr.f32.mxu1 %v11568_v12 }
 0x4dd   : > { %19640 = vmatprep.subr.bf16.mxu0 %v20737_v8  ;;  %19664 = vmatprep.subr.bf16.mxu1 %v20735_v5 }
 0x4de   : > { %18692 = vmatmul.mubr.f32.vlgmr.msra.gmra.mrb[22].mxu0 %v11578_v1 }
 0x4df   : > { %18734 = vmatmul.mubr.f32.vlgmr.msra.gmra.mrb[22].mxu1 %v11578_v1  ;;  %18698 = vmatprep.mubr.f32.mxu0 %v21405_v42 }
 0x4e0   : > { %18740 = vmatprep.mubr.f32.mxu1 %v21405_v42  ;;  %19642 = vmatpush3.bf16.msra.mxu0 %v20737_v8 }
 0x4e1   : > { %19666 = vmatpush3.bf16.msra.mxu1 %v20735_v5  ;;  %19644 = vmatprep.subr.bf16.mxu0 %v20676_v55 }
 0x4e2   : > { %19668 = vmatprep.subr.bf16.mxu1 %v20630_v31 }
 0x4e6   : > { %18699 = vmatmul.mubr.f32.vlgmr.msra.gmra.mrb[22].mxu0 %v21409_v54 }
 0x4e7   : > { %18741 = vmatmul.mubr.f32.vlgmr.msra.gmra.mrb[22].mxu1 %v21409_v54  ;;  %18705 = vmatprep.mubr.f32.mxu0 %v11565_v60 }
 0x4e8   : > { %18747 = vmatprep.mubr.f32.mxu1 %v11565_v60  ;;  %19646 = vmatpush3.bf16.msra.mxu0 %v20676_v55 }
 0x4e9   : > { %19670 = vmatpush3.bf16.msra.mxu1 %v20630_v31  ;;  %19648 = vmatprep.subr.msk.bf16.mxu0 %vm20662_vm6, %v20409_v11 }
 0x4ea   : > { %19672 = vmatprep.subr.msk.bf16.mxu1 %vm20601_vm4, %v20409_v11 }
 0x4ee   : > { %18706 = vmatmul.mubr.f32.vlgmr.msra.gmra.mrb[22].mxu0 %v11575_v62 }
 0x4ef   : > { %18748 = vmatmul.mubr.f32.vlgmr.msra.gmra.mrb[22].mxu1 %v11575_v62  ;;  %18712 = vmatprep.mubr.f32.mxu0 %v11566_v63  ;;  %v12510_v62 = vstv %s16923_s16  ;;  %s20410_s16 = smov [#allocation8]  }
 0x4f0   : > { %18754 = vmatprep.mubr.f32.mxu1 %v11566_v63  ;;  %19650 = vmatpush3.bf16.msk.msra.mxu0 %vm20662_vm6, %v20409_v11  ;;  %s20321_s17 = sshll.u32 %s20410_s16, 4  ;;  %s20322_s17 = int_to_ptr.vmem [resolvable:$false] %s20321_s17 }
 0x4f1   : > { %19674 = vmatpush3.bf16.msk.msra.mxu1 %vm20601_vm4, %v20409_v11  ;;  %19652 = vmatprep.subr.bf16.mxu0 %v20683_v57  ;;  %s20323_s20 = scalar_lea.vmem %s20322_s17, 2048 }
 0x4f2   : > { %19676 = vmatprep.subr.bf16.mxu1 %v20644_v37 }
 0x4f6   : > { %18713 = vmatmul.mubr.f32.vlgmr.msra.gmra.mrb[22].mxu0 %v11576_v0 }
 0x4f7   : > { %18755 = vmatmul.mubr.f32.vlgmr.msra.gmra.mrb[22].mxu1 %v11576_v0  ;;  %18719 = vmatprep.mubr.f32.mxu0 %v21405_v42 }
 0x4f8   : > { %18761 = vmatprep.mubr.f32.mxu1 %v21405_v42  ;;  %19654 = vmatpush3.bf16.msra.mxu0 %v20683_v57 }
 0x4f9   : > { %19678 = vmatpush3.bf16.msra.mxu1 %v20644_v37  ;;  %19656 = vmatprep.subr.msk.bf16.mxu0 %vm20662_vm6, %v20409_v11 }
 0x4fa   : > { %19680 = vmatprep.subr.msk.bf16.mxu1 %vm20601_vm4, %v20409_v11 }
 0x4fe   : > { %18720 = vmatmul.mubr.f32.vlgmr.msra.gmra.mrb[22].mxu0 %v21409_v54 }
 0x4ff   : > { %18762 = vmatmul.mubr.f32.vlgmr.msra.gmra.mrb[22].mxu1 %v21409_v54  ;;  %18726 = vmatprep.mubr.f32.mxu0 %v21405_v42 }
 0x500   : > { %18768 = vmatprep.mubr.f32.mxu1 %v21405_v42  ;;  %19658 = vmatpush3.bf16.msk.msra.mxu0 %vm20662_vm6, %v20409_v11 }
 0x501   : > { %19682 = vmatpush3.bf16.msk.msra.mxu1 %vm20601_vm4, %v20409_v11  ;;  %19684 = vmatprep.subr.bf16.mxu0 %v19683_v27 }
 0x502   : > { %19708 = vmatprep.subr.bf16.mxu1 %v19683_v27 }
 0x506   : > { %18727 = vmatmul.mubr.f32.vlgmr.msra.gmra.mrb[22].mxu0 %v21409_v54 }
 0x507   : > { %18769 = vmatmul.mubr.f32.vlgmr.msra.gmra.mrb[22].mxu1 %v21409_v54  ;;  %19686 = vmatpush3.bf16.msra.mxu0 %v19683_v27 }
 0x508   : > { %18775 = vmatprep.mubr.f32.mxu0 %v20638_v36  ;;  %19710 = vmatpush3.bf16.msra.mxu1 %v19683_v27  ;;  %v19699_v36 = vpack.c.bf16 %v12622_v25, %v12615_v24 }
 0x509   : > { %19688 = vmatprep.subr.bf16.mxu0 %v19687_v32  ;;  %18817 = vmatprep.mubr.f32.mxu1 %v20657_v45 }
 0x50a   : > { %18776 = vmatmul.mubr.f32.vlgmr.msra.gmra.mrb[24].mxu0 %v20655_v44  ;;  %19712 = vmatprep.subr.bf16.mxu1 %v19687_v32 }
 0x50b   : > { %19690 = vmatpush3.bf16.msra.mxu0 %v19687_v32  ;;  %18818 = vmatmul.mubr.f32.vlgmr.msra.gmra.mrb[24].mxu1 %v20687_v59  ;;  %v10977_v59 = vstv %s16902_s8 }
 0x50c   : > { %18782 = vmatprep.mubr.msk.f32.mxu0 %vm189_vm0, %v20579_v9  ;;  %19714 = vmatpush3.bf16.msra.mxu1 %v19687_v32  ;;  %v13540_v32 = vstv %s16942_s24 }
 0x50d   : > { %19692 = vmatprep.subr.bf16.mxu0 %v19691_v34  ;;  %18824 = vmatprep.mubr.msk.f32.mxu1 %vm189_vm0, %v20582_v10 }
 0x50e   : > { %19716 = vmatprep.subr.bf16.mxu1 %v19691_v34 }
 0x512   : > { %18783 = vmatmul.mubr.msk.f32.vlgmr.msra.gmra.mrb[24].mxu0 %vm189_vm0, %v20598_v18 }
 0x513   : > { %19694 = vmatpush3.bf16.msra.mxu0 %v19691_v34  ;;  %18825 = vmatmul.mubr.msk.f32.vlgmr.msra.gmra.mrb[24].mxu1 %vm189_vm0, %v20659_v46 }
 0x514   : > { %18789 = vmatprep.mubr.f32.mxu0 %v20592_v15  ;;  %19718 = vmatpush3.bf16.msra.mxu1 %v19691_v34  ;;  %v13537_v34 = vadd.f32 %v13535_v6, %v13533_v7 }
 0x515   : > { %19696 = vmatprep.subr.bf16.mxu0 %v19683_v27  ;;  %18831 = vmatprep.mubr.f32.mxu1 %v20621_v28 }
 0x516   : > { %19720 = vmatprep.subr.bf16.mxu1 %v19683_v27 }
 0x51a   : > { %18790 = vmatmul.mubr.f32.vlgmr.msra.gmra.mrb[24].mxu0 %v20619_v26 }
 0x51b   : > { %19698 = vmatpush3.bf16.msra.mxu0 %v19683_v27  ;;  %18832 = vmatmul.mubr.f32.vlgmr.msra.gmra.mrb[24].mxu1 %v20672_v52 }
 0x51c   : > { %18796 = vmatprep.mubr.f32.mxu0 %v20607_v21  ;;  %19722 = vmatpush3.bf16.msra.mxu1 %v19683_v27 }
 0x51d   : > { %19700 = vmatprep.subr.bf16.mxu0 %v19699_v36  ;;  %18838 = vmatprep.mubr.f32.mxu1 %v20636_v35 }
 0x51e   : > { %19724 = vmatprep.subr.bf16.mxu1 %v19699_v36 }
 0x522   : > { %18797 = vmatmul.mubr.f32.vlgmr.msra.gmra.mrb[24].mxu0 %v20633_v33 }
 0x523   : > { %19702 = vmatpush3.bf16.msra.mxu0 %v19699_v36  ;;  %18839 = vmatmul.mubr.f32.vlgmr.msra.gmra.mrb[24].mxu1 %v20679_v56 }
 0x524   : > { %18803 = vmatprep.mubr.msk.f32.mxu0 %vm189_vm0, %v20579_v9  ;;  %19726 = vmatpush3.bf16.msra.mxu1 %v19699_v36  ;;  %v13547_v36 = vstv %s16943_s10 }
 0x525   : > { %19704 = vmatprep.subr.bf16.mxu0 %v19683_v27  ;;  %18845 = vmatprep.mubr.msk.f32.mxu1 %vm189_vm0, %v20582_v10 }
 0x526   : > { %19728 = vmatprep.subr.bf16.mxu1 %v19683_v27 }
 0x52a   : > { %18804 = vmatmul.mubr.msk.f32.vlgmr.msra.gmra.mrb[24].mxu0 %vm189_vm0, %v20598_v18 }
 0x52b   : > { %19706 = vmatpush3.bf16.msra.mxu0 %v19683_v27  ;;  %18846 = vmatmul.mubr.msk.f32.vlgmr.msra.gmra.mrb[24].mxu1 %vm189_vm0, %v20659_v46 }
 0x52c   : > { %18810 = vmatprep.mubr.msk.f32.mxu0 %vm189_vm0, %v20579_v9  ;;  %19730 = vmatpush3.bf16.msra.mxu1 %v19683_v27  ;;  %v9953_v9 = vstv %s16888_s25  ;;  %s16645_s25 = sshll.u32 %s21025_s9, 4  ;;  %s21768_s25 = int_to_ptr.vmem [resolvable:$true] %s16645_s25 }
 0x52d   : > { %18852 = vmatprep.mubr.msk.f32.mxu1 %vm189_vm0, %v20582_v10  ;;  %19732 = vmatprep.subr.msk.bf16.mxu0 %vm20662_vm6, %v20409_v11  ;;  %p20324_p0 = scmp.lt.s32.totalorder %s21768_s25, %s20322_s17 }
 0x52e   : > { %19756 = vmatprep.subr.msk.bf16.mxu1 %vm20601_vm4, %v20409_v11 }
 0x532   : > { %18811 = vmatmul.mubr.msk.f32.vlgmr.msra.gmra.mrb[24].mxu0 %vm189_vm0, %v20598_v18  ;;  %v10462_v18 = vstv %s16895_s7 }
 0x533   : > { %18853 = vmatmul.mubr.msk.f32.vlgmr.msra.gmra.mrb[24].mxu1 %vm189_vm0, %v20659_v46  ;;  %19734 = vmatpush3.bf16.msk.msra.mxu0 %vm20662_vm6, %v20409_v11 }
 0x534   : > { %19758 = vmatpush3.bf16.msk.msra.mxu1 %vm20601_vm4, %v20409_v11  ;;  %19736 = vmatprep.subr.bf16.mxu0 %v20737_v8 }
 0x535   : > { %19760 = vmatprep.subr.bf16.mxu1 %v20735_v5 }
 0x581   : > { %v18560_v10 = vpop.f32.mrb[18].mxu0  ;;  %v18602_v15 = vpop.f32.mrb[18].mxu1 }
 0x582   : > { %v9955_v21 = vmul.f32 %v18560_v10, %v9953_v9  ;;  %v9942_v26 = vpop.f32.mrb[19].mxu0  ;;  %v10450_v28 = vpop.f32.mrb[19].mxu1  ;;  %v10464_v44 = vmul.f32 %v18602_v15, %v10462_v18 }
 0x583   : > { %v9954_v33 = vmul.f32 %v9953_v9, %v9942_v26  ;;  %v10463_v46 = vmul.f32 %v10462_v18, %v10450_v28  ;;  %v13536_v9 = vadd.f32 %v13535_v6, %v13532_v30 }
 0x584   : > { %v9957_v35 = vadd.f32 %v9955_v21, %v21309_v20 }
 0x585   : > { %v9956_v45 = vadd.f32 %v9954_v33, %v21311_v23  ;;  %v12001_v23 = vstv %s16916_s15  ;;  %s20317_s15 = scalar_lea.vmem %s21768_s25, 1024 }
 0x586   : > { %v10466_v52 = vadd.f32 %v10464_v44, %v9957_v35  ;;  %p20318_p2 = scmp.ne.s32.totalorder %s21768_s25, %s20317_s15  ;;  %p20325_p7 = scmp.lt.s32.totalorder %s20323_s20, %s20317_s15 }
 0x587   : > { %v10465_v56 = vadd.f32 %v10463_v46, %v9956_v45 }
 0x588   : > { %p20319_p5 = pnand %p20318_p2, %p21837_p3  ;;  %p20326_p10 = por %p20325_p7, %p20324_p0 }
 0x58a   : > { %p20320_p8 = pneg %p20319_p5 }
 0x58c   : > { %p20327_p13 = pnand %p20326_p10, %p20320_p8 }
 0x5ad   : > { %v18644_v39 = vpop.f32.mrb[20].mxu0  ;;  %v18686_v40 = vpop.f32.mrb[20].mxu1 }
 0x5ae   : > { %v10979_v41 = vmul.f32 %v18644_v39, %v10977_v59  ;;  %v10965_v48 = vpop.f32.mrb[21].mxu0  ;;  %v11488_v49 = vmul.f32 %v18686_v40, %v11486_v38  ;;  %v11474_v50 = vpop.f32.mrb[21].mxu1 }
 0x5af   : > { %v10978_v51 = vmul.f32 %v10977_v59, %v10965_v48  ;;  %v11487_v43 = vmul.f32 %v11486_v38, %v11474_v50 }
 0x5b0   : > { %v10981_v53 = vadd.f32 %v10979_v41, %v10466_v52 }
 0x5b1   : > { %v10980_v20 = vadd.f32 %v10978_v51, %v10465_v56 }
 0x5b2   : > { %v11490_v42 = vadd.f32 %v11488_v49, %v10981_v53  ;;  %v14579_v53 = vsel %vm189_vm0, %v21467_v14, 0 }
 0x5b3   : > { %v11489_v54 = vadd.f32 %v11487_v43, %v10980_v20  ;;  %v14576_v43 = vsel %vm189_vm0, %v21464_v13, 0 }
 0x5b4   : > { %v21604_v20 = vand.u32 4294901760, %v14576_v43 }
 0x5d9   : > { %v18728_v60 = vpop.f32.mrb[22].mxu0 }
 0x5da   : > { %v12003_v63 = vmul.f32 %v18728_v60, %v12001_v23  ;;  %v18770_v0 = vpop.f32.mrb[22].mxu1  ;;  %v11989_v2 = vpop.f32.mrb[23].mxu0 }
 0x5db   : > { %v12002_v4 = vmul.f32 %v12001_v23, %v11989_v2  ;;  %v12498_v12 = vpop.f32.mrb[23].mxu1  ;;  %v12512_v3 = vmul.f32 %v18770_v0, %v12510_v62 }
 0x5dc   : > { %v12005_v1 = vadd.f32 %v12003_v63, %v11490_v42  ;;  %v12511_v17 = vmul.f32 %v12510_v62, %v12498_v12  ;;  %v21606_v42 = vand.u32 4294901760, %v14579_v53 }
 0x5dd   : > { %v12004_v16 = vadd.f32 %v12002_v4, %v11489_v54  ;;  %v14649_v54 = vsub.f32 %v14576_v43, %v21604_v20 }
 0x5de   : > { %v12514_v22 = vadd.f32 %v12512_v3, %v12005_v1  ;;  %v14659_v23 = vsub.f32 %v14579_v53, %v21606_v42 }
 0x5df   : > { %v12513_v24 = vadd.f32 %v12511_v17, %v12004_v16  ;;  %v14650_v60 = vand.u32 4294901760, %v14649_v54 }
 0x5e0   : > { %v12516_v25 = vmax.f32 %v21202_v61, %v12514_v22  ;;  %v14660_v62 = vand.u32 4294901760, %v14659_v23 }
 0x5e1   : > { %v12515_v27 = vmax.f32 %v21199_v58, %v12513_v24  ;;  %v14651_v63 = vsub.f32 %v14649_v54, %v14650_v60 }
 0x5e2   : > { %16925 = vst.msk [vmem:[%s21025_s9 + $0x28] sm:$0xff] %vm189_vm0, %v12516_v25  ;;  %v14661_v0 = vsub.f32 %v14659_v23, %v14660_v62 }
 0x5e3   : > { %16924 = vst.msk [vmem:[%s21025_s9 + $0x20] sm:$0xff] %vm189_vm0, %v12515_v27  ;;  %v14652_v2 = vand.u32 4294901760, %v14651_v63 }
 0x5e4   : > { %v14662_v4 = vand.u32 4294901760, %v14661_v0 }
 0x605   : > { %v18812_v61 = vpop.f32.mrb[24].mxu0 }
 0x606   : > { %v13542_v58 = vmul.f32 %v18812_v61, %v13540_v32  ;;  %v13556_v10 = vsel %vm189_vm0, %v18812_v61, 0  ;;  %v13017_v15 = vpop.f32.mrb[25].mxu0  ;;  %v21564_v18 = vpop.f32.mrb[24].mxu1 }
 0x607   : > { %v21566_v21 = vand.u32 4294901760, %v13556_v10  ;;  %v13541_v26 = vmul.f32 %v13540_v32, %v13017_v15  ;;  %v13553_v28 = vsel %vm189_vm0, %v13017_v15, 0  ;;  %v13549_v33 = vmul.f32 %v21564_v18, %v13547_v36  ;;  %v21570_v35 = vpop.f32.mrb[25].mxu1 }
 0x608   : > { %v13544_v44 = vadd.f32 %v13542_v58, %v13537_v34  ;;  %v13625_v45 = vand.u32 4294901760, %v13553_v28  ;;  %v13548_v46 = vmul.f32 %v13547_v36, %v21570_v35  ;;  %v15600_v12 = vsel %vm189_vm0, %v21570_v35, 0 }
 0x609   : > { %v13636_v52 = vsub.f32 %v13556_v10, %v21566_v21  ;;  %v13543_v56 = vadd.f32 %v13541_v26, %v13536_v9  ;;  %v15603_v1 = vsel %vm189_vm0, %v21564_v18, 0  ;;  %v21670_v3 = vand.u32 4294901760, %v15600_v12 }
 0x60a   : > { %v13626_v59 = vsub.f32 %v13553_v28, %v13625_v45  ;;  %v21574_v38 = vadd.f32 %v13549_v33, %v13544_v44  ;;  %v21674_v16 = vand.u32 4294901760, %v15603_v1  ;;  %v15085_v9 = vstv %s16964_s22 }
 0x60b   : > { %v13637_v39 = vand.u32 4294901760, %v13636_v52  ;;  %v21576_v40 = vadd.f32 %v13548_v46, %v13543_v56  ;;  %v15673_v17 = vsub.f32 %v15600_v12, %v21670_v3  ;;  %v15594_v15 = vstv %s16971_s23 }
 0x60c   : > { %v13627_v41 = vand.u32 4294901760, %v13626_v59  ;;  %v15683_v22 = vsub.f32 %v15603_v1, %v21674_v16  ;;  %v16109_v56 = vstv %s16978_s26 }
 0x60d   : > { %v13638_v48 = vsub.f32 %v13636_v52, %v13637_v39  ;;  %v15674_v24 = vand.u32 4294901760, %v15673_v17 }
 0x60e   : > { %v13628_v49 = vsub.f32 %v13626_v59, %v13627_v41  ;;  %v15684_v25 = vand.u32 4294901760, %v15683_v22 }
 0x60f   : > { %v13639_v51 = vand.u32 4294901760, %v13638_v48  ;;  %v15675_v27 = vsub.f32 %v15673_v17, %v15674_v24 }
 0x610   : > { %v13629_v50 = vand.u32 4294901760, %v13628_v49  ;;  %v15685_v29 = vsub.f32 %v15683_v22, %v15684_v25 }
 0x611   : > { %v15676_v7 = vand.u32 4294901760, %v15675_v27 }
 0x612   : > { %18859 = vmatprep.mubr.f32.mxu0 %v13629_v50  ;;  %18901 = vmatprep.mubr.f32.mxu1 %v13629_v50  ;;  %v15686_v6 = vand.u32 4294901760, %v15685_v29 }
 0x613   : > { %18860 = vmatmul.mubr.f32.vlgmr.msra.gmra.mrb[26].mxu0 %v13639_v51  ;;  %18902 = vmatmul.mubr.f32.vlgmr.msra.gmra.mrb[26].mxu1 %v13639_v51 }
 0x614   : > { %18866 = vmatprep.mubr.f32.mxu0 %v13625_v45  ;;  %18908 = vmatprep.mubr.f32.mxu1 %v13625_v45 }
 0x615   : > { %19738 = vmatpush3.bf16.msra.mxu0 %v20737_v8  ;;  %19762 = vmatpush3.bf16.msra.mxu1 %v20735_v5 }
 0x616   : > { %19740 = vmatprep.subr.bf16.mxu0 %v20676_v55  ;;  %19764 = vmatprep.subr.bf16.mxu1 %v20630_v31 }
 0x61b   : > { %18867 = vmatmul.mubr.f32.vlgmr.msra.gmra.mrb[26].mxu0 %v21566_v21  ;;  %18909 = vmatmul.mubr.f32.vlgmr.msra.gmra.mrb[26].mxu1 %v21566_v21 }
 0x61c   : > { %18873 = vmatprep.mubr.f32.mxu0 %v13626_v59  ;;  %18915 = vmatprep.mubr.f32.mxu1 %v13626_v59 }
 0x61d   : > { %19742 = vmatpush3.bf16.msra.mxu0 %v20676_v55  ;;  %19766 = vmatpush3.bf16.msra.mxu1 %v20630_v31 }
 0x61e   : > { %19744 = vmatprep.subr.msk.bf16.mxu0 %vm20662_vm6, %v20409_v11  ;;  %19768 = vmatprep.subr.msk.bf16.mxu1 %vm20601_vm4, %v20409_v11 }
 0x623   : > { %18874 = vmatmul.mubr.f32.vlgmr.msra.gmra.mrb[26].mxu0 %v13636_v52  ;;  %18916 = vmatmul.mubr.f32.vlgmr.msra.gmra.mrb[26].mxu1 %v13636_v52 }
 0x624   : > { %18880 = vmatprep.mubr.f32.mxu0 %v13627_v41  ;;  %18922 = vmatprep.mubr.f32.mxu1 %v13627_v41 }
 0x625   : > { %19746 = vmatpush3.bf16.msk.msra.mxu0 %vm20662_vm6, %v20409_v11  ;;  %19770 = vmatpush3.bf16.msk.msra.mxu1 %vm20601_vm4, %v20409_v11 }
 0x626   : > { %19748 = vmatprep.subr.bf16.mxu0 %v20683_v57  ;;  %19772 = vmatprep.subr.bf16.mxu1 %v20644_v37 }
 0x62b   : > { %18881 = vmatmul.mubr.f32.vlgmr.msra.gmra.mrb[26].mxu0 %v13637_v39  ;;  %18923 = vmatmul.mubr.f32.vlgmr.msra.gmra.mrb[26].mxu1 %v13637_v39 }
 0x62c   : > { %18887 = vmatprep.mubr.f32.mxu0 %v13625_v45  ;;  %18929 = vmatprep.mubr.f32.mxu1 %v13625_v45 }
 0x62d   : > { %19750 = vmatpush3.bf16.msra.mxu0 %v20683_v57  ;;  %19774 = vmatpush3.bf16.msra.mxu1 %v20644_v37 }
 0x62e   : > { %19752 = vmatprep.subr.msk.bf16.mxu0 %vm20662_vm6, %v20409_v11  ;;  %19776 = vmatprep.subr.msk.bf16.mxu1 %vm20601_vm4, %v20409_v11 }
 0x633   : > { %18888 = vmatmul.mubr.f32.vlgmr.msra.gmra.mrb[26].mxu0 %v21566_v21  ;;  %18930 = vmatmul.mubr.f32.vlgmr.msra.gmra.mrb[26].mxu1 %v21566_v21 }
 0x634   : > { %18894 = vmatprep.mubr.f32.mxu0 %v13625_v45  ;;  %18936 = vmatprep.mubr.f32.mxu1 %v13625_v45 }
 0x635   : > { %19754 = vmatpush3.bf16.msk.msra.mxu0 %vm20662_vm6, %v20409_v11  ;;  %19778 = vmatpush3.bf16.msk.msra.mxu1 %vm20601_vm4, %v20409_v11 }
 0x636   : > { %19780 = vmatprep.subr.msk.bf16.mxu0 %vm20662_vm6, %v20409_v11  ;;  %19804 = vmatprep.subr.msk.bf16.mxu1 %vm20601_vm4, %v20409_v11 }
 0x63b   : > { %18895 = vmatmul.mubr.f32.vlgmr.msra.gmra.mrb[26].mxu0 %v21566_v21  ;;  %18937 = vmatmul.mubr.f32.vlgmr.msra.gmra.mrb[26].mxu1 %v21566_v21 }
 0x63c   : > { %19782 = vmatpush3.bf16.msk.msra.mxu0 %vm20662_vm6, %v20409_v11  ;;  %19806 = vmatpush3.bf16.msk.msra.mxu1 %vm20601_vm4, %v20409_v11 }
 0x63d   : > { %18943 = vmatprep.mubr.f32.mxu0 %v14652_v2  ;;  %18985 = vmatprep.mubr.f32.mxu1 %v14652_v2 }
 0x63e   : > { %19784 = vmatprep.subr.bf16.mxu0 %v20737_v8  ;;  %19808 = vmatprep.subr.bf16.mxu1 %v20735_v5 }
 0x63f   : > { %18944 = vmatmul.mubr.f32.vlgmr.msra.gmra.mrb[28].mxu0 %v14662_v4  ;;  %18986 = vmatmul.mubr.f32.vlgmr.msra.gmra.mrb[28].mxu1 %v14662_v4 }
 0x640   : > { %19786 = vmatpush3.bf16.msra.mxu0 %v20737_v8  ;;  %19810 = vmatpush3.bf16.msra.mxu1 %v20735_v5 }
 0x641   : > { %18950 = vmatprep.mubr.f32.mxu0 %v21604_v20  ;;  %18992 = vmatprep.mubr.f32.mxu1 %v21604_v20 }
 0x642   : > { %19788 = vmatprep.subr.bf16.mxu0 %v20676_v55  ;;  %19812 = vmatprep.subr.bf16.mxu1 %v20630_v31 }
 0x647   : > { %18951 = vmatmul.mubr.f32.vlgmr.msra.gmra.mrb[28].mxu0 %v21606_v42  ;;  %18993 = vmatmul.mubr.f32.vlgmr.msra.gmra.mrb[28].mxu1 %v21606_v42 }
 0x648   : > { %19790 = vmatpush3.bf16.msra.mxu0 %v20676_v55  ;;  %19814 = vmatpush3.bf16.msra.mxu1 %v20630_v31 }
 0x649   : > { %18957 = vmatprep.mubr.f32.mxu0 %v14649_v54  ;;  %18999 = vmatprep.mubr.f32.mxu1 %v14649_v54 }
 0x64a   : > { %19792 = vmatprep.subr.msk.bf16.mxu0 %vm20662_vm6, %v20409_v11  ;;  %19816 = vmatprep.subr.msk.bf16.mxu1 %vm20601_vm4, %v20409_v11 }
 0x64f   : > { %18958 = vmatmul.mubr.f32.vlgmr.msra.gmra.mrb[28].mxu0 %v14659_v23  ;;  %19000 = vmatmul.mubr.f32.vlgmr.msra.gmra.mrb[28].mxu1 %v14659_v23 }
 0x650   : > { %19794 = vmatpush3.bf16.msk.msra.mxu0 %vm20662_vm6, %v20409_v11  ;;  %19818 = vmatpush3.bf16.msk.msra.mxu1 %vm20601_vm4, %v20409_v11 }
 0x651   : > { %18964 = vmatprep.mubr.f32.mxu0 %v14650_v60  ;;  %19006 = vmatprep.mubr.f32.mxu1 %v14650_v60 }
 0x652   : > { %19796 = vmatprep.subr.bf16.mxu0 %v20683_v57  ;;  %19820 = vmatprep.subr.bf16.mxu1 %v20644_v37 }
 0x657   : > { %18965 = vmatmul.mubr.f32.vlgmr.msra.gmra.mrb[28].mxu0 %v14660_v62  ;;  %19007 = vmatmul.mubr.f32.vlgmr.msra.gmra.mrb[28].mxu1 %v14660_v62 }
 0x658   : > { %19798 = vmatpush3.bf16.msra.mxu0 %v20683_v57  ;;  %19822 = vmatpush3.bf16.msra.mxu1 %v20644_v37 }
 0x659   : > { %18971 = vmatprep.mubr.f32.mxu0 %v21604_v20  ;;  %19013 = vmatprep.mubr.f32.mxu1 %v21604_v20 }
 0x65a   : > { %19800 = vmatprep.subr.msk.bf16.mxu0 %vm20662_vm6, %v20409_v11  ;;  %19824 = vmatprep.subr.msk.bf16.mxu1 %vm20601_vm4, %v20409_v11 }
 0x65f   : > { %18972 = vmatmul.mubr.f32.vlgmr.msra.gmra.mrb[28].mxu0 %v21606_v42  ;;  %19014 = vmatmul.mubr.f32.vlgmr.msra.gmra.mrb[28].mxu1 %v21606_v42 }
 0x660   : > { %19802 = vmatpush3.bf16.msk.msra.mxu0 %vm20662_vm6, %v20409_v11  ;;  %19826 = vmatpush3.bf16.msk.msra.mxu1 %vm20601_vm4, %v20409_v11 }
 0x661   : > { %18978 = vmatprep.mubr.f32.mxu0 %v21604_v20  ;;  %19020 = vmatprep.mubr.f32.mxu1 %v21604_v20 }
 0x662   : > { %19828 = vmatprep.subr.msk.bf16.mxu0 %vm20662_vm6, %v20409_v11  ;;  %19852 = vmatprep.subr.msk.bf16.mxu1 %vm20601_vm4, %v20409_v11 }
 0x667   : > { %18979 = vmatmul.mubr.f32.vlgmr.msra.gmra.mrb[28].mxu0 %v21606_v42  ;;  %19021 = vmatmul.mubr.f32.vlgmr.msra.gmra.mrb[28].mxu1 %v21606_v42 }
 0x668   : > { %19830 = vmatpush3.bf16.msk.msra.mxu0 %vm20662_vm6, %v20409_v11  ;;  %19027 = vmatprep.mubr.f32.mxu0 %v15676_v7 }
 0x669   : > { %19854 = vmatpush3.bf16.msk.msra.mxu1 %vm20601_vm4, %v20409_v11  ;;  %19069 = vmatprep.mubr.f32.mxu1 %v15676_v7 }
 0x66a   : > { %19832 = vmatprep.subr.bf16.mxu0 %v20737_v8  ;;  %19856 = vmatprep.subr.bf16.mxu1 %v20735_v5 }
 0x66b   : > { %19028 = vmatmul.mubr.f32.vlgmr.msra.gmra.mrb[30].mxu0 %v15686_v6 }
 0x66c   : > { %19070 = vmatmul.mubr.f32.vlgmr.msra.gmra.mrb[30].mxu1 %v15686_v6  ;;  %19034 = vmatprep.mubr.f32.mxu0 %v21670_v3 }
 0x66d   : > { %19076 = vmatprep.mubr.f32.mxu1 %v21670_v3  ;;  %19834 = vmatpush3.bf16.msra.mxu0 %v20737_v8 }
 0x66e   : > { %19858 = vmatpush3.bf16.msra.mxu1 %v20735_v5  ;;  %19836 = vmatprep.subr.bf16.mxu0 %v20676_v55 }
 0x66f   : > { %19860 = vmatprep.subr.bf16.mxu1 %v20630_v31 }
 0x673   : > { %19035 = vmatmul.mubr.f32.vlgmr.msra.gmra.mrb[30].mxu0 %v21674_v16 }
 0x674   : > { %19077 = vmatmul.mubr.f32.vlgmr.msra.gmra.mrb[30].mxu1 %v21674_v16  ;;  %19041 = vmatprep.mubr.f32.mxu0 %v15673_v17 }
 0x675   : > { %19083 = vmatprep.mubr.f32.mxu1 %v15673_v17  ;;  %19838 = vmatpush3.bf16.msra.mxu0 %v20676_v55 }
 0x676   : > { %19862 = vmatpush3.bf16.msra.mxu1 %v20630_v31  ;;  %19840 = vmatprep.subr.msk.bf16.mxu0 %vm20662_vm6, %v20409_v11  ;;  %v14061_v31 = vstv %s16950_s19 }
 0x677   : > { %19864 = vmatprep.subr.msk.bf16.mxu1 %vm20601_vm4, %v20409_v11 }
 0x67b   : > { %19042 = vmatmul.mubr.f32.vlgmr.msra.gmra.mrb[30].mxu0 %v15683_v22 }
 0x67c   : > { %19084 = vmatmul.mubr.f32.vlgmr.msra.gmra.mrb[30].mxu1 %v15683_v22  ;;  %19048 = vmatprep.mubr.f32.mxu0 %v15674_v24 }
 0x67d   : > { %19090 = vmatprep.mubr.f32.mxu1 %v15674_v24  ;;  %19842 = vmatpush3.bf16.msk.msra.mxu0 %vm20662_vm6, %v20409_v11 }
 0x67e   : > { %19866 = vmatpush3.bf16.msk.msra.mxu1 %vm20601_vm4, %v20409_v11  ;;  %19844 = vmatprep.subr.bf16.mxu0 %v20683_v57 }
 0x67f   : > { %19868 = vmatprep.subr.bf16.mxu1 %v20644_v37 }
 0x683   : > { %19049 = vmatmul.mubr.f32.vlgmr.msra.gmra.mrb[30].mxu0 %v15684_v25 }
 0x684   : > { %19091 = vmatmul.mubr.f32.vlgmr.msra.gmra.mrb[30].mxu1 %v15684_v25  ;;  %19055 = vmatprep.mubr.f32.mxu0 %v21670_v3 }
 0x685   : > { %19097 = vmatprep.mubr.f32.mxu1 %v21670_v3  ;;  %19846 = vmatpush3.bf16.msra.mxu0 %v20683_v57  ;;  %v14570_v57 = vstv %s16957_s21 }
 0x686   : > { %19870 = vmatpush3.bf16.msra.mxu1 %v20644_v37  ;;  %19848 = vmatprep.subr.msk.bf16.mxu0 %vm20662_vm6, %v20409_v11 }
 0x687   : > { %19872 = vmatprep.subr.msk.bf16.mxu1 %vm20601_vm4, %v20409_v11 }
 0x68b   : > { %19056 = vmatmul.mubr.f32.vlgmr.msra.gmra.mrb[30].mxu0 %v21674_v16 }
 0x68c   : > { %19098 = vmatmul.mubr.f32.vlgmr.msra.gmra.mrb[30].mxu1 %v21674_v16  ;;  %19062 = vmatprep.mubr.f32.mxu0 %v21670_v3 }
 0x68d   : > { %19104 = vmatprep.mubr.f32.mxu1 %v21670_v3  ;;  %19850 = vmatpush3.bf16.msk.msra.mxu0 %vm20662_vm6, %v20409_v11 }
 0x68e   : > { %19874 = vmatpush3.bf16.msk.msra.mxu1 %vm20601_vm4, %v20409_v11 }
 0x693   : > { %19063 = vmatmul.mubr.f32.vlgmr.msra.gmra.mrb[30].mxu0 %v21674_v16 }
 0x694   : > { %19105 = vmatmul.mubr.f32.vlgmr.msra.gmra.mrb[30].mxu1 %v21674_v16 }
 0x70e   : > { %v18896_v37 = vpop.f32.mrb[26].mxu0  ;;  %v18938_v55 = vpop.f32.mrb[26].mxu1 }
 0x70f   : > { %v14063_v5 = vmul.f32 %v18896_v37, %v14061_v31  ;;  %v14050_v8 = vpop.f32.mrb[27].mxu0  ;;  %v14558_v30 = vpop.f32.mrb[27].mxu1  ;;  %v14572_v34 = vmul.f32 %v18938_v55, %v14570_v57 }
 0x710   : > { %v14062_v32 = vmul.f32 %v14061_v31, %v14050_v8  ;;  %v14571_v11 = vmul.f32 %v14570_v57, %v14558_v30 }
 0x711   : > { %v14065_v47 = vadd.f32 %v14063_v5, %v21574_v38  ;;  %v16618_v38 = vstv %s16985_s4 }
 0x712   : > { %v14064_v19 = vadd.f32 %v14062_v32, %v21576_v40 }
 0x713   : > { %v14574_v36 = vadd.f32 %v14572_v34, %v14065_v47 }
 0x714   : > { %v14573_v61 = vadd.f32 %v14571_v11, %v14064_v19 }
 0x73a   : > { %v18980_v58 = vpop.f32.mrb[28].mxu0  ;;  %v19022_v10 = vpop.f32.mrb[28].mxu1 }
 0x73b   : > { %v15087_v18 = vmul.f32 %v18980_v58, %v15085_v9  ;;  %v15073_v21 = vpop.f32.mrb[29].mxu0  ;;  %v15582_v26 = vpop.f32.mrb[29].mxu1  ;;  %v15596_v35 = vmul.f32 %v19022_v10, %v15594_v15 }
 0x73c   : > { %v15086_v28 = vmul.f32 %v15085_v9, %v15073_v21  ;;  %v15595_v45 = vmul.f32 %v15594_v15, %v15582_v26 }
 0x73d   : > { %v15089_v33 = vadd.f32 %v15087_v18, %v14574_v36 }
 0x73e   : > { %v15088_v44 = vadd.f32 %v15086_v28, %v14573_v61 }
 0x73f   : > { %v15598_v46 = vadd.f32 %v15596_v35, %v15089_v33 }
 0x740   : > { %v15597_v52 = vadd.f32 %v15595_v45, %v15088_v44 }
 0x766   : > { %v19064_v59 = vpop.f32.mrb[30].mxu0 }
 0x767   : > { %v16111_v39 = vmul.f32 %v19064_v59, %v16109_v56  ;;  %v19106_v40 = vpop.f32.mrb[30].mxu1  ;;  %v16097_v41 = vpop.f32.mrb[31].mxu0 }
 0x768   : > { %v16110_v48 = vmul.f32 %v16109_v56, %v16097_v41  ;;  %v16606_v49 = vpop.f32.mrb[31].mxu1  ;;  %v16620_v51 = vmul.f32 %v19106_v40, %v16618_v38 }
 0x769   : > { %v16113_v50 = vadd.f32 %v16111_v39, %v15598_v46  ;;  %v16619_v53 = vmul.f32 %v16618_v38, %v16606_v49 }
 0x76a   : > { %v16112_v43 = vadd.f32 %v16110_v48, %v15597_v52 }
 0x76b   : > { %v16622_v20 = vadd.f32 %v16620_v51, %v16113_v50 }
 0x76c   : > { %v16621_v42 = vadd.f32 %v16619_v53, %v16112_v43 }
 0x76d   : > { %v16624_v54 = vmax.f32 %v21467_v14, %v16622_v20 }
 0x76e   : > { %v16623_v23 = vmax.f32 %v21464_v13, %v16621_v42 }
 0x76f   : > { %16987 = vst.msk [vmem:[%s21025_s9 + $0x38] sm:$0xff] %vm189_vm0, %v16624_v54 }
 0x770   : > { %16986 = vst.msk [vmem:[%s21025_s9 + $0x30] sm:$0xff] %vm189_vm0, %v16623_v23 }
 0x771   : > { %20330 = shalt.err (!%p20327_p13)
}
 0x772   : > { %s20331_s9 = scalar_lea.hbm %s21766_s14, 1024  ;;  %s20335_s19 = scalar_lea.hbm %s21824_s3, 2048 }
 0x773   : > { %p20332_p12 = scmp.ne.s32.totalorder %s21766_s14, %s20331_s9  ;;  %p20336_p6 = scmp.lt.u32.totalorder %s21766_s14, %s21824_s3 }
 0x774   : > { %p20337_p9 = scmp.lt.u32.totalorder %s20335_s19, %s20331_s9  ;;  %p20339_p2 = scmp.lt.u32.totalorder %s20331_s9, %s21766_s14 }
 0x775   : > { %p20333_p1 = pnand %p20332_p12, %p21837_p3 }
 0x776   : > { %p20338_p11 = por %p20337_p9, %p20336_p6 }
 0x777   : > { %p20334_p4 = pneg %p20333_p1 }
 0x778   : > { %p20340_p5 = por %p20339_p2, %p20338_p11 }
 0x77a   : > { %p20341_p8 = pnand %p20340_p5, %p20334_p4 }
 0x77c   : > { %20344 = shalt.err (!%p20341_p8)
}
 0x77d   : > { %s20411_s23 = smov 128   ;;  %s20412_s26 = smov 8  }
 0x77e   : > { %20197 = dma.vmem_to_hbm [thread:$0]  (%p21837_p3), %s21768_s25, 1024, %s21766_s14, %s16629_s28, %s20411_s23, %s20411_s23, %s20412_s26  }
 0x77f PF: > { %s16660_s4 = sand.u32 1, %s20381_s0   ;;  %p21838_p0 = scmp.ne.s32.totalorder %s21830_s13, 0 }
 0x780   : > { %p21839_p7 = scmp.ge.s32.totalorder %s20401_s30, 2  ;;  %s16661_s5 = scalar_lea.sflag [#allocation7], %s16660_s4 }
 0x782   : > { %p20204_p10 = pnand %p21839_p7, %p21838_p0 }
 0x784   : > { %20376 = dma.done.wait (!%p20204_p10), %s16661_s5, 1024  }
 0x785   : > { %20378 = vsyncadd (!%p20204_p10), %s16661_s5, 4294966272  ;;  %s27_s30 = sadd.s32 1, %s20401_s30   ;;  %s21840_s0 = smov %s20385_s1 }
 0x786   : > { %p24_p13 = scmp.ge.s32.totalorder %s27_s30, 4   ;;  %s21841_s1 = smov %s20389_s27 }
 0x787   : > { %s21842_s27 = smov %s20504_s12  ;;  %s21843_s28 = smov %s20397_s29 }
 0x788   : > { %s21844_s29 = smov %s21846_s6  ;;  %26 = sbr.rel (!%p24_p13) target bundleno = 28 (0x1c), region = 75 }
 0x78f   :  { %16666 = vsyncpa [#allocation6], 1 }
 0x790   :  { %16668 = vsyncpa [#allocation6 + $0x1], 1 }
 0x791   :  { %16669 = vsyncpa [#allocation7], 1 }
 0x792   :  { %16671 = vsyncpa [#allocation7 + $0x1], 1 }

</bundles_post_ra>
